<compile_context>
chip_gen: v5e
topology: v5e:2x2
jax: 0.10.0
libtpu: 0.0.40
codegen_flags: <defaults>
</compile_context>

<pallas_src>
import functools

import jax
import jax.numpy as jnp
import numpy as np
from jax.experimental import pallas as pl
from jax.experimental.pallas import tpu as pltpu

_BN_EPS = 1e-5
MATMUL_DTYPE = jnp.bfloat16     # MXU operand dtype (accumulation stays f32)
ACT_DTYPE = jnp.bfloat16        # inter-block activation storage dtype
_STAT_ROWS = 8                  # sublane-padded rows for the tiny stat outputs
_LANE = 128

_COMPILER_PARAMS = pltpu.CompilerParams(
    dimension_semantics=("parallel",),
    vmem_limit_bytes=48 * 1024 * 1024,
)


def _round_up(x, m):
    return (x + m - 1) // m * m


# ---------------------------------------------------------------------------
# Kernel 1: fused (3x3 pad=1  +  1x1) conv for one image + partial BN stats
# ---------------------------------------------------------------------------
def _conv_stats_kernel(x_ref, ss_ref, w_ref, z_ref, st_ref, *, H, W, C, F2):
    """x_ref : [1, H+2, W+2, C]  spatially zero-padded, channel-padded input
                                 (pre-BN activation of the previous stage, bf16)
       ss_ref: [8, C]            row0 = scale, row1 = shift of the folded
                                 previous BatchNorm (identity for block 0)
       w_ref : [9*C, F2]         packed conv weights, tap-major; the centre tap
                                 also carries the 1x1 weights in cols Fp:2Fp (bf16)
       z_ref : [H*W, F2]         raw conv outputs for this image (f32)
       st_ref: [1, 8, F2]        row0 = sum, row1 = sum-of-squares over the image
    """
    Hp, Wp = H + 2, W + 2
    x = x_ref[0].astype(jnp.float32)                       # [Hp, Wp, C]

    # Fold the previous block's BatchNorm: xn = x * scale + shift  (f32 VPU).
    scale = ss_ref[0:1, :].reshape(1, 1, C)
    shift = ss_ref[1:2, :].reshape(1, 1, C)
    xn = x * scale + shift

    # The conv's zero padding must stay zero AFTER the affine -> mask the halo.
    hh = jax.lax.broadcasted_iota(jnp.int32, (Hp, Wp, C), 0)
    ww = jax.lax.broadcasted_iota(jnp.int32, (Hp, Wp, C), 1)
    interior = (hh >= 1) & (hh <= H) & (ww >= 1) & (ww <= W)
    xn = jnp.where(interior, xn, 0.0)

    # 3x3 conv as 9 shifted-slice matmuls accumulated in f32 (bf16 MXU operands).
    # The centre tap (dy=dx=1) simultaneously computes the 1x1 branch because
    # the packed weight holds w1 in its Fp:2Fp columns (no conv biases: they are
    # cancelled exactly by the affine-free batch-stat BatchNorm that follows).
    acc = jnp.zeros((H * W, F2), jnp.float32)
    for dx in range(3):
        xs = xn[:, dx:dx + W, :]                           # [Hp, W, C]
        for dy in range(3):
            t = dy * 3 + dx
            tap = xs[dy:dy + H].reshape(H * W, C).astype(MATMUL_DTYPE)
            acc = acc + jnp.dot(tap, w_ref[t * C:(t + 1) * C, :],
                                preferred_element_type=jnp.float32)

    z_ref[...] = acc
    st_ref[...] = jnp.zeros_like(st_ref)
    st_ref[0:1, 0:1, :] = jnp.sum(acc, axis=0, keepdims=True)[None]
    st_ref[0:1, 1:2, :] = jnp.sum(acc * acc, axis=0, keepdims=True)[None]


# ---------------------------------------------------------------------------
# Kernel 2: BN both conv branches, relu, residual add, relu + partial stats
# ---------------------------------------------------------------------------
def _merge_stats_kernel(z_ref, ss_ref, r_ref, st_ref, *, F):
    """z_ref : [TP, 2F]  raw conv outputs (cols 0:F = 3x3 branch, F:2F = 1x1)
       ss_ref: [8, 2F]   row0 = scale, row1 = shift for BOTH branch BatchNorms
       r_ref : [TP, F]   pre-batch_norm1 activation (bf16, feeds the next block)
       st_ref: [1, 8, F] row0 = sum, row1 = sum-of-squares of r over this tile
    """
    z = z_ref[...]
    zn = z * ss_ref[0:1, :] + ss_ref[1:2, :]
    y = jnp.maximum(zn[:, :F], 0.0)        # conv2d_bn_3x3 (activation='relu')
    s = zn[:, F:]                          # conv2d_bn_1x1 (activation='None')
    r = jnp.maximum(y + s, 0.0)            # x += shortcut ; relu
    r_ref[...] = r.astype(r_ref.dtype)
    st_ref[...] = jnp.zeros_like(st_ref)
    st_ref[0:1, 0:1, :] = jnp.sum(r, axis=0, keepdims=True)[None]
    st_ref[0:1, 1:2, :] = jnp.sum(r * r, axis=0, keepdims=True)[None]


# ---------------------------------------------------------------------------
# Wrapper helpers
# ---------------------------------------------------------------------------
def _stats_to_affine(partial, count):
    """partial: [K, 8, C] per-tile (sum, sumsq) rows -> [8, C] (scale, shift)."""
    s = jnp.sum(partial.astype(jnp.float32), axis=0)
    mean = s[0] / count
    var = jnp.maximum(s[1] / count - mean * mean, 0.0)       # biased variance
    scale = jax.lax.rsqrt(var + _BN_EPS)
    shift = -mean * scale
    out = jnp.zeros_like(s)
    return out.at[0].set(scale).at[1].set(shift)


def _row_tile(p, cap=256):
    """Largest multiple-of-8 divisor of p that is <= cap (rows per K2 step)."""
    best, d = 8, 8
    while d <= min(p, cap):
        if p % d == 0:
            best = d
        d += 8
    return best


def _pack_weights(w1, w3, cin, cp, f, fp):
    """Pack [cin,f] 1x1 and [9*cin,f] 3x3 weights into one [9*cp, 2*fp] block.

    Columns 0:fp hold the 3x3 filter; columns fp:2*fp hold the 1x1 filter in the
    centre tap only.  Channel / filter padding is zero so padded lanes stay 0.
    """
    w3p = jnp.pad(w3.astype(jnp.float32).reshape(9, cin, f),
                  ((0, 0), (0, cp - cin), (0, fp - f)))
    w1p = jnp.pad(w1.astype(jnp.float32), ((0, cp - cin), (0, fp - f)))
    w1taps = jnp.zeros((9, cp, fp), jnp.float32).at[4].set(w1p)
    packed = jnp.concatenate([w3p, w1taps], axis=-1)          # [9, cp, 2fp]
    return packed.reshape(9 * cp, 2 * fp).astype(MATMUL_DTYPE)


def _respath_block(xpad, ss_in, wpk, n, h, w, cp, fp):
    """One Conv-BN respath block (conv1x1-BN shortcut, conv3x3-BN-relu, add,
    relu, batch_norm1).  Returns (r, ss_out): r is the pre-batch_norm1
    activation [n*h*w, fp] (bf16) and ss_out its [8, fp] BN affine so that
    batch_norm1(r) = r * ss_out[0] + ss_out[1]."""
    hw = h * w
    p = n * hw
    f2 = 2 * fp
    hp, wp = h + 2, w + 2
    assert hw % 8 == 0, "H*W must be a multiple of 8 for TPU tiling"

    # --- K1: conv (both branches) + per-image partial stats -----------------
    z, st1 = pl.pallas_call(
        functools.partial(_conv_stats_kernel, H=h, W=w, C=cp, F2=f2),
        grid=(n,),
        in_specs=[
            pl.BlockSpec((1, hp, wp, cp), lambda i: (i, 0, 0, 0)),
            pl.BlockSpec((_STAT_ROWS, cp), lambda i: (0, 0)),
            pl.BlockSpec((9 * cp, f2), lambda i: (0, 0)),
        ],
        out_specs=(
            pl.BlockSpec((hw, f2), lambda i: (i, 0)),
            pl.BlockSpec((1, _STAT_ROWS, f2), lambda i: (i, 0, 0)),
        ),
        out_shape=(
            jax.ShapeDtypeStruct((p, f2), jnp.float32),
            jax.ShapeDtypeStruct((n, _STAT_ROWS, f2), jnp.float32),
        ),
        compiler_params=_COMPILER_PARAMS,
    )(xpad, ss_in, wpk)
    ss1 = _stats_to_affine(st1, p)                            # [8, 2*fp]

    # --- K2: normalize, relu, residual add, relu + partial stats of r -------
    tp = _row_tile(p)
    nt = p // tp
    r, st2 = pl.pallas_call(
        functools.partial(_merge_stats_kernel, F=fp),
        grid=(nt,),
        in_specs=[
            pl.BlockSpec((tp, f2), lambda i: (i, 0)),
            pl.BlockSpec((_STAT_ROWS, f2), lambda i: (0, 0)),
        ],
        out_specs=(
            pl.BlockSpec((tp, fp), lambda i: (i, 0)),
            pl.BlockSpec((1, _STAT_ROWS, fp), lambda i: (i, 0, 0)),
        ),
        out_shape=(
            jax.ShapeDtypeStruct((p, fp), ACT_DTYPE),
            jax.ShapeDtypeStruct((nt, _STAT_ROWS, fp), jnp.float32),
        ),
        compiler_params=_COMPILER_PARAMS,
    )(z, ss1)
    ss2 = _stats_to_affine(st2, p)                            # [8, fp]
    return r, ss2


# ---------------------------------------------------------------------------
# Respath forward (mirrors the PyTorch control flow)
# ---------------------------------------------------------------------------
def respath_forward(x_nchw, params, respath_length):
    n, cin, h, w = x_nchw.shape
    f = params["w1_in"].shape[1]
    cp_in = _round_up(cin, _LANE)
    fp = _round_up(f, _LANE)

    # NCHW -> NHWC once, pad channels to a lane multiple, spatial zero-pad
    # (the conv's padding=1; re-applied between blocks).
    x = jnp.transpose(x_nchw, (0, 2, 3, 1))
    xpad = jnp.pad(x, ((0, 0), (1, 1), (1, 1), (0, cp_in - cin))).astype(ACT_DTYPE)

    # identity "previous BN" for the first block
    ss_id = jnp.zeros((_STAT_ROWS, cp_in), jnp.float32).at[0].set(1.0)

    w_in = _pack_weights(params["w1_in"], params["w3_in"], cin, cp_in, f, fp)
    r, ss2 = _respath_block(xpad, ss_id, w_in, n, h, w, cp_in, fp)

    if respath_length > 1:
        w_c = _pack_weights(params["w1_c"], params["w3_c"], f, fp, f, fp)
        for _ in range(respath_length):
            # The batch_norm1 ending the previous stage is folded into the next
            # K1 (normalize-on-load); only the spatial halo re-pad is done here.
            # TODO(synk): build the halo inside K1 from the unpadded activation
            # to also drop this small XLA pad copy per block.
            xpad = jnp.pad(r.reshape(n, h, w, fp), ((0, 0), (1, 1), (1, 1), (0, 0)))
            r, ss2 = _respath_block(xpad, ss2, w_c, n, h, w, fp, fp)

    # final batch_norm1, drop channel padding, back to NCHW
    out = r.astype(jnp.float32) * ss2[0] + ss2[1]
    out = out.reshape(n, h, w, fp)[..., :f]
    return jnp.transpose(out, (0, 3, 1, 2))


# ---------------------------------------------------------------------------
# Pure-jnp reference mirroring the kernel math (bf16 MXU operands, f32
# accumulation, batch-stat BN with biased var, eps=1e-5).  Conv biases ARE
# included here to demonstrate they are cancelled by the affine-free BN.
# ---------------------------------------------------------------------------
def _ref_forward(x_nchw, params, respath_length):
    n, cin, h, w = x_nchw.shape
    f = params["w1_in"].shape[1]
    p = n * h * w

    def bn_affine(t):
        m = jnp.mean(t, axis=0)
        v = jnp.maximum(jnp.mean(t * t, axis=0) - m * m, 0.0)
        sc = jax.lax.rsqrt(v + _BN_EPS)
        return sc, -m * sc

    def im2col(a):                          # a: [n, h+2, w+2, c] (padded)
        cols = [a[:, dy:dy + h, dx:dx + w, :]
                for dy in range(3) for dx in range(3)]
        return jnp.concatenate(cols, axis=-1).reshape(p, 9 * a.shape[-1])

    def block(a, w1, b1, w3, b3):
        # a: [n, h, w, c] conv input exactly as the MXU sees it (bf16)
        c = a.shape[-1]
        ap = jnp.pad(a, ((0, 0), (1, 1), (1, 1), (0, 0)))
        z3 = jnp.dot(im2col(ap), w3.astype(MATMUL_DTYPE),
                     preferred_element_type=jnp.float32) + b3
        z1 = jnp.dot(a.reshape(p, c), w1.astype(MATMUL_DTYPE),
                     preferred_element_type=jnp.float32) + b1
        sc3, sh3 = bn_affine(z3)
        sc1, sh1 = bn_affine(z1)
        y = jnp.maximum(z3 * sc3 + sh3, 0.0)      # conv2d_bn_3x3 -> relu
        s = z1 * sc1 + sh1                        # conv2d_bn_1x1
        r = jnp.maximum(y + s, 0.0)               # += shortcut ; relu
        sc2, sh2 = bn_affine(r)                   # batch_norm1 statistics
        return r.astype(ACT_DTYPE), sc2, sh2      # r stored bf16 like the kernel

    x = jnp.transpose(x_nchw, (0, 2, 3, 1)).astype(ACT_DTYPE)
    r, sc2, sh2 = block(x, params["w1_in"], params["b1_in"],
                        params["w3_in"], params["b3_in"])
    if respath_length > 1:
        for _ in range(respath_length):
            a = (r.astype(jnp.float32) * sc2 + sh2).astype(ACT_DTYPE)
            r, sc2, sh2 = block(a.reshape(n, h, w, f), params["w1_c"],
                                params["b1_c"], params["w3_c"], params["b3_c"])
    out = (r.astype(jnp.float32) * sc2 + sh2).reshape(n, h, w, f)
    return jnp.transpose(out, (0, 3, 1, 2))


# ---------------------------------------------------------------------------
# Deterministic parameter init (shapes match the torch module's __init__).
# Biases are kept only for the reference: the kernel drops them because they
# are cancelled exactly by the affine-free, batch-stat BatchNorm.
# ---------------------------------------------------------------------------
def init_params(key, input_features, filters):
    ks = jax.random.split(key, 8)
    scale_in = 1.0 / np.sqrt(input_features)
    scale_f = 1.0 / np.sqrt(filters)
    return {
        "w1_in": jax.random.normal(ks[0], (input_features, filters), jnp.float32) * scale_in,
        "b1_in": jax.random.normal(ks[1], (1, filters), jnp.float32) * 0.1,
        "w3_in": jax.random.normal(ks[2], (9 * input_features, filters), jnp.float32) * scale_in / 3.0,
        "b3_in": jax.random.normal(ks[3], (1, filters), jnp.float32) * 0.1,
        "w1_c": jax.random.normal(ks[4], (filters, filters), jnp.float32) * scale_f,
        "b1_c": jax.random.normal(ks[5], (1, filters), jnp.float32) * 0.1,
        "w3_c": jax.random.normal(ks[6], (9 * filters, filters), jnp.float32) * scale_f / 3.0,
        "b3_c": jax.random.normal(ks[7], (1, filters), jnp.float32) * 0.1,
    }


if __name__ == "__main__":
    key = jax.random.PRNGKey(0)
    k_x, k_p = jax.random.split(key)

    # small shapes: batch=2, in_channels=4, spatial=16x16, filters=8, length=2
    N, C_IN, H, W = 2, 4, 16, 16
    FILTERS = 8
    RESPATH_LENGTH = 2

    x = jax.random.normal(k_x, (N, C_IN, H, W), jnp.float32)   # NCHW like torch
    params = init_params(k_p, C_IN, FILTERS)

    fwd = jax.jit(functools.partial(respath_forward, respath_length=RESPATH_LENGTH))
    out = jax.block_until_ready(fwd(x, params))
    assert out.shape == (N, FILTERS, H, W), out.shape

    ref = jax.block_until_ready(_ref_forward(x, params, RESPATH_LENGTH))
    np.testing.assert_allclose(np.asarray(out), np.asarray(ref),
                               atol=5e-3, rtol=5e-3)

    print("KERNEL_OK")
</pallas_src>

<mosaic_0001>
module attributes {stable_mosaic.version = 11 : i64} {
  func.func @_conv_stats_kernel(%arg0: i32, %arg1: memref<1x18x18x128xbf16, #tpu.memory_space<vmem>>, %arg2: memref<8x128xf32, #tpu.memory_space<vmem>>, %arg3: memref<1152x256xbf16, #tpu.memory_space<vmem>>, %arg4: memref<256x256xf32, #tpu.memory_space<vmem>>, %arg5: memref<1x8x256xf32, #tpu.memory_space<vmem>>) attributes {dimension_semantics = [#tpu.dimension_semantics<parallel>], iteration_bounds = array<i64: 2>, scalar_prefetch = 0 : i64, scratch_operands = 0 : i64, tpu.core_type = #tpu.core_type<tc>, window_params = [{transform_indices = @transform_0, window_bounds = array<i64: 1, 18, 18, 128>}, {pipeline_mode = #tpu.pipeline_mode<synchronous>, transform_indices = @transform_1, window_bounds = array<i64: 8, 128>}, {pipeline_mode = #tpu.pipeline_mode<synchronous>, transform_indices = @transform_2, window_bounds = array<i64: 1152, 256>}, {transform_indices = @transform_3, window_bounds = array<i64: 256, 256>}, {transform_indices = @transform_4, window_bounds = array<i64: 1, 8, 256>}]} {
    %c0 = arith.constant 0 : index
    %c0_0 = arith.constant 0 : index
    %c0_1 = arith.constant 0 : index
    %c0_2 = arith.constant 0 : index
    %0 = vector.load %arg1[%c0, %c0_0, %c0_1, %c0_2] : memref<1x18x18x128xbf16, #tpu.memory_space<vmem>>, vector<1x18x18x128xbf16>
    %1 = vector.shape_cast %0 : vector<1x18x18x128xbf16> to vector<18x18x128xbf16>
    %2 = arith.extf %1 : vector<18x18x128xbf16> to vector<18x18x128xf32>
    %c0_3 = arith.constant 0 : index
    %c0_4 = arith.constant 0 : index
    %3 = vector.load %arg2[%c0_3, %c0_4] : memref<8x128xf32, #tpu.memory_space<vmem>>, vector<1x128xf32>
    %4 = vector.shape_cast %3 : vector<1x128xf32> to vector<1x1x128xf32>
    %c1 = arith.constant 1 : index
    %c0_5 = arith.constant 0 : index
    %5 = vector.load %arg2[%c1, %c0_5] : memref<8x128xf32, #tpu.memory_space<vmem>>, vector<1x128xf32>
    %6 = vector.shape_cast %5 : vector<1x128xf32> to vector<1x1x128xf32>
    %7 = vector.broadcast %4 : vector<1x1x128xf32> to vector<18x18x128xf32>
    %8 = arith.mulf %2, %7 : vector<18x18x128xf32>
    %9 = vector.broadcast %6 : vector<1x1x128xf32> to vector<18x18x128xf32>
    %10 = arith.addf %8, %9 : vector<18x18x128xf32>
    %11 = tpu.iota {dimensions = array<i32: 0>} : vector<18x18x128xi32>
    %12 = tpu.iota {dimensions = array<i32: 1>} : vector<18x18x128xi32>
    %c1_i32 = arith.constant 1 : i32
    %13 = vector.broadcast %c1_i32 : i32 to vector<18x18x128xi32>
    %14 = arith.cmpi sge, %11, %13 : vector<18x18x128xi32>
    %c16_i32 = arith.constant 16 : i32
    %15 = vector.broadcast %c16_i32 : i32 to vector<18x18x128xi32>
    %16 = arith.cmpi sle, %11, %15 : vector<18x18x128xi32>
    %17 = arith.andi %14, %16 : vector<18x18x128xi1>
    %c1_i32_6 = arith.constant 1 : i32
    %18 = vector.broadcast %c1_i32_6 : i32 to vector<18x18x128xi32>
    %19 = arith.cmpi sge, %12, %18 : vector<18x18x128xi32>
    %20 = arith.andi %17, %19 : vector<18x18x128xi1>
    %c16_i32_7 = arith.constant 16 : i32
    %21 = vector.broadcast %c16_i32_7 : i32 to vector<18x18x128xi32>
    %22 = arith.cmpi sle, %12, %21 : vector<18x18x128xi32>
    %23 = arith.andi %20, %22 : vector<18x18x128xi1>
    %cst = arith.constant 0.000000e+00 : f32
    %24 = vector.broadcast %cst : f32 to vector<18x18x128xf32>
    %25 = arith.select %23, %10, %24 : vector<18x18x128xi1>, vector<18x18x128xf32>
    %cst_8 = arith.constant 0.000000e+00 : f32
    %26 = vector.broadcast %cst_8 : f32 to vector<256x256xf32>
    %27 = vector.extract_strided_slice %25 {offsets = [0, 0, 0], sizes = [18, 16, 128], strides = [1, 1, 1]} : vector<18x18x128xf32> to vector<18x16x128xf32>
    %28 = vector.extract_strided_slice %27 {offsets = [0, 0, 0], sizes = [16, 16, 128], strides = [1, 1, 1]} : vector<18x16x128xf32> to vector<16x16x128xf32>
    %29 = vector.shape_cast %28 : vector<16x16x128xf32> to vector<256x128xf32>
    %30 = arith.truncf %29 : vector<256x128xf32> to vector<256x128xbf16>
    %c0_9 = arith.constant 0 : index
    %c0_10 = arith.constant 0 : index
    %31 = vector.load %arg3[%c0_9, %c0_10] : memref<1152x256xbf16, #tpu.memory_space<vmem>>, vector<128x256xbf16>
    %cst_11 = arith.constant dense<0.000000e+00> : vector<256x256xf32>
    %32 = tpu.matmul %30, %31, %cst_11 {dimension_numbers = #tpu.dot_dimension_numbers<[1], [0], [0], [1], [0, 0, 1, 1], [], []>} : vector<256x128xbf16>, vector<128x256xbf16>, vector<256x256xf32> -> vector<256x256xf32>
    %33 = arith.addf %26, %32 : vector<256x256xf32>
    %34 = vector.extract_strided_slice %27 {offsets = [1, 0, 0], sizes = [16, 16, 128], strides = [1, 1, 1]} : vector<18x16x128xf32> to vector<16x16x128xf32>
    %35 = vector.shape_cast %34 : vector<16x16x128xf32> to vector<256x128xf32>
    %36 = arith.truncf %35 : vector<256x128xf32> to vector<256x128xbf16>
    %c384 = arith.constant 384 : index
    %c0_12 = arith.constant 0 : index
    %37 = vector.load %arg3[%c384, %c0_12] : memref<1152x256xbf16, #tpu.memory_space<vmem>>, vector<128x256xbf16>
    %cst_13 = arith.constant dense<0.000000e+00> : vector<256x256xf32>
    %38 = tpu.matmul %36, %37, %cst_13 {dimension_numbers = #tpu.dot_dimension_numbers<[1], [0], [0], [1], [0, 0, 1, 1], [], []>} : vector<256x128xbf16>, vector<128x256xbf16>, vector<256x256xf32> -> vector<256x256xf32>
    %39 = arith.addf %33, %38 : vector<256x256xf32>
    %40 = vector.extract_strided_slice %27 {offsets = [2, 0, 0], sizes = [16, 16, 128], strides = [1, 1, 1]} : vector<18x16x128xf32> to vector<16x16x128xf32>
    %41 = vector.shape_cast %40 : vector<16x16x128xf32> to vector<256x128xf32>
    %42 = arith.truncf %41 : vector<256x128xf32> to vector<256x128xbf16>
    %c768 = arith.constant 768 : index
    %c0_14 = arith.constant 0 : index
    %43 = vector.load %arg3[%c768, %c0_14] : memref<1152x256xbf16, #tpu.memory_space<vmem>>, vector<128x256xbf16>
    %cst_15 = arith.constant dense<0.000000e+00> : vector<256x256xf32>
    %44 = tpu.matmul %42, %43, %cst_15 {dimension_numbers = #tpu.dot_dimension_numbers<[1], [0], [0], [1], [0, 0, 1, 1], [], []>} : vector<256x128xbf16>, vector<128x256xbf16>, vector<256x256xf32> -> vector<256x256xf32>
    %45 = arith.addf %39, %44 : vector<256x256xf32>
    %46 = vector.extract_strided_slice %25 {offsets = [0, 1, 0], sizes = [18, 16, 128], strides = [1, 1, 1]} : vector<18x18x128xf32> to vector<18x16x128xf32>
    %47 = vector.extract_strided_slice %46 {offsets = [0, 0, 0], sizes = [16, 16, 128], strides = [1, 1, 1]} : vector<18x16x128xf32> to vector<16x16x128xf32>
    %48 = vector.shape_cast %47 : vector<16x16x128xf32> to vector<256x128xf32>
    %49 = arith.truncf %48 : vector<256x128xf32> to vector<256x128xbf16>
    %c128 = arith.constant 128 : index
    %c0_16 = arith.constant 0 : index
    %50 = vector.load %arg3[%c128, %c0_16] : memref<1152x256xbf16, #tpu.memory_space<vmem>>, vector<128x256xbf16>
    %cst_17 = arith.constant dense<0.000000e+00> : vector<256x256xf32>
    %51 = tpu.matmul %49, %50, %cst_17 {dimension_numbers = #tpu.dot_dimension_numbers<[1], [0], [0], [1], [0, 0, 1, 1], [], []>} : vector<256x128xbf16>, vector<128x256xbf16>, vector<256x256xf32> -> vector<256x256xf32>
    %52 = arith.addf %45, %51 : vector<256x256xf32>
    %53 = vector.extract_strided_slice %46 {offsets = [1, 0, 0], sizes = [16, 16, 128], strides = [1, 1, 1]} : vector<18x16x128xf32> to vector<16x16x128xf32>
    %54 = vector.shape_cast %53 : vector<16x16x128xf32> to vector<256x128xf32>
    %55 = arith.truncf %54 : vector<256x128xf32> to vector<256x128xbf16>
    %c512 = arith.constant 512 : index
    %c0_18 = arith.constant 0 : index
    %56 = vector.load %arg3[%c512, %c0_18] : memref<1152x256xbf16, #tpu.memory_space<vmem>>, vector<128x256xbf16>
    %cst_19 = arith.constant dense<0.000000e+00> : vector<256x256xf32>
    %57 = tpu.matmul %55, %56, %cst_19 {dimension_numbers = #tpu.dot_dimension_numbers<[1], [0], [0], [1], [0, 0, 1, 1], [], []>} : vector<256x128xbf16>, vector<128x256xbf16>, vector<256x256xf32> -> vector<256x256xf32>
    %58 = arith.addf %52, %57 : vector<256x256xf32>
    %59 = vector.extract_strided_slice %46 {offsets = [2, 0, 0], sizes = [16, 16, 128], strides = [1, 1, 1]} : vector<18x16x128xf32> to vector<16x16x128xf32>
    %60 = vector.shape_cast %59 : vector<16x16x128xf32> to vector<256x128xf32>
    %61 = arith.truncf %60 : vector<256x128xf32> to vector<256x128xbf16>
    %c896 = arith.constant 896 : index
    %c0_20 = arith.constant 0 : index
    %62 = vector.load %arg3[%c896, %c0_20] : memref<1152x256xbf16, #tpu.memory_space<vmem>>, vector<128x256xbf16>
    %cst_21 = arith.constant dense<0.000000e+00> : vector<256x256xf32>
    %63 = tpu.matmul %61, %62, %cst_21 {dimension_numbers = #tpu.dot_dimension_numbers<[1], [0], [0], [1], [0, 0, 1, 1], [], []>} : vector<256x128xbf16>, vector<128x256xbf16>, vector<256x256xf32> -> vector<256x256xf32>
    %64 = arith.addf %58, %63 : vector<256x256xf32>
    %65 = vector.extract_strided_slice %25 {offsets = [0, 2, 0], sizes = [18, 16, 128], strides = [1, 1, 1]} : vector<18x18x128xf32> to vector<18x16x128xf32>
    %66 = vector.extract_strided_slice %65 {offsets = [0, 0, 0], sizes = [16, 16, 128], strides = [1, 1, 1]} : vector<18x16x128xf32> to vector<16x16x128xf32>
    %67 = vector.shape_cast %66 : vector<16x16x128xf32> to vector<256x128xf32>
    %68 = arith.truncf %67 : vector<256x128xf32> to vector<256x128xbf16>
    %c256 = arith.constant 256 : index
    %c0_22 = arith.constant 0 : index
    %69 = vector.load %arg3[%c256, %c0_22] : memref<1152x256xbf16, #tpu.memory_space<vmem>>, vector<128x256xbf16>
    %cst_23 = arith.constant dense<0.000000e+00> : vector<256x256xf32>
    %70 = tpu.matmul %68, %69, %cst_23 {dimension_numbers = #tpu.dot_dimension_numbers<[1], [0], [0], [1], [0, 0, 1, 1], [], []>} : vector<256x128xbf16>, vector<128x256xbf16>, vector<256x256xf32> -> vector<256x256xf32>
    %71 = arith.addf %64, %70 : vector<256x256xf32>
    %72 = vector.extract_strided_slice %65 {offsets = [1, 0, 0], sizes = [16, 16, 128], strides = [1, 1, 1]} : vector<18x16x128xf32> to vector<16x16x128xf32>
    %73 = vector.shape_cast %72 : vector<16x16x128xf32> to vector<256x128xf32>
    %74 = arith.truncf %73 : vector<256x128xf32> to vector<256x128xbf16>
    %c640 = arith.constant 640 : index
    %c0_24 = arith.constant 0 : index
    %75 = vector.load %arg3[%c640, %c0_24] : memref<1152x256xbf16, #tpu.memory_space<vmem>>, vector<128x256xbf16>
    %cst_25 = arith.constant dense<0.000000e+00> : vector<256x256xf32>
    %76 = tpu.matmul %74, %75, %cst_25 {dimension_numbers = #tpu.dot_dimension_numbers<[1], [0], [0], [1], [0, 0, 1, 1], [], []>} : vector<256x128xbf16>, vector<128x256xbf16>, vector<256x256xf32> -> vector<256x256xf32>
    %77 = arith.addf %71, %76 : vector<256x256xf32>
    %78 = vector.extract_strided_slice %65 {offsets = [2, 0, 0], sizes = [16, 16, 128], strides = [1, 1, 1]} : vector<18x16x128xf32> to vector<16x16x128xf32>
    %79 = vector.shape_cast %78 : vector<16x16x128xf32> to vector<256x128xf32>
    %80 = arith.truncf %79 : vector<256x128xf32> to vector<256x128xbf16>
    %c1024 = arith.constant 1024 : index
    %c0_26 = arith.constant 0 : index
    %81 = vector.load %arg3[%c1024, %c0_26] : memref<1152x256xbf16, #tpu.memory_space<vmem>>, vector<128x256xbf16>
    %cst_27 = arith.constant dense<0.000000e+00> : vector<256x256xf32>
    %82 = tpu.matmul %80, %81, %cst_27 {dimension_numbers = #tpu.dot_dimension_numbers<[1], [0], [0], [1], [0, 0, 1, 1], [], []>} : vector<256x128xbf16>, vector<128x256xbf16>, vector<256x256xf32> -> vector<256x256xf32>
    %83 = arith.addf %77, %82 : vector<256x256xf32>
    %c0_28 = arith.constant 0 : index
    %c0_29 = arith.constant 0 : index
    %84 = vector.load %arg4[%c0_28, %c0_29] : memref<256x256xf32, #tpu.memory_space<vmem>>, vector<256x256xf32>
    tpu.vector_store %arg4[%c0_28, %c0_29], %83 {strides = array<i32>} : memref<256x256xf32, #tpu.memory_space<vmem>>, vector<256x256xf32>,
    %cst_30 = arith.constant 0.000000e+00 : f32
    %85 = vector.broadcast %cst_30 : f32 to vector<1x8x256xf32>
    %c0_31 = arith.constant 0 : index
    %c0_32 = arith.constant 0 : index
    %c0_33 = arith.constant 0 : index
    %86 = vector.load %arg5[%c0_31, %c0_32, %c0_33] : memref<1x8x256xf32, #tpu.memory_space<vmem>>, vector<1x8x256xf32>
    tpu.vector_store %arg5[%c0_31, %c0_32, %c0_33], %85 {strides = array<i32>} : memref<1x8x256xf32, #tpu.memory_space<vmem>>, vector<1x8x256xf32>,
    %cst_34 = arith.constant dense<0.000000e+00> : vector<256xf32>
    %87 = vector.multi_reduction <add>, %83, %cst_34 [0] : vector<256x256xf32> to vector<256xf32>
    %88 = vector.shape_cast %87 : vector<256xf32> to vector<1x256xf32>
    %89 = vector.shape_cast %88 : vector<1x256xf32> to vector<1x1x256xf32>
    %c0_35 = arith.constant 0 : index
    %c0_36 = arith.constant 0 : index
    %c0_37 = arith.constant 0 : index
    %90 = vector.load %arg5[%c0_35, %c0_36, %c0_37] : memref<1x8x256xf32, #tpu.memory_space<vmem>>, vector<1x1x256xf32>
    tpu.vector_store %arg5[%c0_35, %c0_36, %c0_37], %89 {strides = array<i32>} : memref<1x8x256xf32, #tpu.memory_space<vmem>>, vector<1x1x256xf32>,
    %91 = arith.mulf %83, %83 : vector<256x256xf32>
    %cst_38 = arith.constant dense<0.000000e+00> : vector<256xf32>
    %92 = vector.multi_reduction <add>, %91, %cst_38 [0] : vector<256x256xf32> to vector<256xf32>
    %93 = vector.shape_cast %92 : vector<256xf32> to vector<1x256xf32>
    %94 = vector.shape_cast %93 : vector<1x256xf32> to vector<1x1x256xf32>
    %c0_39 = arith.constant 0 : index
    %c1_40 = arith.constant 1 : index
    %c0_41 = arith.constant 0 : index
    %95 = vector.load %arg5[%c0_39, %c1_40, %c0_41] : memref<1x8x256xf32, #tpu.memory_space<vmem>>, vector<1x1x256xf32>
    tpu.vector_store %arg5[%c0_39, %c1_40, %c0_41], %94 {strides = array<i32>} : memref<1x8x256xf32, #tpu.memory_space<vmem>>, vector<1x1x256xf32>,
    return
  }
  func.func @transform_0(%arg0: i32) -> (i32, i32, i32, i32) {
    %c0_i32 = arith.constant 0 : i32
    %c0_i32_0 = arith.constant 0 : i32
    %c0_i32_1 = arith.constant 0 : i32
    %c0_i32_2 = arith.constant 0 : i32
    return %arg0, %c0_i32, %c0_i32_0, %c0_i32_1 : i32, i32, i32, i32
  }
  func.func @transform_1(%arg0: i32) -> (i32, i32) {
    %c0_i32 = arith.constant 0 : i32
    %c0_i32_0 = arith.constant 0 : i32
    %c0_i32_1 = arith.constant 0 : i32
    return %c0_i32, %c0_i32_0 : i32, i32
  }
  func.func @transform_2(%arg0: i32) -> (i32, i32) {
    %c0_i32 = arith.constant 0 : i32
    %c0_i32_0 = arith.constant 0 : i32
    %c0_i32_1 = arith.constant 0 : i32
    return %c0_i32, %c0_i32_0 : i32, i32
  }
  func.func @transform_3(%arg0: i32) -> (i32, i32) {
    %c0_i32 = arith.constant 0 : i32
    %c0_i32_0 = arith.constant 0 : i32
    return %arg0, %c0_i32 : i32, i32
  }
  func.func @transform_4(%arg0: i32) -> (i32, i32, i32) {
    %c0_i32 = arith.constant 0 : i32
    %c0_i32_0 = arith.constant 0 : i32
    %c0_i32_1 = arith.constant 0 : i32
    return %arg0, %c0_i32, %c0_i32_0 : i32, i32, i32
  }
}

module attributes {stable_mosaic.version = 11 : i64} {
  func.func @_merge_stats_kernel(%arg0: i32, %arg1: memref<256x256xf32, #tpu.memory_space<vmem>>, %arg2: memref<8x256xf32, #tpu.memory_space<vmem>>, %arg3: memref<256x128xbf16, #tpu.memory_space<vmem>>, %arg4: memref<1x8x128xf32, #tpu.memory_space<vmem>>) attributes {dimension_semantics = [#tpu.dimension_semantics<parallel>], iteration_bounds = array<i64: 2>, scalar_prefetch = 0 : i64, scratch_operands = 0 : i64, tpu.core_type = #tpu.core_type<tc>, window_params = [{transform_indices = @transform_0, window_bounds = array<i64: 256, 256>}, {pipeline_mode = #tpu.pipeline_mode<synchronous>, transform_indices = @transform_1, window_bounds = array<i64: 8, 256>}, {transform_indices = @transform_2, window_bounds = array<i64: 256, 128>}, {transform_indices = @transform_3, window_bounds = array<i64: 1, 8, 128>}]} {
    %c0 = arith.constant 0 : index
    %c0_0 = arith.constant 0 : index
    %0 = vector.load %arg1[%c0, %c0_0] : memref<256x256xf32, #tpu.memory_space<vmem>>, vector<256x256xf32>
    %c0_1 = arith.constant 0 : index
    %c0_2 = arith.constant 0 : index
    %1 = vector.load %arg2[%c0_1, %c0_2] : memref<8x256xf32, #tpu.memory_space<vmem>>, vector<1x256xf32>
    %2 = vector.broadcast %1 : vector<1x256xf32> to vector<256x256xf32>
    %3 = arith.mulf %0, %2 : vector<256x256xf32>
    %c1 = arith.constant 1 : index
    %c0_3 = arith.constant 0 : index
    %4 = vector.load %arg2[%c1, %c0_3] : memref<8x256xf32, #tpu.memory_space<vmem>>, vector<1x256xf32>
    %5 = vector.broadcast %4 : vector<1x256xf32> to vector<256x256xf32>
    %6 = arith.addf %3, %5 : vector<256x256xf32>
    %7 = vector.extract_strided_slice %6 {offsets = [0, 0], sizes = [256, 128], strides = [1, 1]} : vector<256x256xf32> to vector<256x128xf32>
    %cst = arith.constant 0.000000e+00 : f32
    %8 = vector.broadcast %cst : f32 to vector<256x128xf32>
    %9 = arith.maximumf %7, %8 : vector<256x128xf32>
    %10 = vector.extract_strided_slice %6 {offsets = [0, 128], sizes = [256, 128], strides = [1, 1]} : vector<256x256xf32> to vector<256x128xf32>
    %11 = arith.addf %9, %10 : vector<256x128xf32>
    %cst_4 = arith.constant 0.000000e+00 : f32
    %12 = vector.broadcast %cst_4 : f32 to vector<256x128xf32>
    %13 = arith.maximumf %11, %12 : vector<256x128xf32>
    %14 = arith.truncf %13 : vector<256x128xf32> to vector<256x128xbf16>
    %c0_5 = arith.constant 0 : index
    %c0_6 = arith.constant 0 : index
    %15 = vector.load %arg3[%c0_5, %c0_6] : memref<256x128xbf16, #tpu.memory_space<vmem>>, vector<256x128xbf16>
    tpu.vector_store %arg3[%c0_5, %c0_6], %14 {strides = array<i32>} : memref<256x128xbf16, #tpu.memory_space<vmem>>, vector<256x128xbf16>,
    %cst_7 = arith.constant 0.000000e+00 : f32
    %16 = vector.broadcast %cst_7 : f32 to vector<1x8x128xf32>
    %c0_8 = arith.constant 0 : index
    %c0_9 = arith.constant 0 : index
    %c0_10 = arith.constant 0 : index
    %17 = vector.load %arg4[%c0_8, %c0_9, %c0_10] : memref<1x8x128xf32, #tpu.memory_space<vmem>>, vector<1x8x128xf32>
    tpu.vector_store %arg4[%c0_8, %c0_9, %c0_10], %16 {strides = array<i32>} : memref<1x8x128xf32, #tpu.memory_space<vmem>>, vector<1x8x128xf32>,
    %cst_11 = arith.constant dense<0.000000e+00> : vector<128xf32>
    %18 = vector.multi_reduction <add>, %13, %cst_11 [0] : vector<256x128xf32> to vector<128xf32>
    %19 = vector.shape_cast %18 : vector<128xf32> to vector<1x128xf32>
    %20 = vector.shape_cast %19 : vector<1x128xf32> to vector<1x1x128xf32>
    %c0_12 = arith.constant 0 : index
    %c0_13 = arith.constant 0 : index
    %c0_14 = arith.constant 0 : index
    %21 = vector.load %arg4[%c0_12, %c0_13, %c0_14] : memref<1x8x128xf32, #tpu.memory_space<vmem>>, vector<1x1x128xf32>
    tpu.vector_store %arg4[%c0_12, %c0_13, %c0_14], %20 {strides = array<i32>} : memref<1x8x128xf32, #tpu.memory_space<vmem>>, vector<1x1x128xf32>,
    %22 = arith.mulf %13, %13 : vector<256x128xf32>
    %cst_15 = arith.constant dense<0.000000e+00> : vector<128xf32>
    %23 = vector.multi_reduction <add>, %22, %cst_15 [0] : vector<256x128xf32> to vector<128xf32>
    %24 = vector.shape_cast %23 : vector<128xf32> to vector<1x128xf32>
    %25 = vector.shape_cast %24 : vector<1x128xf32> to vector<1x1x128xf32>
    %c0_16 = arith.constant 0 : index
    %c1_17 = arith.constant 1 : index
    %c0_18 = arith.constant 0 : index
    %26 = vector.load %arg4[%c0_16, %c1_17, %c0_18] : memref<1x8x128xf32, #tpu.memory_space<vmem>>, vector<1x1x128xf32>
    tpu.vector_store %arg4[%c0_16, %c1_17, %c0_18], %25 {strides = array<i32>} : memref<1x8x128xf32, #tpu.memory_space<vmem>>, vector<1x1x128xf32>,
    return
  }
  func.func @transform_0(%arg0: i32) -> (i32, i32) {
    %c0_i32 = arith.constant 0 : i32
    %c0_i32_0 = arith.constant 0 : i32
    return %arg0, %c0_i32 : i32, i32
  }
  func.func @transform_1(%arg0: i32) -> (i32, i32) {
    %c0_i32 = arith.constant 0 : i32
    %c0_i32_0 = arith.constant 0 : i32
    %c0_i32_1 = arith.constant 0 : i32
    return %c0_i32, %c0_i32_0 : i32, i32
  }
  func.func @transform_2(%arg0: i32) -> (i32, i32) {
    %c0_i32 = arith.constant 0 : i32
    %c0_i32_0 = arith.constant 0 : i32
    return %arg0, %c0_i32 : i32, i32
  }
  func.func @transform_3(%arg0: i32) -> (i32, i32, i32) {
    %c0_i32 = arith.constant 0 : i32
    %c0_i32_0 = arith.constant 0 : i32
    %c0_i32_1 = arith.constant 0 : i32
    return %arg0, %c0_i32, %c0_i32_0 : i32, i32, i32
  }
}

</mosaic_0001>

<bundles_post_ra>
// kernel: respath_forward.7
= control target key start
LH: loop header
LB: loop body
LE: loop exit
PB: predicated region body
PF: predicated region fallthrough
CT: control target
= control target key end

     0   :  { %s897_s12 = smov 0   ;;  %s1152_s0 = inlined_call_operand.vmem [shape: f32[512,256], index: 0, kind: input, shape index: {}]   ;;  %s1153_s1 = inlined_call_operand.vmem [shape: f32[8,256], index: 1, kind: input, shape index: {}]   ;;  %s1154_s2 = inlined_call_operand.vmem [shape: bf16[512,128], index: 2, kind: output, shape index: {0}]   ;;  %s1155_s3 = inlined_call_operand.vmem [shape: f32[2,8,128], index: 3, kind: output, shape index: {1}]  }
   0x1 LB: > { %s749_s13 = sadd.s32 4294967295, %s874_s12   ;;  %p753_p0 = scmp.ge.s32.totalorder %s874_s12, 1  ;;  %s874_s12 = sphi %s897_s12, %s14_s12  }
   0x2   : > { %p142_p1 = scmp.lt.s32.totalorder %s874_s12, 3 }
   0x4   : > { %p143_p2 = pnand %p753_p0, %p142_p1 }
   0x5   : > { %p184_p3 = scmp.lt.s32.totalorder (!%p143_p2), %s749_s13, 1  ;;  %s754_s14 = sshll.u32 (!%p143_p2), %s749_s13, 5 }
   0x6   : > { %146 = sbr.rel (%p143_p2) target bundleno = 121 (0x79), region = 28  ;;  %p172_p4 = scmp.lt.s32.totalorder (!%p143_p2), %s754_s14, 63 }
   0xb   : > { %v252_v0 = vld [vmem:[%s1153_s1] ss:$8 sm:$0x3]  ;;  %s1157_s13 = smov (!%p184_p3, %s749_s13), 1  ;;  %s1159_s14 = smov (!%p172_p4, %s754_s14), 63  ;;  %v876_v4 = vmov 0.0  }
   0xc   : > { %v760_v1 = vld [vmem:[%s1153_s1 + $0x1] ss:$8 sm:$0x3]  ;;  %s759_s19 = sshll.u32 %s1157_s13, 3  ;;  %v913_v2 = vperm.slane %v252_v0, 0  ;;  %v915_v3 = vperm.slane %v252_v0, 1 }
   0xd   : > { %s920_s22 = scalar_lea.vmem %s1155_s3, %s759_s19  ;;  %s763_s23 = sshll.u32 %s1159_s14, 4  ;;  %v929_v5 = vperm.slane %v760_v1, 0  ;;  %v931_v6 = vperm.slane %v760_v1, 1 }
   0xe   : > { %553 = vst [vmem:[%s920_s22] sm:$0xff] %v876_v4  ;;  %s927_s26 = scalar_lea.vmem %s1152_s0, %s763_s23  ;;  %s758_s27 = sshll.u32 %s1159_s14, 2 }
   0xf   : > { %v188_v7 = vld [vmem:[%s927_s26] sm:$0xff]  ;;  %v189_v8 = vld [vmem:[%s927_s26 + $0x8] sm:$0xff]  ;;  %v190_v9 = vld [vmem:[%s927_s26 + $0x10] sm:$0xff]  ;;  %s974_s30 = scalar_lea.vmem %s1154_s2, %s758_s27 }
  0x10   : > { %v191_v10 = vld [vmem:[%s927_s26 + $0x18] sm:$0xff]  ;;  %v258_v11 = vmul.f32 %v913_v2, %v188_v7  ;;  %v259_v12 = vmul.f32 %v915_v3, %v189_v8  ;;  %v260_v13 = vmul.f32 %v913_v2, %v190_v9  ;;  %v192_v14 = vld [vmem:[%s927_s26 + $0x20] sm:$0xff]  ;;  %v193_v15 = vld [vmem:[%s927_s26 + $0x28] sm:$0xff] }
  0x11   : > { %v261_v16 = vmul.f32 %v915_v3, %v191_v10  ;;  %v194_v17 = vld [vmem:[%s927_s26 + $0x30] sm:$0xff]  ;;  %v195_v18 = vld [vmem:[%s927_s26 + $0x38] sm:$0xff]  ;;  %v262_v19 = vmul.f32 %v913_v2, %v192_v14  ;;  %v263_v20 = vmul.f32 %v915_v3, %v193_v15  ;;  %v196_v21 = vld [vmem:[%s927_s26 + $0x40] sm:$0xff] }
  0x12   : > { %v329_v22 = vadd.f32 %v929_v5, %v258_v11  ;;  %v330_v23 = vadd.f32 %v931_v6, %v259_v12  ;;  %v331_v24 = vadd.f32 %v929_v5, %v260_v13  ;;  %v264_v25 = vmul.f32 %v913_v2, %v194_v17  ;;  %v197_v26 = vld [vmem:[%s927_s26 + $0x48] sm:$0xff]  ;;  %v198_v27 = vld [vmem:[%s927_s26 + $0x50] sm:$0xff]  ;;  %v199_v32 = vld [vmem:[%s927_s26 + $0x58] sm:$0xff] }
  0x13   : > { %v332_v28 = vadd.f32 %v931_v6, %v261_v16  ;;  %v265_v29 = vmul.f32 %v915_v3, %v195_v18  ;;  %v333_v30 = vadd.f32 %v929_v5, %v262_v19  ;;  %v334_v31 = vadd.f32 %v931_v6, %v263_v20  ;;  %v200_v45 = vld [vmem:[%s927_s26 + $0x60] sm:$0xff]  ;;  %v201_v57 = vld [vmem:[%s927_s26 + $0x68] sm:$0xff]  ;;  %v202_v58 = vld [vmem:[%s927_s26 + $0x70] sm:$0xff] }
  0x14   : > { %v393_v33 = vmax.f32 %v329_v22, 0.0  ;;  %v394_v34 = vmax.f32 %v331_v24, 0.0  ;;  %v335_v35 = vadd.f32 %v929_v5, %v264_v25  ;;  %v266_v36 = vmul.f32 %v913_v2, %v196_v21  ;;  %v203_v8 = vld [vmem:[%s927_s26 + $0x78] sm:$0xff]  ;;  %v204_v21 = vld [vmem:[%s927_s26 + $0x80] sm:$0xff]  ;;  %v205_v22 = vld [vmem:[%s927_s26 + $0x88] sm:$0xff] }
  0x15   : > { %v336_v37 = vadd.f32 %v931_v6, %v265_v29  ;;  %v395_v38 = vmax.f32 %v333_v30, 0.0  ;;  %v267_v39 = vmul.f32 %v915_v3, %v197_v26  ;;  %v268_v40 = vmul.f32 %v913_v2, %v198_v27 }
  0x16   : > { %v425_v41 = vadd.f32 %v393_v33, %v330_v23  ;;  %v426_v42 = vadd.f32 %v394_v34, %v332_v28  ;;  %v396_v43 = vmax.f32 %v335_v35, 0.0  ;;  %v269_v44 = vmul.f32 %v915_v3, %v199_v32  ;;  %v206_v23 = vld [vmem:[%s927_s26 + $0x90] sm:$0xff]  ;;  %v207_v28 = vld [vmem:[%s927_s26 + $0x98] sm:$0xff] }
  0x17   : > { %v427_v46 = vadd.f32 %v395_v38, %v334_v31  ;;  %v337_v47 = vadd.f32 %v929_v5, %v266_v36  ;;  %v338_v48 = vadd.f32 %v931_v6, %v267_v39  ;;  %v339_v49 = vadd.f32 %v929_v5, %v268_v40 }
  0x18   : > { %v457_v50 = vmax.f32 %v425_v41, 0.0  ;;  %v458_v51 = vmax.f32 %v426_v42, 0.0  ;;  %v428_v52 = vadd.f32 %v396_v43, %v336_v37  ;;  %v340_v53 = vadd.f32 %v931_v6, %v269_v44  ;;  %v208_v37 = vld [vmem:[%s927_s26 + $0xa0] sm:$0xff]  ;;  %v209_v42 = vld [vmem:[%s927_s26 + $0xa8] sm:$0xff] }
  0x19   : > { %v459_v54 = vmax.f32 %v427_v46, 0.0  ;;  %v397_v55 = vmax.f32 %v337_v47, 0.0  ;;  %v398_v56 = vmax.f32 %v339_v49, 0.0  ;;  %v270_v59 = vmul.f32 %v913_v2, %v200_v45  ;;  %v210_v47 = vld [vmem:[%s927_s26 + $0xb0] sm:$0xff] }
  0x1a   : > { %v767_v60 = vpack.c.bf16 %v458_v51, %v457_v50  ;;  %v554_v61 = vadd.f32 %v458_v51, %v457_v50  ;;  %v592_v62 = vmul.f32 %v457_v50, %v457_v50  ;;  %v593_v63 = vmul.f32 %v458_v51, %v458_v51 }
  0x1b   : > { %v460_v0 = vmax.f32 %v428_v52, 0.0  ;;  %v594_v1 = vmul.f32 %v459_v54, %v459_v54  ;;  %v429_v4 = vadd.f32 %v397_v55, %v338_v48  ;;  %v430_v7 = vadd.f32 %v398_v56, %v340_v53  ;;  %v211_v48 = vld [vmem:[%s927_s26 + $0xb8] sm:$0xff] }
  0x1c   : > { %768 = vst [vmem:[%s974_s30] sm:$0xff] %v767_v60   ;;  %v624_v9 = vadd.f32 %v593_v63, %v592_v62  ;;  %v555_v10 = vadd.f32 %v554_v61, %v459_v54  ;;  %v271_v11 = vmul.f32 %v915_v3, %v201_v57  ;;  %v272_v12 = vmul.f32 %v913_v2, %v202_v58 }
  0x1d   : > { %v772_v13 = vpack.c.bf16 %v460_v0, %v459_v54  ;;  %v595_v14 = vmul.f32 %v460_v0, %v460_v0  ;;  %v461_v15 = vmax.f32 %v429_v4, 0.0  ;;  %v462_v16 = vmax.f32 %v430_v7, 0.0 }
  0x1e   : > { %v556_v17 = vadd.f32 %v555_v10, %v460_v0  ;;  %v625_v18 = vadd.f32 %v624_v9, %v594_v1  ;;  %v273_v19 = vmul.f32 %v915_v3, %v203_v8  ;;  %v341_v20 = vadd.f32 %v929_v5, %v270_v59  ;;  %v212_v1 = vld [vmem:[%s927_s26 + $0xc0] sm:$0xff] }
  0x1f   : > { %844 = vst [vmem:[%s974_s30 + $0x8] sm:$0xff] %v772_v13   ;;  %v777_v24 = vpack.c.bf16 %v462_v16, %v461_v15  ;;  %v596_v25 = vmul.f32 %v461_v15, %v461_v15  ;;  %v597_v26 = vmul.f32 %v462_v16, %v462_v16  ;;  %v342_v27 = vadd.f32 %v931_v6, %v271_v11 }
  0x20   : > { %v626_v29 = vadd.f32 %v625_v18, %v595_v14  ;;  %v557_v30 = vadd.f32 %v556_v17, %v461_v15  ;;  %v343_v31 = vadd.f32 %v929_v5, %v272_v12  ;;  %v344_v32 = vadd.f32 %v931_v6, %v273_v19  ;;  %v213_v14 = vld [vmem:[%s927_s26 + $0xc8] sm:$0xff]  ;;  %v214_v18 = vld [vmem:[%s927_s26 + $0xd0] sm:$0xff]  ;;  %v215_v19 = vld [vmem:[%s927_s26 + $0xd8] sm:$0xff] }
  0x21   : > { %845 = vst [vmem:[%s974_s30 + $0x10] sm:$0xff] %v777_v24   ;;  %v399_v33 = vmax.f32 %v341_v20, 0.0  ;;  %v274_v34 = vmul.f32 %v913_v2, %v204_v21  ;;  %v275_v35 = vmul.f32 %v915_v3, %v205_v22  ;;  %v276_v36 = vmul.f32 %v913_v2, %v206_v23 }
  0x22   : > { %v558_v38 = vadd.f32 %v557_v30, %v462_v16  ;;  %v627_v39 = vadd.f32 %v626_v29, %v596_v25  ;;  %v400_v40 = vmax.f32 %v343_v31, 0.0  ;;  %v277_v41 = vmul.f32 %v915_v3, %v207_v28  ;;  %v216_v29 = vld [vmem:[%s927_s26 + $0xe0] sm:$0xff] }
  0x23   : > { %v431_v43 = vadd.f32 %v399_v33, %v342_v27  ;;  %v345_v44 = vadd.f32 %v929_v5, %v274_v34  ;;  %v346_v45 = vadd.f32 %v931_v6, %v275_v35  ;;  %v347_v46 = vadd.f32 %v929_v5, %v276_v36 }
  0x24   : > { %v628_v49 = vadd.f32 %v627_v39, %v597_v26  ;;  %v432_v50 = vadd.f32 %v400_v40, %v344_v32  ;;  %v348_v51 = vadd.f32 %v931_v6, %v277_v41  ;;  %v278_v52 = vmul.f32 %v913_v2, %v208_v37  ;;  %v218_v39 = vld [vmem:[%s927_s26 + $0xf0] sm:$0xff] }
  0x25   : > { %v463_v53 = vmax.f32 %v431_v43, 0.0  ;;  %v401_v54 = vmax.f32 %v345_v44, 0.0  ;;  %v402_v55 = vmax.f32 %v347_v46, 0.0  ;;  %v279_v56 = vmul.f32 %v915_v3, %v209_v42  ;;  %v219_v43 = vld [vmem:[%s927_s26 + $0xf8] sm:$0xff] }
  0x26   : > { %v464_v57 = vmax.f32 %v432_v50, 0.0  ;;  %v280_v58 = vmul.f32 %v913_v2, %v210_v47  ;;  %v281_v59 = vmul.f32 %v915_v3, %v211_v48  ;;  %v349_v60 = vadd.f32 %v929_v5, %v278_v52 }
  0x27   : > { %v559_v61 = vadd.f32 %v558_v38, %v463_v53  ;;  %v598_v62 = vmul.f32 %v463_v53, %v463_v53  ;;  %v433_v63 = vadd.f32 %v401_v54, %v346_v45  ;;  %v434_v0 = vadd.f32 %v402_v55, %v348_v51  ;;  %v217_v38 = vld [vmem:[%s927_s26 + $0xe8] sm:$0xff] }
  0x28   : > { %v782_v4 = vpack.c.bf16 %v464_v57, %v463_v53  ;;  %v599_v7 = vmul.f32 %v464_v57, %v464_v57  ;;  %v350_v8 = vadd.f32 %v931_v6, %v279_v56  ;;  %v351_v9 = vadd.f32 %v929_v5, %v280_v58  ;;  %v220_v53 = vld [vmem:[%s927_s26 + $0x100] sm:$0xff]  ;;  %v221_v58 = vld [vmem:[%s927_s26 + $0x108] sm:$0xff] }
  0x29   : > { %v560_v10 = vadd.f32 %v559_v61, %v464_v57  ;;  %v629_v11 = vadd.f32 %v628_v49, %v598_v62  ;;  %v465_v12 = vmax.f32 %v433_v63, 0.0  ;;  %v466_v13 = vmax.f32 %v434_v0, 0.0  ;;  %v222_v63 = vld [vmem:[%s927_s26 + $0x110] sm:$0xff]  ;;  %v223_v0 = vld [vmem:[%s927_s26 + $0x118] sm:$0xff] }
  0x2a   : > { %846 = vst [vmem:[%s974_s30 + $0x18] sm:$0xff] %v782_v4   ;;  %v352_v15 = vadd.f32 %v931_v6, %v281_v59  ;;  %v403_v16 = vmax.f32 %v349_v60, 0.0  ;;  %v404_v17 = vmax.f32 %v351_v9, 0.0  ;;  %v282_v20 = vmul.f32 %v913_v2, %v212_v1 }
  0x2b   : > { %v630_v21 = vadd.f32 %v629_v11, %v599_v7  ;;  %v787_v22 = vpack.c.bf16 %v466_v13, %v465_v12  ;;  %v561_v23 = vadd.f32 %v560_v10, %v465_v12  ;;  %v600_v24 = vmul.f32 %v465_v12, %v465_v12 }
  0x2c   : > { %v601_v25 = vmul.f32 %v466_v13, %v466_v13  ;;  %v435_v26 = vadd.f32 %v403_v16, %v350_v8  ;;  %v436_v27 = vadd.f32 %v404_v17, %v352_v15  ;;  %v283_v28 = vmul.f32 %v915_v3, %v213_v14 }
  0x2d   : > { %847 = vst [vmem:[%s974_s30 + $0x20] sm:$0xff] %v787_v22   ;;  %v562_v30 = vadd.f32 %v561_v23, %v466_v13  ;;  %v631_v31 = vadd.f32 %v630_v21, %v600_v24  ;;  %v284_v32 = vmul.f32 %v913_v2, %v214_v18  ;;  %v285_v33 = vmul.f32 %v915_v3, %v215_v19  ;;  %v224_v21 = vld [vmem:[%s927_s26 + $0x120] sm:$0xff] }
  0x2e   : > { %v467_v34 = vmax.f32 %v435_v26, 0.0  ;;  %v468_v35 = vmax.f32 %v436_v27, 0.0  ;;  %v353_v36 = vadd.f32 %v929_v5, %v282_v20  ;;  %v354_v37 = vadd.f32 %v931_v6, %v283_v28  ;;  %v225_v26 = vld [vmem:[%s927_s26 + $0x128] sm:$0xff] }
  0x2f   : > { %v632_v40 = vadd.f32 %v631_v31, %v601_v25  ;;  %v355_v41 = vadd.f32 %v929_v5, %v284_v32  ;;  %v356_v42 = vadd.f32 %v931_v6, %v285_v33  ;;  %v286_v44 = vmul.f32 %v913_v2, %v216_v29  ;;  %v226_v31 = vld [vmem:[%s927_s26 + $0x130] sm:$0xff] }
  0x30   : > { %v792_v45 = vpack.c.bf16 %v468_v35, %v467_v34  ;;  %v563_v46 = vadd.f32 %v562_v30, %v467_v34  ;;  %v602_v47 = vmul.f32 %v467_v34, %v467_v34  ;;  %v603_v48 = vmul.f32 %v468_v35, %v468_v35 }
  0x31   : > { %v405_v49 = vmax.f32 %v353_v36, 0.0  ;;  %v406_v50 = vmax.f32 %v355_v41, 0.0  ;;  %v287_v51 = vmul.f32 %v915_v3, %v217_v38  ;;  %v288_v52 = vmul.f32 %v913_v2, %v218_v39 }
  0x32   : > { %848 = vst [vmem:[%s974_s30 + $0x28] sm:$0xff] %v792_v45   ;;  %v564_v54 = vadd.f32 %v563_v46, %v468_v35  ;;  %v633_v55 = vadd.f32 %v632_v40, %v602_v47  ;;  %v289_v56 = vmul.f32 %v915_v3, %v219_v43  ;;  %v357_v57 = vadd.f32 %v929_v5, %v286_v44  ;;  %v227_v35 = vld [vmem:[%s927_s26 + $0x138] sm:$0xff] }
  0x33   : > { %v437_v59 = vadd.f32 %v405_v49, %v354_v37  ;;  %v438_v60 = vadd.f32 %v406_v50, %v356_v42  ;;  %v358_v61 = vadd.f32 %v931_v6, %v287_v51  ;;  %v359_v62 = vadd.f32 %v929_v5, %v288_v52 }
  0x34   : > { %v634_v1 = vadd.f32 %v633_v55, %v603_v48  ;;  %v360_v4 = vadd.f32 %v931_v6, %v289_v56  ;;  %v407_v7 = vmax.f32 %v357_v57, 0.0  ;;  %v290_v8 = vmul.f32 %v913_v2, %v220_v53  ;;  %v228_v53 = vld [vmem:[%s927_s26 + $0x140] sm:$0xff] }
  0x35   : > { %v469_v9 = vmax.f32 %v437_v59, 0.0  ;;  %v470_v10 = vmax.f32 %v438_v60, 0.0  ;;  %v408_v11 = vmax.f32 %v359_v62, 0.0  ;;  %v291_v12 = vmul.f32 %v915_v3, %v221_v58  ;;  %v230_v59 = vld [vmem:[%s927_s26 + $0x150] sm:$0xff]  ;;  %v231_v60 = vld [vmem:[%s927_s26 + $0x158] sm:$0xff] }
  0x36   : > { %v439_v13 = vadd.f32 %v407_v7, %v358_v61  ;;  %v292_v14 = vmul.f32 %v913_v2, %v222_v63  ;;  %v293_v15 = vmul.f32 %v915_v3, %v223_v0  ;;  %v361_v16 = vadd.f32 %v929_v5, %v290_v8 }
  0x37   : > { %v797_v17 = vpack.c.bf16 %v470_v10, %v469_v9  ;;  %v565_v18 = vadd.f32 %v564_v54, %v469_v9  ;;  %v604_v19 = vmul.f32 %v469_v9, %v469_v9  ;;  %v605_v20 = vmul.f32 %v470_v10, %v470_v10  ;;  %v229_v54 = vld [vmem:[%s927_s26 + $0x148] sm:$0xff] }
  0x38   : > { %v440_v22 = vadd.f32 %v408_v11, %v360_v4  ;;  %v471_v23 = vmax.f32 %v439_v13, 0.0  ;;  %v362_v24 = vadd.f32 %v931_v6, %v291_v12  ;;  %v363_v25 = vadd.f32 %v929_v5, %v292_v14  ;;  %v233_v14 = vld [vmem:[%s927_s26 + $0x168] sm:$0xff] }
  0x39   : > { %849 = vst [vmem:[%s974_s30 + $0x30] sm:$0xff] %v797_v17   ;;  %v566_v27 = vadd.f32 %v565_v18, %v470_v10  ;;  %v635_v28 = vadd.f32 %v634_v1, %v604_v19  ;;  %v364_v29 = vadd.f32 %v931_v6, %v293_v15  ;;  %v409_v30 = vmax.f32 %v361_v16, 0.0  ;;  %v232_v1 = vld [vmem:[%s927_s26 + $0x160] sm:$0xff]  ;;  %v234_v15 = vld [vmem:[%s927_s26 + $0x170] sm:$0xff]  ;;  %v235_v16 = vld [vmem:[%s927_s26 + $0x178] sm:$0xff] }
  0x3a   : > { %v472_v32 = vmax.f32 %v440_v22, 0.0  ;;  %v606_v33 = vmul.f32 %v471_v23, %v471_v23  ;;  %v410_v34 = vmax.f32 %v363_v25, 0.0  ;;  %v294_v36 = vmul.f32 %v913_v2, %v224_v21 }
  0x3b   : > { %v636_v37 = vadd.f32 %v635_v28, %v605_v20  ;;  %v567_v38 = vadd.f32 %v566_v27, %v471_v23  ;;  %v441_v39 = vadd.f32 %v409_v30, %v362_v24  ;;  %v295_v40 = vmul.f32 %v915_v3, %v225_v26 }
  0x3c   : > { %v802_v41 = vpack.c.bf16 %v472_v32, %v471_v23  ;;  %v607_v42 = vmul.f32 %v472_v32, %v472_v32  ;;  %v442_v43 = vadd.f32 %v410_v34, %v364_v29  ;;  %v296_v44 = vmul.f32 %v913_v2, %v226_v31 }
  0x3d   : > { %v568_v45 = vadd.f32 %v567_v38, %v472_v32  ;;  %v637_v46 = vadd.f32 %v636_v37, %v606_v33  ;;  %v473_v47 = vmax.f32 %v441_v39, 0.0  ;;  %v297_v48 = vmul.f32 %v915_v3, %v227_v35  ;;  %v236_v33 = vld [vmem:[%s927_s26 + $0x180] sm:$0xff]  ;;  %v237_v38 = vld [vmem:[%s927_s26 + $0x188] sm:$0xff]  ;;  %v238_v39 = vld [vmem:[%s927_s26 + $0x190] sm:$0xff] }
  0x3e   : > { %850 = vst [vmem:[%s974_s30 + $0x38] sm:$0xff] %v802_v41   ;;  %v474_v49 = vmax.f32 %v442_v43, 0.0  ;;  %v365_v50 = vadd.f32 %v929_v5, %v294_v36  ;;  %v366_v51 = vadd.f32 %v931_v6, %v295_v40  ;;  %v367_v52 = vadd.f32 %v929_v5, %v296_v44 }
  0x3f   : > { %v638_v55 = vadd.f32 %v637_v46, %v607_v42  ;;  %v569_v56 = vadd.f32 %v568_v45, %v473_v47  ;;  %v608_v57 = vmul.f32 %v473_v47, %v473_v47  ;;  %v368_v58 = vadd.f32 %v931_v6, %v297_v48 }
  0x40   : > { %v807_v61 = vpack.c.bf16 %v474_v49, %v473_v47  ;;  %v609_v62 = vmul.f32 %v474_v49, %v474_v49  ;;  %v411_v63 = vmax.f32 %v365_v50, 0.0  ;;  %v412_v0 = vmax.f32 %v367_v52, 0.0  ;;  %v239_v47 = vld [vmem:[%s927_s26 + $0x198] sm:$0xff] }
  0x41   : > { %v570_v4 = vadd.f32 %v569_v56, %v474_v49  ;;  %v639_v7 = vadd.f32 %v638_v55, %v608_v57  ;;  %v298_v8 = vmul.f32 %v913_v2, %v228_v53  ;;  %v299_v9 = vmul.f32 %v915_v3, %v229_v54 }
  0x42   : > { %851 = vst [vmem:[%s974_s30 + $0x40] sm:$0xff] %v807_v61   ;;  %v443_v10 = vadd.f32 %v411_v63, %v366_v51  ;;  %v444_v11 = vadd.f32 %v412_v0, %v368_v58  ;;  %v300_v12 = vmul.f32 %v913_v2, %v230_v59  ;;  %v301_v13 = vmul.f32 %v915_v3, %v231_v60  ;;  %v240_v61 = vld [vmem:[%s927_s26 + $0x1a0] sm:$0xff] }
  0x43   : > { %v640_v17 = vadd.f32 %v639_v7, %v609_v62  ;;  %v369_v18 = vadd.f32 %v929_v5, %v298_v8  ;;  %v370_v19 = vadd.f32 %v931_v6, %v299_v9  ;;  %v302_v20 = vmul.f32 %v913_v2, %v232_v1  ;;  %v241_v62 = vld [vmem:[%s927_s26 + $0x1a8] sm:$0xff] }
  0x44   : > { %v475_v21 = vmax.f32 %v443_v10, 0.0  ;;  %v476_v22 = vmax.f32 %v444_v11, 0.0  ;;  %v371_v23 = vadd.f32 %v929_v5, %v300_v12  ;;  %v372_v24 = vadd.f32 %v931_v6, %v301_v13  ;;  %v242_v11 = vld [vmem:[%s927_s26 + $0x1b0] sm:$0xff]  ;;  %v243_v12 = vld [vmem:[%s927_s26 + $0x1b8] sm:$0xff] }
  0x45   : > { %v413_v25 = vmax.f32 %v369_v18, 0.0  ;;  %v303_v26 = vmul.f32 %v915_v3, %v233_v14  ;;  %v304_v27 = vmul.f32 %v913_v2, %v234_v15  ;;  %v305_v28 = vmul.f32 %v915_v3, %v235_v16 }
  0x46   : > { %v812_v29 = vpack.c.bf16 %v476_v22, %v475_v21  ;;  %v571_v30 = vadd.f32 %v570_v4, %v475_v21  ;;  %v610_v31 = vmul.f32 %v475_v21, %v475_v21  ;;  %v611_v32 = vmul.f32 %v476_v22, %v476_v22 }
  0x47   : > { %v414_v34 = vmax.f32 %v371_v23, 0.0  ;;  %v445_v35 = vadd.f32 %v413_v25, %v370_v19  ;;  %v373_v36 = vadd.f32 %v929_v5, %v302_v20  ;;  %v374_v37 = vadd.f32 %v931_v6, %v303_v26  ;;  %v244_v25 = vld [vmem:[%s927_s26 + $0x1c0] sm:$0xff]  ;;  %v245_v26 = vld [vmem:[%s927_s26 + $0x1c8] sm:$0xff] }
  0x48   : > { %852 = vst [vmem:[%s974_s30 + $0x48] sm:$0xff] %v812_v29   ;;  %v572_v40 = vadd.f32 %v571_v30, %v476_v22  ;;  %v641_v41 = vadd.f32 %v640_v17, %v610_v31  ;;  %v375_v42 = vadd.f32 %v929_v5, %v304_v27  ;;  %v376_v43 = vadd.f32 %v931_v6, %v305_v28 }
  0x49   : > { %v446_v44 = vadd.f32 %v414_v34, %v372_v24  ;;  %v477_v45 = vmax.f32 %v445_v35, 0.0  ;;  %v415_v46 = vmax.f32 %v373_v36, 0.0  ;;  %v306_v48 = vmul.f32 %v913_v2, %v236_v33  ;;  %v246_v35 = vld [vmem:[%s927_s26 + $0x1d0] sm:$0xff]  ;;  %v247_v36 = vld [vmem:[%s927_s26 + $0x1d8] sm:$0xff] }
  0x4a   : > { %v642_v49 = vadd.f32 %v641_v41, %v611_v32  ;;  %v416_v50 = vmax.f32 %v375_v42, 0.0  ;;  %v307_v51 = vmul.f32 %v915_v3, %v237_v38  ;;  %v308_v52 = vmul.f32 %v913_v2, %v238_v39 }
  0x4b   : > { %v478_v53 = vmax.f32 %v446_v44, 0.0  ;;  %v573_v54 = vadd.f32 %v572_v40, %v477_v45  ;;  %v612_v55 = vmul.f32 %v477_v45, %v477_v45  ;;  %v447_v56 = vadd.f32 %v415_v46, %v374_v37 }
  0x4c   : > { %v448_v57 = vadd.f32 %v416_v50, %v376_v43  ;;  %v309_v58 = vmul.f32 %v915_v3, %v239_v47  ;;  %v377_v59 = vadd.f32 %v929_v5, %v306_v48  ;;  %v378_v60 = vadd.f32 %v931_v6, %v307_v51 }
  0x4d   : > { %v817_v63 = vpack.c.bf16 %v478_v53, %v477_v45  ;;  %v574_v0 = vadd.f32 %v573_v54, %v478_v53  ;;  %v613_v1 = vmul.f32 %v478_v53, %v478_v53  ;;  %v643_v4 = vadd.f32 %v642_v49, %v612_v55  ;;  %v248_v49 = vld [vmem:[%s927_s26 + $0x1e0] sm:$0xff] }
  0x4e   : > { %v479_v7 = vmax.f32 %v447_v56, 0.0  ;;  %v480_v8 = vmax.f32 %v448_v57, 0.0  ;;  %v379_v9 = vadd.f32 %v929_v5, %v308_v52  ;;  %v380_v10 = vadd.f32 %v931_v6, %v309_v58  ;;  %v249_v58 = vld [vmem:[%s927_s26 + $0x1e8] sm:$0xff] }
  0x4f   : > { %853 = vst [vmem:[%s974_s30 + $0x50] sm:$0xff] %v817_v63   ;;  %v644_v13 = vadd.f32 %v643_v4, %v613_v1  ;;  %v417_v14 = vmax.f32 %v377_v59, 0.0  ;;  %v310_v15 = vmul.f32 %v913_v2, %v240_v61  ;;  %v311_v16 = vmul.f32 %v915_v3, %v241_v62  ;;  %v250_v59 = vld [vmem:[%s927_s26 + $0x1f0] sm:$0xff] }
  0x50   : > { %v822_v17 = vpack.c.bf16 %v480_v8, %v479_v7  ;;  %v575_v18 = vadd.f32 %v574_v0, %v479_v7  ;;  %v614_v19 = vmul.f32 %v479_v7, %v479_v7  ;;  %v615_v20 = vmul.f32 %v480_v8, %v480_v8 }
  0x51   : > { %v418_v21 = vmax.f32 %v379_v9, 0.0  ;;  %v449_v22 = vadd.f32 %v417_v14, %v378_v60  ;;  %v312_v23 = vmul.f32 %v913_v2, %v242_v11  ;;  %v313_v24 = vmul.f32 %v915_v3, %v243_v12  ;;  %v251_v60 = vld [vmem:[%s927_s26 + $0x1f8] sm:$0xff] }
  0x52   : > { %854 = vst [vmem:[%s974_s30 + $0x58] sm:$0xff] %v822_v17   ;;  %v576_v27 = vadd.f32 %v575_v18, %v480_v8  ;;  %v645_v28 = vadd.f32 %v644_v13, %v614_v19  ;;  %v381_v29 = vadd.f32 %v929_v5, %v310_v15  ;;  %v382_v30 = vadd.f32 %v931_v6, %v311_v16 }
  0x53   : > { %v450_v31 = vadd.f32 %v418_v21, %v380_v10  ;;  %v481_v32 = vmax.f32 %v449_v22, 0.0  ;;  %v383_v33 = vadd.f32 %v929_v5, %v312_v23  ;;  %v384_v34 = vadd.f32 %v931_v6, %v313_v24 }
  0x54   : > { %v646_v37 = vadd.f32 %v645_v28, %v615_v20  ;;  %v419_v38 = vmax.f32 %v381_v29, 0.0  ;;  %v314_v39 = vmul.f32 %v913_v2, %v244_v25  ;;  %v315_v40 = vmul.f32 %v915_v3, %v245_v26 }
  0x55   : > { %v482_v41 = vmax.f32 %v450_v31, 0.0  ;;  %v577_v42 = vadd.f32 %v576_v27, %v481_v32  ;;  %v616_v43 = vmul.f32 %v481_v32, %v481_v32  ;;  %v420_v44 = vmax.f32 %v383_v33, 0.0 }
  0x56   : > { %v451_v45 = vadd.f32 %v419_v38, %v382_v30  ;;  %v316_v46 = vmul.f32 %v913_v2, %v246_v35  ;;  %v317_v47 = vmul.f32 %v915_v3, %v247_v36  ;;  %v385_v48 = vadd.f32 %v929_v5, %v314_v39 }
  0x57   : > { %v827_v50 = vpack.c.bf16 %v482_v41, %v481_v32  ;;  %v578_v51 = vadd.f32 %v577_v42, %v482_v41  ;;  %v617_v52 = vmul.f32 %v482_v41, %v482_v41  ;;  %v647_v53 = vadd.f32 %v646_v37, %v616_v43 }
  0x58   : > { %v452_v54 = vadd.f32 %v420_v44, %v384_v34  ;;  %v483_v55 = vmax.f32 %v451_v45, 0.0  ;;  %v386_v56 = vadd.f32 %v931_v6, %v315_v40  ;;  %v387_v57 = vadd.f32 %v929_v5, %v316_v46 }
  0x59   : > { %855 = vst [vmem:[%s974_s30 + $0x60] sm:$0xff] %v827_v50   ;;  %v648_v61 = vadd.f32 %v647_v53, %v617_v52  ;;  %v388_v62 = vadd.f32 %v931_v6, %v317_v47  ;;  %v421_v63 = vmax.f32 %v385_v48, 0.0  ;;  %v318_v0 = vmul.f32 %v913_v2, %v248_v49 }
  0x5a   : > { %v484_v1 = vmax.f32 %v452_v54, 0.0  ;;  %v579_v4 = vadd.f32 %v578_v51, %v483_v55  ;;  %v618_v7 = vmul.f32 %v483_v55, %v483_v55  ;;  %v422_v8 = vmax.f32 %v387_v57, 0.0 }
  0x5b   : > { %v453_v9 = vadd.f32 %v421_v63, %v386_v56  ;;  %v319_v10 = vmul.f32 %v915_v3, %v249_v58  ;;  %v320_v11 = vmul.f32 %v913_v2, %v250_v59  ;;  %v321_v12 = vmul.f32 %v915_v3, %v251_v60 }
  0x5c   : > { %v832_v13 = vpack.c.bf16 %v484_v1, %v483_v55  ;;  %v580_v14 = vadd.f32 %v579_v4, %v484_v1  ;;  %v619_v15 = vmul.f32 %v484_v1, %v484_v1  ;;  %v649_v16 = vadd.f32 %v648_v61, %v618_v7 }
  0x5d   : > { %v454_v17 = vadd.f32 %v422_v8, %v388_v62  ;;  %v485_v18 = vmax.f32 %v453_v9, 0.0  ;;  %v389_v19 = vadd.f32 %v929_v5, %v318_v0  ;;  %v390_v21 = vadd.f32 %v931_v6, %v319_v10 }
  0x5e   : > { %856 = vst [vmem:[%s974_s30 + $0x68] sm:$0xff] %v832_v13   ;;  %v650_v20 = vadd.f32 %v649_v16, %v619_v15  ;;  %v391_v22 = vadd.f32 %v929_v5, %v320_v11  ;;  %v392_v23 = vadd.f32 %v931_v6, %v321_v12 }
  0x5f   : > { %v486_v2 = vmax.f32 %v454_v17, 0.0  ;;  %v581_v24 = vadd.f32 %v580_v14, %v485_v18  ;;  %v620_v3 = vmul.f32 %v485_v18, %v485_v18  ;;  %v423_v25 = vmax.f32 %v389_v19, 0.0 }
  0x60   : > { %v424_v26 = vmax.f32 %v391_v22, 0.0 }
  0x61   : > { %v837_v27 = vpack.c.bf16 %v486_v2, %v485_v18  ;;  %v621_v28 = vmul.f32 %v486_v2, %v486_v2  ;;  %v651_v29 = vadd.f32 %v650_v20, %v620_v3  ;;  %v582_v30 = vadd.f32 %v581_v24, %v486_v2 }
  0x62   : > { %v455_v31 = vadd.f32 %v423_v25, %v390_v21  ;;  %v456_v32 = vadd.f32 %v424_v26, %v392_v23 }
  0x63   : > { %857 = vst [vmem:[%s974_s30 + $0x70] sm:$0xff] %v837_v27   ;;  %v652_v33 = vadd.f32 %v651_v29, %v621_v28 }
  0x64   : > { %v487_v34 = vmax.f32 %v455_v31, 0.0  ;;  %v488_v35 = vmax.f32 %v456_v32, 0.0 }
  0x66   : > { %v842_v36 = vpack.c.bf16 %v488_v35, %v487_v34  ;;  %v583_v5 = vadd.f32 %v582_v30, %v487_v34  ;;  %v622_v37 = vmul.f32 %v487_v34, %v487_v34  ;;  %v623_v6 = vmul.f32 %v488_v35, %v488_v35 }
  0x68   : > { %858 = vst [vmem:[%s974_s30 + $0x78] sm:$0xff] %v842_v36   ;;  %v584_v38 = vadd.f32 %v583_v5, %v488_v35  ;;  %v653_v39 = vadd.f32 %v652_v33, %v622_v37 }
  0x6a   : > { %v585_v40 = vrot.slane %v584_v38, 4  ;;  %v654_v41 = vadd.f32 %v653_v39, %v623_v6 }
  0x6c   : > { %v586_v42 = vadd.f32 %v585_v40, %v584_v38  ;;  %v655_v43 = vrot.slane %v654_v41, 4 }
  0x6e   : > { %v587_v44 = vrot.slane %v586_v42, 2  ;;  %v656_v45 = vadd.f32 %v655_v43, %v654_v41 }
  0x70   : > { %v588_v46 = vadd.f32 %v587_v44, %v586_v42  ;;  %v657_v47 = vrot.slane %v656_v45, 2 }
  0x72   : > { %v589_v48 = vrot.slane %v588_v46, 1  ;;  %v658_v49 = vadd.f32 %v657_v47, %v656_v45 }
  0x74   : > { %v590_v50 = vadd.f32 %v589_v48, %v588_v46  ;;  %v659_v51 = vrot.slane %v658_v49, 1 }
  0x76   : > { %591 = vst [vmem:[%s920_s22] sm:$0x1] %v590_v50  ;;  %v660_v52 = vadd.f32 %v659_v51, %v658_v49 }
  0x78   : > { %661 = vst [vmem:[%s920_s22 + $0x1] sm:$0x1] %v660_v52 }
  0x79 PF: > { %s14_s12 = sadd.s32 1, %s874_s12  }
  0x7a   : > { %p11_p5 = scmp.ge.s32.totalorder %s14_s12, 4  }
  0x7c   :  { %13 = sbr.rel (!%p11_p5) target bundleno = 1 (0x1), region = 71 }

// kernel: respath_forward.6
= control target key start
LH: loop header
LB: loop body
LE: loop exit
PB: predicated region body
PF: predicated region fallthrough
CT: control target
= control target key end

     0   :  { %s5298_s15 = smov 0   ;;  %s8170_s0 = inlined_call_operand.vmem [shape: bf16[2,18,18,128], index: 0, kind: input, shape index: {}]   ;;  %s8171_s1 = inlined_call_operand.vmem [shape: f32[8,128], index: 1, kind: input, shape index: {}]   ;;  %s8172_s2 = inlined_call_operand.vmem [shape: bf16[1152,256], index: 2, kind: input, shape index: {}]   ;;  %s8173_s3 = inlined_call_operand.vmem [shape: f32[512,256], index: 3, kind: output, shape index: {0}]   ;;  %s8174_s4 = inlined_call_operand.vmem [shape: f32[2,8,256], index: 4, kind: output, shape index: {1}]  }
   0x1 LB: > { %s5304_s16 = sadd.s32 4294967295, %s5268_s15   ;;  %p4179_p0 = scmp.ge.s32.totalorder %s5268_s15, 1  ;;  %s5268_s15 = sphi %s5298_s15, %s15_s15  }
   0x2   : > { %p165_p1 = scmp.lt.s32.totalorder %s5268_s15, 3 }
   0x4   : > { %p166_p2 = pnand %p4179_p0, %p165_p1 }
   0x6   : > { %169 = sbr.rel (%p166_p2) target bundleno = 1348 (0x544), region = 32 }
   0xb   : > { %v4244_v0 = vld [vmem:[%s8172_s2 + $0x1f0] sm:$0xf]  ;;  %v5074_v1 = vld [vmem:[%s8172_s2 + $0x1f4] sm:$0xf0]  ;;  %v5073_v2 = vld [vmem:[%s8172_s2 + $0x1f4] sm:$0xf]  ;;  %v8175_v45 = vlaneseq }
   0xc   : > { %v4245_v3 = vor.u32 %v5074_v1, %v4244_v0  ;;  %v4246_v4 = vld [vmem:[%s8172_s2 + $0x1f8] sm:$0xf0]  ;;  %v4236_v5 = vld [vmem:[%s8172_s2 + $0x1e0] sm:$0xf]  ;;  %v5072_v6 = vld [vmem:[%s8172_s2 + $0x1e4] sm:$0xf0] }
   0xd   : > { %v4249_v7 = vor.u32 %v5073_v2, %v4246_v4  ;;  %v5071_v8 = vld [vmem:[%s8172_s2 + $0x1e4] sm:$0xf]  ;;  %v4238_v9 = vld [vmem:[%s8172_s2 + $0x1e8] sm:$0xf0]  ;;  %v4237_v10 = vor.u32 %v5072_v6, %v4236_v5  ;;  %v4228_v12 = vld [vmem:[%s8172_s2 + $0x1d0] sm:$0xf] }
   0xe   : > { %5227 = vmatpush.bf16.msra.mxu2 %v4245_v3  ;;  %639 = vmatpush.bf16.msra.mxu0 %v4245_v3  ;;  %v4241_v11 = vor.u32 %v5071_v8, %v4238_v9  ;;  %v5070_v13 = vld [vmem:[%s8172_s2 + $0x1d4] sm:$0xf0]  ;;  %v5069_v14 = vld [vmem:[%s8172_s2 + $0x1d4] sm:$0xf]  ;;  %v4230_v15 = vld [vmem:[%s8172_s2 + $0x1d8] sm:$0xf0] }
   0xf   : > { %728 = vmatpush.bf16.msra.mxu1 %v4249_v7  ;;  %5235 = vmatpush.bf16.msra.mxu3 %v4249_v7  ;;  %v4229_v16 = vor.u32 %v5070_v13, %v4228_v12  ;;  %v4233_v17 = vor.u32 %v5069_v14, %v4230_v15  ;;  %v4220_v18 = vld [vmem:[%s8172_s2 + $0x1c0] sm:$0xf]  ;;  %v5068_v19 = vld [vmem:[%s8172_s2 + $0x1c4] sm:$0xf0]  ;;  %v5067_v20 = vld [vmem:[%s8172_s2 + $0x1c4] sm:$0xf] }
  0x10   : > { %v4222_v21 = vld [vmem:[%s8172_s2 + $0x1c8] sm:$0xf0]  ;;  %p197_p3 = scmp.lt.s32.totalorder %s5304_s16, 1  ;;  %v4221_v22 = vor.u32 %v5068_v19, %v4220_v18  ;;  %v4212_v24 = vld [vmem:[%s8172_s2 + $0x1b0] sm:$0xf]  ;;  %v5425_v57 = vshrl.u32 %v8175_v45, 7 }
  0x11   : > { %v4225_v23 = vor.u32 %v5067_v20, %v4222_v21  ;;  %v5066_v25 = vld [vmem:[%s8172_s2 + $0x1b4] sm:$0xf0]  ;;  %v5065_v26 = vld [vmem:[%s8172_s2 + $0x1b4] sm:$0xf]  ;;  %v4214_v27 = vld [vmem:[%s8172_s2 + $0x1b8] sm:$0xf0] }
  0x12   : > { %5228 = vmatpush.bf16.msra.mxu2 %v4237_v10  ;;  %640 = vmatpush.bf16.msra.mxu0 %v4237_v10  ;;  %s5364_s29 = scalar_select %p197_p3, %s5304_s16, 1  ;;  %v4213_v28 = vor.u32 %v5066_v25, %v4212_v24  ;;  %v4217_v29 = vor.u32 %v5065_v26, %v4214_v27  ;;  %v4204_v30 = vld [vmem:[%s8172_s2 + $0x1a0] sm:$0xf]  ;;  %v5064_v31 = vld [vmem:[%s8172_s2 + $0x1a4] sm:$0xf0]  ;;  %vm438_vm0 = vcmp.ge.s32.totalorder %v5425_v57, 1 }
  0x13   : > { %729 = vmatpush.bf16.msra.mxu1 %v4241_v11  ;;  %5236 = vmatpush.bf16.msra.mxu3 %v4241_v11  ;;  %v5063_v32 = vld [vmem:[%s8172_s2 + $0x1a4] sm:$0xf]  ;;  %v4206_v33 = vld [vmem:[%s8172_s2 + $0x1a8] sm:$0xf0]  ;;  %v5395_v38 = vld [vmem:[%s8171_s1] ss:$0 sm:$0xff]  ;;  %v4205_v39 = vor.u32 %v5064_v31, %v4204_v30 }
  0x14   : > { %s5243_s8 = smul.u32 216, %s5364_s29  ;;  %v4209_v42 = vor.u32 %v5063_v32, %v4206_v33  ;;  %v4196_v43 = vld [vmem:[%s8172_s2 + $0x190] sm:$0xf]  ;;  %v5062_v44 = vld [vmem:[%s8172_s2 + $0x194] sm:$0xf0]  ;;  %vm5270_vm1 = vmmov 1  }
  0x15   : > { %v5061_v46 = vld [vmem:[%s8172_s2 + $0x194] sm:$0xf]  ;;  %v4198_v47 = vld [vmem:[%s8172_s2 + $0x198] sm:$0xf0]  ;;  %v5414_v50 = vld [vmem:[%s8171_s1 + $0x1] ss:$0 sm:$0xff]  ;;  %v4197_v51 = vor.u32 %v5062_v44, %v4196_v43 }
  0x16   : > { %5229 = vmatpush.bf16.msra.mxu2 %v4229_v16  ;;  %641 = vmatpush.bf16.msra.mxu0 %v4229_v16  ;;  %s5385_s19 = scalar_lea.vmem %s8170_s0, %s5243_s8  ;;  %v4201_v54 = vor.u32 %v5061_v46, %v4198_v47  ;;  %v4188_v55 = vld [vmem:[%s8172_s2 + $0x180] sm:$0xf]  ;;  %v5060_v56 = vld [vmem:[%s8172_s2 + $0x184] sm:$0xf0]  ;;  %v5059_v58 = vld [vmem:[%s8172_s2 + $0x184] sm:$0xf] }
  0x17   : > { %730 = vmatpush.bf16.msra.mxu1 %v4233_v17  ;;  %5237 = vmatpush.bf16.msra.mxu3 %v4233_v17  ;;  %v241_v34 = vld [vmem:[%s5385_s19 + $0x6c] sm:$0xff]   ;;  %v5057_v60 = vld [vmem:[%s8172_s2 + $0x74] sm:$0xf]  ;;  %v4406_v63 = vld [vmem:[%s8172_s2 + $0x78] sm:$0xf0]  ;;  %v4189_v2 = vor.u32 %v5060_v56, %v4188_v55  ;;  %s5042_s9 = sshll.u32 %s5364_s29, 4 }
  0x18   : > { %v217_v35 = vld [vmem:[%s5385_s19 + $0xc] sm:$0xff]   ;;  %v295_v36 = vunpack.c.l.bf16 %v241_v34  ;;  %v296_v37 = vunpack.c.h.bf16 %v241_v34  ;;  %v5058_v1 = vld [vmem:[%s8172_s2 + $0x74] sm:$0xf0]  ;;  %v5089_v6 = vld [vmem:[%s8172_s2 + $0x374] sm:$0xf]  ;;  %v4409_v8 = vor.u32 %v5057_v60, %v4406_v63  ;;  %s6484_s12 = scalar_lea.vmem %s8174_s4, %s5042_s9  ;;  %vm1462_vm4 = vcmask 1046528  }
  0x19   : > { %v271_v40 = vunpack.c.l.bf16 %v217_v35  ;;  %v272_v41 = vunpack.c.h.bf16 %v217_v35  ;;  %v4190_v59 = vld [vmem:[%s8172_s2 + $0x188] sm:$0xf0]  ;;  %v4404_v0 = vld [vmem:[%s8172_s2 + $0x70] sm:$0xf]  ;;  %v4560_v7 = vld [vmem:[%s8172_s2 + $0x378] sm:$0xf0] }
  0x1a   : > { %5230 = vmatpush.bf16.msra.mxu2 %v4221_v22  ;;  %642 = vmatpush.bf16.msra.mxu0 %v4221_v22  ;;  %v352_v48 = vmul.f32 %v5395_v38, %v295_v36  ;;  %v353_v49 = vmul.f32 %v5395_v38, %v296_v37  ;;  %v4193_v5 = vor.u32 %v5059_v58, %v4190_v59  ;;  %v4558_v10 = vld [vmem:[%s8172_s2 + $0x370] sm:$0xf]  ;;  %v5090_v11 = vld [vmem:[%s8172_s2 + $0x374] sm:$0xf0]  ;;  %v5055_v12 = vld [vmem:[%s8172_s2 + $0x64] sm:$0xf] }
  0x1b   : > { %731 = vmatpush.bf16.msra.mxu1 %v4225_v23  ;;  %5238 = vmatpush.bf16.msra.mxu3 %v4225_v23  ;;  %v328_v52 = vmul.f32 %v5395_v38, %v271_v40  ;;  %v329_v53 = vmul.f32 %v5395_v38, %v272_v41  ;;  %v4405_v9 = vor.u32 %v5058_v1, %v4404_v0  ;;  %v4398_v14 = vld [vmem:[%s8172_s2 + $0x68] sm:$0xf0]  ;;  %v4396_v15 = vld [vmem:[%s8172_s2 + $0x60] sm:$0xf]  ;;  %v5056_v16 = vld [vmem:[%s8172_s2 + $0x64] sm:$0xf0] }
  0x1c   : > { %v5437_v61 = vadd.f32 %v5414_v50, %v352_v48  ;;  %v5440_v62 = vadd.f32 %v5414_v50, %v353_v49  ;;  %vm5488_vm2 = vmpackc.low %vm5270_vm1, %vm438_vm0  ;;  %v5223_v19 = vld [vmem:[%s5385_s19 + $0x78] sm:$0xff]   ;;  %v4563_v20 = vor.u32 %v5089_v6, %v4560_v7  ;;  %v4559_v21 = vor.u32 %v5090_v11, %v4558_v10  ;;  %v5087_v23 = vld [vmem:[%s8172_s2 + $0x364] sm:$0xf]  ;;  %s4181_s6 = sshll.u32 %s5304_s16, 5 }
  0x1d   : > { %v5452_v3 = vadd.f32 %v5414_v50, %v328_v52  ;;  %v5455_v4 = vadd.f32 %v5414_v50, %v329_v53  ;;  %v5219_v22 = vld [vmem:[%s5385_s19 + $0x18] sm:$0xff]   ;;  %v4401_v24 = vor.u32 %v5055_v12, %v4398_v14  ;;  %v4397_v25 = vor.u32 %v5056_v16, %v4396_v15  ;;  %v4552_v26 = vld [vmem:[%s8172_s2 + $0x368] sm:$0xf0]  ;;  %v4550_v27 = vld [vmem:[%s8172_s2 + $0x360] sm:$0xf]  ;;  %p203_p4 = scmp.lt.s32.totalorder %s4181_s6, 63 }
  0x1e   : > { %5231 = vmatpush.bf16.msra.mxu2 %v4213_v28  ;;  %643 = vmatpush.bf16.msra.mxu0 %v4213_v28  ;;  %8278 = vst [vmem:[#allocation2_spill] sm:$0xff] %v5437_v61  ;;  %v5475_v13 = vpack.c.bf16 %v5440_v62, %v5437_v61  ;;  %v5088_v28 = vld [vmem:[%s8172_s2 + $0x364] sm:$0xf0]  ;;  %v5206_v30 = vunpack.c.h.bf16 %v5223_v19  ;;  %v5189_v31 = vunpack.c.l.bf16 %v5219_v22  ;;  %v5190_v32 = vunpack.c.h.bf16 %v5219_v22  ;;  %v5053_v33 = vld [vmem:[%s8172_s2 + $0x54] sm:$0xf] }
  0x1f   : > { %732 = vmatpush.bf16.msra.mxu1 %v4217_v29  ;;  %5239 = vmatpush.bf16.msra.mxu3 %v4217_v29  ;;  %8279 = vst [vmem:[#allocation3_spill] sm:$0xff] %v5440_v62  ;;  %v5494_v18 = vpack.c.bf16 %v5455_v4, %v5452_v3  ;;  %v5205_v29 = vunpack.c.l.bf16 %v5223_v19  ;;  %v4390_v34 = vld [vmem:[%s8172_s2 + $0x58] sm:$0xf0]  ;;  %v4555_v35 = vor.u32 %v5087_v23, %v4552_v26  ;;  %v4388_v37 = vld [vmem:[%s8172_s2 + $0x50] sm:$0xf]  ;;  %v247_v63 = vld [vmem:[%s5385_s19 + $0x84] sm:$0xff]  }
  0x20   : > { %8280 = vst [vmem:[#allocation4_spill] sm:$0xff] %v5455_v4  ;;  %v4551_v36 = vor.u32 %v5088_v28, %v4550_v27  ;;  %v4393_v40 = vor.u32 %v5053_v33, %v4390_v34  ;;  %v4544_v43 = vld [vmem:[%s8172_s2 + $0x358] sm:$0xf0]  ;;  %v356_v46 = vmul.f32 %v5395_v38, %v5206_v30  ;;  %v4542_v47 = vld [vmem:[%s8172_s2 + $0x350] sm:$0xf]  ;;  %v331_v49 = vmul.f32 %v5395_v38, %v5189_v31  ;;  %v223_v0 = vld [vmem:[%s5385_s19 + $0x24] sm:$0xff]  }
  0x21   : > { %v355_v44 = vmul.f32 %v5395_v38, %v5205_v29  ;;  %v5086_v48 = vld [vmem:[%s8172_s2 + $0x354] sm:$0xf0]  ;;  %v301_v1 = vunpack.c.l.bf16 %v247_v63  ;;  %v278_v6 = vunpack.c.h.bf16 %v223_v0  ;;  %v5051_v7 = vld [vmem:[%s8172_s2 + $0x44] sm:$0xf]  ;;  %v4380_v10 = vld [vmem:[%s8172_s2 + $0x40] sm:$0xf] }
  0x22   : > { %5232 = vmatpush.bf16.msra.mxu2 %v4205_v39  ;;  %644 = vmatpush.bf16.msra.mxu0 %v4205_v39  ;;  %v5054_v39 = vld [vmem:[%s8172_s2 + $0x54] sm:$0xf0]  ;;  %v4543_v53 = vor.u32 %v5086_v48, %v4542_v47  ;;  %v5554_v55 = vadd.f32 %v5414_v50, %v356_v46  ;;  %v5557_v56 = vadd.f32 %v5414_v50, %v331_v49  ;;  %v5052_v11 = vld [vmem:[%s8172_s2 + $0x44] sm:$0xf0]  ;;  %v5083_v12 = vld [vmem:[%s8172_s2 + $0x344] sm:$0xf] }
  0x23   : > { %733 = vmatpush.bf16.msra.mxu1 %v4209_v42  ;;  %5240 = vmatpush.bf16.msra.mxu3 %v4209_v42  ;;  %v4389_v41 = vor.u32 %v5054_v39, %v4388_v37  ;;  %v5085_v42 = vld [vmem:[%s8172_s2 + $0x354] sm:$0xf]  ;;  %v4381_v14 = vor.u32 %v5052_v11, %v4380_v10  ;;  %v4536_v15 = vld [vmem:[%s8172_s2 + $0x348] sm:$0xf0]  ;;  %v4534_v16 = vld [vmem:[%s8172_s2 + $0x340] sm:$0xf] }
  0x24   : > { %v4547_v52 = vor.u32 %v5085_v42, %v4544_v43  ;;  %8284 = vst [vmem:[#allocation6_spill] sm:$0xff] %v5554_v55  ;;  %v5084_v19 = vld [vmem:[%s8172_s2 + $0x344] sm:$0xf0]  ;;  %v4539_v22 = vor.u32 %v5083_v12, %v4536_v15  ;;  %v5220_v33 = vld [vmem:[%s5385_s19 + $0x30] sm:$0xff]   ;;  %v5050_v43 = vld [vmem:[%s8172_s2 + $0x34] sm:$0xf0] }
  0x25   : > { %v4535_v23 = vor.u32 %v5084_v19, %v4534_v16  ;;  %v5194_v37 = vunpack.c.h.bf16 %v5220_v33  ;;  %v5049_v39 = vld [vmem:[%s8172_s2 + $0x34] sm:$0xf]  ;;  %v4372_v42 = vld [vmem:[%s8172_s2 + $0x30] sm:$0xf]  ;;  %v4528_v47 = vld [vmem:[%s8172_s2 + $0x338] sm:$0xf0] }
  0x26   : > { %5233 = vmatpush.bf16.msra.mxu2 %v4197_v51  ;;  %645 = vmatpush.bf16.msra.mxu0 %v4197_v51  ;;  %v332_v51 = vmul.f32 %v5395_v38, %v5190_v32  ;;  %v5224_v32 = vld [vmem:[%s5385_s19 + $0x90] sm:$0xff]   ;;  %v4373_v46 = vor.u32 %v5050_v43, %v4372_v42  ;;  %v5082_v49 = vld [vmem:[%s8172_s2 + $0x334] sm:$0xf0]  ;;  %v253_v10 = vld [vmem:[%s5385_s19 + $0x9c] sm:$0xff]   ;;  %vm2627_vm5 = vcmask 1045504   ;;  %s8672_s6 = smov (!%p203_p4, %s4181_s6), 63 }
  0x27   : > { %734 = vmatpush.bf16.msra.mxu1 %v4201_v54  ;;  %5241 = vmatpush.bf16.msra.mxu3 %v4201_v54  ;;  %v5551_v54 = vadd.f32 %v5414_v50, %v355_v44  ;;  %v5209_v34 = vunpack.c.l.bf16 %v5224_v32  ;;  %v5081_v44 = vld [vmem:[%s8172_s2 + $0x334] sm:$0xf]  ;;  %v4526_v48 = vld [vmem:[%s8172_s2 + $0x330] sm:$0xf]  ;;  %v229_v11 = vld [vmem:[%s5385_s19 + $0x3c] sm:$0xff]   ;;  %v307_v12 = vunpack.c.l.bf16 %v253_v10  ;;  %s5041_s16 = sshll.u32 %s8672_s6, 4 }
  0x28   : > { %v5560_v58 = vadd.f32 %v5414_v50, %v332_v51  ;;  %v283_v15 = vunpack.c.l.bf16 %v229_v11  ;;  %v284_v16 = vunpack.c.h.bf16 %v229_v11  ;;  %v5047_v19 = vld [vmem:[%s8172_s2 + $0x24] sm:$0xf]  ;;  %s8006_s9 = scalar_lea.vmem %s8173_s3, %s5041_s16  ;;  %vm3929_vm6 = vcmask 1040384  }
  0x29   : > { %8283 = vst [vmem:[#allocation5_spill] sm:$0xff] %v5551_v54  ;;  %v5564_v59 = vpack.c.bf16 %v5554_v55, %v5551_v54  ;;  %v361_v51 = vmul.f32 %v5395_v38, %v5209_v34  ;;  %v5080_v34 = vld [vmem:[%s8172_s2 + $0x324] sm:$0xf0]  ;;  %v5119_v45 = vld [vmem:[%s8172_s2 + $0x264] sm:$0xf] }
  0x2a   : > { %5234 = vmatpush.bf16.msra.mxu2 %v4189_v2  ;;  %646 = vmatpush.bf16.msra.mxu0 %v4189_v2  ;;  %8285 = vst [vmem:[#allocation7_spill] sm:$0xff] %v5560_v58  ;;  %v5568_v60 = vpack.c.bf16 %v5560_v58, %v5557_v56  ;;  %v302_v2 = vunpack.c.h.bf16 %v247_v63  ;;  %v4527_v63 = vor.u32 %v5082_v49, %v4526_v48  ;;  %v5225_v49 = vld [vmem:[%s5385_s19 + $0xa8] sm:$0xff]   ;;  %v5117_v55 = vld [vmem:[%s8172_s2 + $0x254] sm:$0xf] }
  0x2b   : > { %735 = vmatpush.bf16.msra.mxu1 %v4193_v5  ;;  %5242 = vmatpush.bf16.msra.mxu3 %v4193_v5  ;;  %v277_v5 = vunpack.c.l.bf16 %v223_v0 }
  0x2d   : > { %4276 = vmatmul.msk.bf16.vlgmr.msra.gmra.mxu2 %vm5488_vm2, %v5475_v13  ;;  %4252 = vmatmul.msk.bf16.vlgmr.msra.gmra.mxu0 %vm5488_vm2, %v5494_v18 }
  0x2e   : > { %897 = vmatpush.bf16.msrb.mxu2 %v4405_v9  ;;  %4300 = vmatmul.msk.bf16.vlgmr.msra.gmra.mxu1 %vm5488_vm2, %v5494_v18 }
  0x2f   : > { %986 = vmatpush.bf16.msrb.mxu3 %v4409_v8  ;;  %1261 = vmatpush.bf16.msrb.mxu1 %v4563_v20  ;;  %v4382_v8 = vld [vmem:[%s8172_s2 + $0x48] sm:$0xf0]  ;;  %v358_v20 = vmul.f32 %v5395_v38, %v301_v1  ;;  %v338_v1 = vmul.f32 %v5395_v38, %v5194_v37 }
  0x30   : > { %4324 = vmatmul.msk.bf16.vlgmr.msra.gmra.mxu3 %vm5488_vm2, %v5475_v13  ;;  %1172 = vmatpush.bf16.msrb.mxu0 %v4559_v21  ;;  %v4385_v9 = vor.u32 %v5051_v7, %v4382_v8  ;;  %v359_v21 = vmul.f32 %v5395_v38, %v302_v2  ;;  %v5675_v2 = vadd.f32 %v5414_v50, %v361_v51  ;;  %v5221_v51 = vld [vmem:[%s5385_s19 + $0x48] sm:$0xff]  }
  0x31   : > { %v5613_v26 = vadd.f32 %v5414_v50, %v358_v20  ;;  %v5684_v7 = vadd.f32 %v5414_v50, %v338_v1  ;;  %v4366_v20 = vld [vmem:[%s8172_s2 + $0x28] sm:$0xf0]  ;;  %v5045_v1 = vld [vmem:[%s8172_s2 + $0x14] sm:$0xf] }
  0x32   : > { %898 = vmatpush.bf16.msrb.mxu2 %v4397_v25  ;;  %v335_v25 = vmul.f32 %v5395_v38, %v278_v6  ;;  %v5616_v27 = vadd.f32 %v5414_v50, %v359_v21  ;;  %8290 = vst [vmem:[#allocation12_spill] sm:$0xff] %v5675_v2  ;;  %v4369_v21 = vor.u32 %v5047_v19, %v4366_v20  ;;  %v4512_v19 = vld [vmem:[%s8172_s2 + $0x318] sm:$0xf0]  ;;  %v4510_v20 = vld [vmem:[%s8172_s2 + $0x310] sm:$0xf] }
  0x33   : > { %987 = vmatpush.bf16.msrb.mxu3 %v4401_v24  ;;  %1262 = vmatpush.bf16.msrb.mxu1 %v4555_v35  ;;  %v334_v24 = vmul.f32 %v5395_v38, %v277_v5  ;;  %8286 = vst [vmem:[#allocation8_spill] sm:$0xff] %v5613_v26  ;;  %v5210_v35 = vunpack.c.h.bf16 %v5224_v32  ;;  %v4520_v32 = vld [vmem:[%s8172_s2 + $0x328] sm:$0xf0] }
  0x34   : > { %1173 = vmatpush.bf16.msrb.mxu0 %v4551_v36  ;;  %8287 = vst [vmem:[#allocation9_spill] sm:$0xff] %v5616_v27  ;;  %v5622_v29 = vadd.f32 %v5414_v50, %v335_v25  ;;  %v5626_v30 = vpack.c.bf16 %v5616_v27, %v5613_v26  ;;  %v5193_v36 = vunpack.c.l.bf16 %v5220_v33  ;;  %v4518_v33 = vld [vmem:[%s8172_s2 + $0x320] sm:$0xf] }
  0x35   : > { %v5619_v28 = vadd.f32 %v5414_v50, %v334_v24  ;;  %8293 = vst [vmem:[#allocation15_spill] sm:$0xff] %v5684_v7  ;;  %v5079_v24 = vld [vmem:[%s8172_s2 + $0x324] sm:$0xf] }
  0x36   : > { %899 = vmatpush.bf16.msrb.mxu2 %v4389_v41  ;;  %8289 = vst [vmem:[#allocation11_spill] sm:$0xff] %v5622_v29  ;;  %v337_v0 = vmul.f32 %v5395_v38, %v5193_v36  ;;  %v4523_v37 = vor.u32 %v5079_v24, %v4520_v32 }
  0x37   : > { %988 = vmatpush.bf16.msrb.mxu3 %v4393_v40  ;;  %1263 = vmatpush.bf16.msrb.mxu1 %v4547_v52  ;;  %8288 = vst [vmem:[#allocation10_spill] sm:$0xff] %v5619_v28  ;;  %v5630_v31 = vpack.c.bf16 %v5622_v29, %v5619_v28  ;;  %v4374_v40 = vld [vmem:[%s8172_s2 + $0x38] sm:$0xf0]  ;;  %v362_v52 = vmul.f32 %v5395_v38, %v5210_v35 }
  0x38   : > { %1174 = vmatpush.bf16.msrb.mxu0 %v4543_v53  ;;  %v4377_v41 = vor.u32 %v5049_v39, %v4374_v40  ;;  %v4531_v53 = vor.u32 %v5081_v44, %v4528_v47  ;;  %v5681_v6 = vadd.f32 %v5414_v50, %v337_v0  ;;  %v364_v35 = vmul.f32 %v5395_v38, %v307_v12  ;;  %v4356_v12 = vld [vmem:[%s8172_s2 + $0x10] sm:$0xf] }
  0x39   : > { %v5678_v5 = vadd.f32 %v5414_v50, %v362_v52  ;;  %v4519_v39 = vor.u32 %v5080_v34, %v4518_v33  ;;  %v340_v40 = vmul.f32 %v5395_v38, %v283_v15  ;;  %v5213_v52 = vunpack.c.l.bf16 %v5225_v49  ;;  %v5077_v15 = vld [vmem:[%s8172_s2 + $0x314] sm:$0xf] }
  0x3a   : > { %900 = vmatpush.bf16.msrb.mxu2 %v4381_v14  ;;  %8292 = vst [vmem:[#allocation14_spill] sm:$0xff] %v5681_v6  ;;  %v308_v14 = vunpack.c.h.bf16 %v253_v10  ;;  %v5737_v42 = vadd.f32 %v5414_v50, %v364_v35  ;;  %v5198_v0 = vunpack.c.h.bf16 %v5221_v51  ;;  %v4358_v10 = vld [vmem:[%s8172_s2 + $0x18] sm:$0xf0]  ;;  %v4515_v24 = vor.u32 %v5077_v15, %v4512_v19  ;;  %v4502_v19 = vld [vmem:[%s8172_s2 + $0x300] sm:$0xf] }
  0x3b   : > { %989 = vmatpush.bf16.msrb.mxu3 %v4385_v9  ;;  %1264 = vmatpush.bf16.msrb.mxu1 %v4539_v22  ;;  %8291 = vst [vmem:[#allocation13_spill] sm:$0xff] %v5678_v5  ;;  %v5688_v8 = vpack.c.bf16 %v5678_v5, %v5675_v2  ;;  %v5692_v9 = vpack.c.bf16 %v5684_v7, %v5681_v6  ;;  %v4364_v22 = vld [vmem:[%s8172_s2 + $0x20] sm:$0xf] }
  0x3c   : > { %1175 = vmatpush.bf16.msrb.mxu0 %v4535_v23  ;;  %v5048_v23 = vld [vmem:[%s8172_s2 + $0x24] sm:$0xf0]  ;;  %v365_v36 = vmul.f32 %v5395_v38, %v308_v14  ;;  %8294 = vst [vmem:[#allocation16_spill] sm:$0xff] %v5737_v42  ;;  %v5743_v44 = vadd.f32 %v5414_v50, %v340_v40  ;;  %v4361_v11 = vor.u32 %v5045_v1, %v4358_v10  ;;  %v5046_v14 = vld [vmem:[%s8172_s2 + $0x14] sm:$0xf0] }
  0x3d   : > { %4279 = vmatmul.msk.bf16.gmra.mxu2 %vm5488_vm2, %v5564_v59  ;;  %4255 = vmatmul.msk.bf16.gmra.mxu0 %vm5488_vm2, %v5568_v60  ;;  %v4365_v25 = vor.u32 %v5048_v23, %v4364_v22  ;;  %v367_v22 = vmul.f32 %v5395_v38, %v5213_v52  ;;  %v344_v33 = vmul.f32 %v5395_v38, %v5198_v0  ;;  %v5043_v0 = vld [vmem:[%s8172_s2 + $0x4] sm:$0xf]  ;;  %v4350_v1 = vld [vmem:[%s8172_s2 + $0x8] sm:$0xf0] }
  0x3e   : > { %4303 = vmatmul.msk.bf16.gmra.mxu1 %vm5488_vm2, %v5568_v60  ;;  %901 = vmatpush.bf16.msrb.mxu2 %v4373_v46  ;;  %v5740_v43 = vadd.f32 %v5414_v50, %v365_v36  ;;  %8296 = vst [vmem:[#allocation18_spill] sm:$0xff] %v5743_v44  ;;  %v4353_v10 = vor.u32 %v5043_v0, %v4350_v1  ;;  %v5222_v0 = vld [vmem:[%s5385_s19 + $0x60] sm:$0xff]  }
  0x3f   : > { %990 = vmatpush.bf16.msrb.mxu3 %v4377_v41  ;;  %1265 = vmatpush.bf16.msrb.mxu1 %v4531_v53  ;;  %v341_v41 = vmul.f32 %v5395_v38, %v284_v16  ;;  %v5214_v53 = vunpack.c.h.bf16 %v5225_v49  ;;  %v4357_v16 = vor.u32 %v5046_v14, %v4356_v12  ;;  %v5799_v34 = vadd.f32 %v5414_v50, %v367_v22  ;;  %v235_v49 = vld [vmem:[%s5385_s19 + $0x54] sm:$0xff]   ;;  %v5044_v12 = vld [vmem:[%s8172_s2 + $0x4] sm:$0xf0]  ;;  %v5075_v14 = vld [vmem:[%s8172_s2 + $0x304] sm:$0xf] }
  0x40   : > { %4327 = vmatmul.msk.bf16.gmra.mxu3 %vm5488_vm2, %v5564_v59  ;;  %1176 = vmatpush.bf16.msrb.mxu0 %v4527_v63  ;;  %8295 = vst [vmem:[#allocation17_spill] sm:$0xff] %v5740_v43  ;;  %v5750_v47 = vpack.c.bf16 %v5740_v43, %v5737_v42  ;;  %v5197_v63 = vunpack.c.l.bf16 %v5221_v51 }
  0x41   : > { %v5746_v46 = vadd.f32 %v5414_v50, %v341_v41  ;;  %v368_v23 = vmul.f32 %v5395_v38, %v5214_v53  ;;  %8298 = vst [vmem:[#allocation20_spill] sm:$0xff] %v5799_v34  ;;  %v259_v41 = vld [vmem:[%s5385_s19 + $0xb4] sm:$0xff]   ;;  %v289_v53 = vunpack.c.l.bf16 %v235_v49 }
  0x42   : > { %902 = vmatpush.bf16.msrb.mxu2 %v4365_v25  ;;  %v343_v32 = vmul.f32 %v5395_v38, %v5197_v63  ;;  %v313_v51 = vunpack.c.l.bf16 %v259_v41  ;;  %v314_v52 = vunpack.c.h.bf16 %v259_v41  ;;  %v290_v63 = vunpack.c.h.bf16 %v235_v49 }
  0x43   : > { %991 = vmatpush.bf16.msrb.mxu3 %v4369_v21  ;;  %1266 = vmatpush.bf16.msrb.mxu1 %v4523_v37  ;;  %8297 = vst [vmem:[#allocation19_spill] sm:$0xff] %v5746_v46  ;;  %v5754_v48 = vpack.c.bf16 %v5746_v46, %v5743_v44  ;;  %v5078_v21 = vld [vmem:[%s8172_s2 + $0x314] sm:$0xf0]  ;;  %v5802_v35 = vadd.f32 %v5414_v50, %v368_v23 }
  0x44   : > { %1177 = vmatpush.bf16.msrb.mxu0 %v4519_v39  ;;  %v4511_v25 = vor.u32 %v5078_v21, %v4510_v20  ;;  %v5805_v36 = vadd.f32 %v5414_v50, %v343_v32  ;;  %v5808_v37 = vadd.f32 %v5414_v50, %v344_v33  ;;  %v5076_v20 = vld [vmem:[%s8172_s2 + $0x304] sm:$0xf0]  ;;  %v370_v21 = vmul.f32 %v5395_v38, %v313_v51 }
  0x45   : > { %8299 = vst [vmem:[#allocation21_spill] sm:$0xff] %v5802_v35  ;;  %v5812_v39 = vpack.c.bf16 %v5802_v35, %v5799_v34  ;;  %v371_v22 = vmul.f32 %v5395_v38, %v314_v52  ;;  %v347_v32 = vmul.f32 %v5395_v38, %v290_v63  ;;  %v5226_v63 = vld [vmem:[%s5385_s19 + $0xc0] sm:$0xff]   ;;  %v4698_v35 = vld [vmem:[%s8172_s2 + $0xd8] sm:$0xf0]  ;;  %v4696_v34 = vld [vmem:[%s8172_s2 + $0xd0] sm:$0xf] }
  0x46   : > { %903 = vmatpush.bf16.msrb.mxu2 %v4357_v16  ;;  %8300 = vst [vmem:[#allocation22_spill] sm:$0xff] %v5805_v36  ;;  %v5816_v40 = vpack.c.bf16 %v5808_v37, %v5805_v36  ;;  %v4504_v16 = vld [vmem:[%s8172_s2 + $0x308] sm:$0xf0]  ;;  %v5861_v33 = vadd.f32 %v5414_v50, %v370_v21  ;;  %v5217_v1 = vunpack.c.l.bf16 %v5226_v63 }
  0x47   : > { %992 = vmatpush.bf16.msrb.mxu3 %v4361_v11  ;;  %1267 = vmatpush.bf16.msrb.mxu1 %v4515_v24  ;;  %8301 = vst [vmem:[#allocation23_spill] sm:$0xff] %v5808_v37  ;;  %v4348_v11 = vld [vmem:[%s8172_s2] sm:$0xf]  ;;  %v4507_v23 = vor.u32 %v5075_v14, %v4504_v16  ;;  %v4503_v24 = vor.u32 %v5076_v20, %v4502_v19  ;;  %v5105_v14 = vld [vmem:[%s8172_s2 + $0xf4] sm:$0xf] }
  0x48   : > { %1178 = vmatpush.bf16.msrb.mxu0 %v4511_v25  ;;  %v4349_v15 = vor.u32 %v5044_v12, %v4348_v11  ;;  %v346_v25 = vmul.f32 %v5395_v38, %v289_v53  ;;  %8302 = vst [vmem:[#allocation24_spill] sm:$0xff] %v5861_v33  ;;  %v5864_v41 = vadd.f32 %v5414_v50, %v371_v22  ;;  %v5201_v11 = vunpack.c.l.bf16 %v5222_v0  ;;  %v4712_v16 = vld [vmem:[%s8172_s2 + $0xf0] sm:$0xf]  ;;  %v5106_v20 = vld [vmem:[%s8172_s2 + $0xf4] sm:$0xf0] }
  0x49   : > { %v5870_v51 = vadd.f32 %v5414_v50, %v347_v32  ;;  %v5202_v12 = vunpack.c.h.bf16 %v5222_v0  ;;  %v4713_v21 = vor.u32 %v5106_v20, %v4712_v16  ;;  %v373_v22 = vmul.f32 %v5395_v38, %v5217_v1  ;;  %v5121_v32 = vld [vmem:[%s8172_s2 + $0x274] sm:$0xf]  ;;  %v4776_v0 = vld [vmem:[%s8172_s2 + $0x270] sm:$0xf] }
  0x4a   : > { %904 = vmatpush.bf16.msrb.mxu2 %v4349_v15  ;;  %8303 = vst [vmem:[#allocation25_spill] sm:$0xff] %v5864_v41  ;;  %v5867_v49 = vadd.f32 %v5414_v50, %v346_v25  ;;  %v5874_v52 = vpack.c.bf16 %v5864_v41, %v5861_v33  ;;  %v4714_v15 = vld [vmem:[%s8172_s2 + $0xf8] sm:$0xf0] }
  0x4b   : > { %993 = vmatpush.bf16.msrb.mxu3 %v4353_v10  ;;  %1268 = vmatpush.bf16.msrb.mxu1 %v4507_v23  ;;  %8305 = vst [vmem:[#allocation27_spill] sm:$0xff] %v5870_v51  ;;  %v5218_v10 = vunpack.c.h.bf16 %v5226_v63  ;;  %v4717_v19 = vor.u32 %v5105_v14, %v4714_v15  ;;  %v350_v25 = vmul.f32 %v5395_v38, %v5202_v12  ;;  %v4778_v63 = vld [vmem:[%s8172_s2 + $0x278] sm:$0xf0] }
  0x4c   : > { %1179 = vmatpush.bf16.msrb.mxu0 %v4503_v24  ;;  %8304 = vst [vmem:[#allocation26_spill] sm:$0xff] %v5867_v49  ;;  %v5878_v53 = vpack.c.bf16 %v5870_v51, %v5867_v49  ;;  %v349_v24 = vmul.f32 %v5395_v38, %v5201_v11  ;;  %v4781_v1 = vor.u32 %v5121_v32, %v4778_v63  ;;  %v5104_v32 = vld [vmem:[%s8172_s2 + $0xe4] sm:$0xf0]  ;;  %v4690_v51 = vld [vmem:[%s8172_s2 + $0xc8] sm:$0xf0] }
  0x4d   : > { %4282 = vmatmul.msk.bf16.gmra.mxu2 %vm5488_vm2, %v5626_v30  ;;  %4258 = vmatmul.msk.bf16.gmra.mxu0 %vm5488_vm2, %v5630_v31  ;;  %v374_v23 = vmul.f32 %v5395_v38, %v5218_v10  ;;  %v5122_v10 = vld [vmem:[%s8172_s2 + $0x274] sm:$0xf0]  ;;  %v5923_v38 = vadd.f32 %v5414_v50, %v373_v22  ;;  %v5932_v15 = vadd.f32 %v5414_v50, %v350_v25  ;;  %v5103_v22 = vld [vmem:[%s8172_s2 + $0xe4] sm:$0xf]  ;;  %v4688_v49 = vld [vmem:[%s8172_s2 + $0xc0] sm:$0xf] }
  0x4e   : > { %4306 = vmatmul.msk.bf16.gmra.mxu1 %vm5488_vm2, %v5630_v31  ;;  %1687 = vmatpush.bf16.msra.mxu2 %v4713_v21  ;;  %v4777_v12 = vor.u32 %v5122_v10, %v4776_v0  ;;  %v5929_v14 = vadd.f32 %v5414_v50, %v349_v24  ;;  %v8176_v21 = vmov 0.0|0.0   ;;  %v4704_v24 = vld [vmem:[%s8172_s2 + $0xe0] sm:$0xf] }
  0x4f   : > { %1776 = vmatpush.bf16.msra.mxu3 %v4717_v19  ;;  %8306 = vst [vmem:[#allocation28_spill] sm:$0xff] %v5923_v38  ;;  %v5926_v11 = vadd.f32 %v5414_v50, %v374_v23  ;;  %2125 = vmatpush.bf16.msra.mxu1 %v4781_v1  ;;  %v4706_v23 = vld [vmem:[%s8172_s2 + $0xe8] sm:$0xf0]  ;;  %v4705_v0 = vor.u32 %v5104_v32, %v4704_v24 }
  0x50   : > { %4330 = vmatmul.msk.bf16.gmra.mxu3 %vm5488_vm2, %v5626_v30  ;;  %8308 = vst [vmem:[#allocation30_spill] sm:$0xff] %v5929_v14  ;;  %2036 = vmatpush.bf16.msra.mxu0 %v4777_v12  ;;  %v5940_v19 = vpack.c.bf16 %v5932_v15, %v5929_v14  ;;  %v4709_v25 = vor.u32 %v5103_v22, %v4706_v23  ;;  %v4770_v22 = vld [vmem:[%s8172_s2 + $0x268] sm:$0xf0]  ;;  %v4768_v23 = vld [vmem:[%s8172_s2 + $0x260] sm:$0xf] }
  0x51   : > { %8307 = vst [vmem:[#allocation29_spill] sm:$0xff] %v5926_v11  ;;  %v5936_v16 = vpack.c.bf16 %v5926_v11, %v5923_v38  ;;  %v4773_v24 = vor.u32 %v5119_v45, %v4770_v22 }
  0x52   : > { %8309 = vst [vmem:[#allocation31_spill] sm:$0xff] %v5932_v15  ;;  %1688 = vmatpush.bf16.msra.mxu2 %v4705_v0 }
  0x53   : > { %1777 = vmatpush.bf16.msra.mxu3 %v4709_v25  ;;  %v5120_v25 = vld [vmem:[%s8172_s2 + $0x264] sm:$0xf0]  ;;  %2126 = vmatpush.bf16.msra.mxu1 %v4773_v24 }
  0x54   : > { %v4769_v32 = vor.u32 %v5120_v25, %v4768_v23 }
  0x56   : > { %2037 = vmatpush.bf16.msra.mxu0 %v4769_v32 }
  0x5d   : > { %4285 = vmatmul.msk.bf16.gmra.mxu2 %vm5488_vm2, %v5688_v8  ;;  %4261 = vmatmul.msk.bf16.gmra.mxu0 %vm5488_vm2, %v5692_v9 }
  0x5e   : > { %4309 = vmatmul.msk.bf16.gmra.mxu1 %vm5488_vm2, %v5692_v9 }
  0x60   : > { %4333 = vmatmul.msk.bf16.gmra.mxu3 %vm5488_vm2, %v5688_v8 }
  0x6d   : > { %4288 = vmatmul.msk.bf16.gmra.mxu2 %vm5488_vm2, %v5750_v47  ;;  %4264 = vmatmul.msk.bf16.gmra.mxu0 %vm5488_vm2, %v5754_v48 }
  0x6e   : > { %4312 = vmatmul.msk.bf16.gmra.mxu1 %vm5488_vm2, %v5754_v48 }
  0x70   : > { %4336 = vmatmul.msk.bf16.gmra.mxu3 %vm5488_vm2, %v5750_v47 }
  0x7d   : > { %4291 = vmatmul.msk.bf16.gmra.mxu2 %vm5488_vm2, %v5812_v39  ;;  %4267 = vmatmul.msk.bf16.gmra.mxu0 %vm5488_vm2, %v5816_v40 }
  0x7e   : > { %4315 = vmatmul.msk.bf16.gmra.mxu1 %vm5488_vm2, %v5816_v40 }
  0x80   : > { %4339 = vmatmul.msk.bf16.gmra.mxu3 %vm5488_vm2, %v5812_v39 }
  0x8d   : > { %4294 = vmatmul.msk.bf16.gmra.mxu2 %vm5488_vm2, %v5874_v52  ;;  %4270 = vmatmul.msk.bf16.gmra.mxu0 %vm5488_vm2, %v5878_v53 }
  0x8e   : > { %4318 = vmatmul.msk.bf16.gmra.mxu1 %vm5488_vm2, %v5878_v53 }
  0x90   : > { %4342 = vmatmul.msk.bf16.gmra.mxu3 %vm5488_vm2, %v5874_v52 }
  0x9d   : > { %4297 = vmatmul.msk.bf16.gmra.mxu2 %vm5488_vm2, %v5936_v16  ;;  %4273 = vmatmul.msk.bf16.gmra.mxu0 %vm5488_vm2, %v5940_v19 }
  0x9e   : > { %4321 = vmatmul.msk.bf16.gmra.mxu1 %vm5488_vm2, %v5940_v19 }
  0xa0   : > { %4345 = vmatmul.msk.bf16.gmra.mxu3 %vm5488_vm2, %v5936_v16 }
  0xaa   : > { %v5954_v50 = vpop.f32.mrf.mxu0 }
  0xab   : > { %v5956_v20 = vpop.f32.mrf.mxu1 }
  0xad   : > { %905 = vmatmul.bf16.vlgmr.msrb.gmra.mxu2 %v8176_v21  ;;  %4566 = vmatmul.msk.bf16.vlgmr.msrb.gmra.mxu0 %vm5488_vm2, %v5568_v60 }
  0xae   : > { %4611 = vmatmul.msk.bf16.vlgmr.msrb.gmra.mxu1 %vm5488_vm2, %v5568_v60 }
  0xb0   : > { %994 = vmatmul.bf16.vlgmr.msrb.gmra.mxu3 %v8176_v21  ;;  %v5978_v63 = vpop.f32.mrf.mxu2 }
  0xb2   : > { %v5982_v10 = vpop.f32.mrf.mxu0 }
  0xb3   : > { %v5980_v1 = vpop.f32.mrf.mxu3  ;;  %v5984_v12 = vpop.f32.mrf.mxu1 }
  0xb4   : > { %8310 = vst [vmem:[#allocation32_spill] sm:$0xff] %v5980_v1 }
  0xb8   : > { %v5998_v0 = vpop.f32.mrf.mxu2 }
  0xb9   : > { %8311 = vst [vmem:[#allocation33_spill] sm:$0xff] %v5998_v0 }
  0xba   : > { %v6002_v11 = vpop.f32.mrf.mxu0 }
  0xbb   : > { %v6000_v21 = vpop.f32.mrf.mxu3  ;;  %v6004_v38 = vpop.f32.mrf.mxu1 }
  0xbc   : > { %8312 = vst [vmem:[#allocation34_spill] sm:$0xff] %v6000_v21  ;;  %v5111_v21 = vld [vmem:[%s8172_s2 + $0x224] sm:$0xf] }
  0xbd   : > { %4412 = vmatmul.msk.bf16.gmra.mxu2 %vm5488_vm2, %v5494_v18  ;;  %4569 = vmatmul.msk.bf16.gmra.mxu0 %vm5488_vm2, %v5630_v31 }
  0xbe   : > { %4614 = vmatmul.msk.bf16.gmra.mxu1 %vm5488_vm2, %v5630_v31 }
  0xc0   : > { %4457 = vmatmul.msk.bf16.gmra.mxu3 %vm5488_vm2, %v5494_v18  ;;  %v6018_v45 = vpop.f32.mrf.mxu2  ;;  %v5101_v18 = vld [vmem:[%s8172_s2 + $0xd4] sm:$0xf] }
  0xc1   : > { %8313 = vst [vmem:[#allocation35_spill] sm:$0xff] %v6018_v45  ;;  %v4701_v43 = vor.u32 %v5101_v18, %v4698_v35  ;;  %v4762_v35 = vld [vmem:[%s8172_s2 + $0x258] sm:$0xf0] }
  0xc2   : > { %v6022_v23 = vpop.f32.mrf.mxu0  ;;  %v4765_v18 = vor.u32 %v5117_v55, %v4762_v35 }
  0xc3   : > { %v6020_v22 = vpop.f32.mrf.mxu3  ;;  %v6024_v24 = vpop.f32.mrf.mxu1  ;;  %1778 = vmatpush.bf16.msra.mxu3 %v4701_v43  ;;  %v5118_v43 = vld [vmem:[%s8172_s2 + $0x254] sm:$0xf0] }
  0xc4   : > { %8314 = vst [vmem:[#allocation36_spill] sm:$0xff] %v6020_v22  ;;  %2127 = vmatpush.bf16.msra.mxu1 %v4765_v18 }
  0xc8   : > { %v6026_v25 = vpop.f32.mrf.mxu2 }
  0xc9   : > { %8315 = vst [vmem:[#allocation37_spill] sm:$0xff] %v6026_v25 }
  0xca   : > { %v6030_v41 = vpop.f32.mrf.mxu0 }
  0xcb   : > { %v6028_v32 = vpop.f32.mrf.mxu3  ;;  %v6032_v33 = vpop.f32.mrf.mxu1 }
  0xcc   : > { %8316 = vst [vmem:[#allocation38_spill] sm:$0xff] %v6028_v32 }
  0xcd   : > { %4415 = vmatmul.msk.bf16.gmra.mxu2 %vm5488_vm2, %v5568_v60  ;;  %4572 = vmatmul.msk.bf16.gmra.mxu0 %vm5488_vm2, %v5692_v9 }
  0xce   : > { %4617 = vmatmul.msk.bf16.gmra.mxu1 %vm5488_vm2, %v5692_v9 }
  0xd0   : > { %4460 = vmatmul.msk.bf16.gmra.mxu3 %vm5488_vm2, %v5568_v60  ;;  %v5102_v60 = vld [vmem:[%s8172_s2 + $0xd4] sm:$0xf0]  ;;  %v6058_v42 = vpop.f32.mrf.mxu2 }
  0xd1   : > { %8317 = vst [vmem:[#allocation39_spill] sm:$0xff] %v6058_v42  ;;  %v4697_v5 = vor.u32 %v5102_v60, %v4696_v34  ;;  %v4760_v34 = vld [vmem:[%s8172_s2 + $0x250] sm:$0xf]  ;;  %v5113_v42 = vld [vmem:[%s8172_s2 + $0x234] sm:$0xf] }
  0xd2   : > { %v6062_v27 = vpop.f32.mrf.mxu0 }
  0xd3   : > { %v6060_v2 = vpop.f32.mrf.mxu3  ;;  %1689 = vmatpush.bf16.msra.mxu2 %v4697_v5  ;;  %v6064_v26 = vpop.f32.mrf.mxu1  ;;  %v4761_v5 = vor.u32 %v5118_v43, %v4760_v34 }
  0xd4   : > { %8318 = vst [vmem:[#allocation40_spill] sm:$0xff] %v6060_v2 }
  0xd5   : > { %2038 = vmatpush.bf16.msra.mxu0 %v4761_v5 }
  0xd8   : > { %v6078_v60 = vpop.f32.mrf.mxu2 }
  0xd9   : > { %8319 = vst [vmem:[#allocation41_spill] sm:$0xff] %v6078_v60 }
  0xda   : > { %v6082_v62 = vpop.f32.mrf.mxu0 }
  0xdb   : > { %v6080_v54 = vpop.f32.mrf.mxu3  ;;  %v6084_v61 = vpop.f32.mrf.mxu1 }
  0xdc   : > { %8320 = vst [vmem:[#allocation42_spill] sm:$0xff] %v6080_v54 }
  0xdd   : > { %4418 = vmatmul.msk.bf16.gmra.mxu2 %vm5488_vm2, %v5630_v31  ;;  %4575 = vmatmul.msk.bf16.gmra.mxu0 %vm5488_vm2, %v5754_v48 }
  0xde   : > { %4620 = vmatmul.msk.bf16.gmra.mxu1 %vm5488_vm2, %v5754_v48 }
  0xe0   : > { %4463 = vmatmul.msk.bf16.gmra.mxu3 %vm5488_vm2, %v5630_v31  ;;  %v6098_v55 = vpop.f32.mrf.mxu2  ;;  %v5099_v31 = vld [vmem:[%s8172_s2 + $0xc4] sm:$0xf] }
  0xe1   : > { %8321 = vst [vmem:[#allocation43_spill] sm:$0xff] %v6098_v55  ;;  %v4693_v37 = vor.u32 %v5099_v31, %v4690_v51  ;;  %v5115_v55 = vld [vmem:[%s8172_s2 + $0x244] sm:$0xf]  ;;  %v4754_v51 = vld [vmem:[%s8172_s2 + $0x248] sm:$0xf0] }
  0xe2   : > { %v6102_v34 = vpop.f32.mrf.mxu0  ;;  %v4757_v31 = vor.u32 %v5115_v55, %v4754_v51 }
  0xe3   : > { %v6100_v35 = vpop.f32.mrf.mxu3  ;;  %v6104_v18 = vpop.f32.mrf.mxu1  ;;  %1779 = vmatpush.bf16.msra.mxu3 %v4693_v37  ;;  %v5116_v37 = vld [vmem:[%s8172_s2 + $0x244] sm:$0xf0] }
  0xe4   : > { %8322 = vst [vmem:[#allocation44_spill] sm:$0xff] %v6100_v35  ;;  %2128 = vmatpush.bf16.msra.mxu1 %v4757_v31 }
  0xe8   : > { %v6106_v43 = vpop.f32.mrf.mxu2 }
  0xe9   : > { %8323 = vst [vmem:[#allocation45_spill] sm:$0xff] %v6106_v43 }
  0xea   : > { %v6110_v15 = vpop.f32.mrf.mxu0 }
  0xeb   : > { %v6108_v5 = vpop.f32.mrf.mxu3  ;;  %v6112_v14 = vpop.f32.mrf.mxu1 }
  0xec   : > { %8324 = vst [vmem:[#allocation46_spill] sm:$0xff] %v6108_v5 }
  0xed   : > { %4421 = vmatmul.msk.bf16.gmra.mxu2 %vm5488_vm2, %v5692_v9  ;;  %4578 = vmatmul.msk.bf16.gmra.mxu0 %vm5488_vm2, %v5816_v40 }
  0xee   : > { %4623 = vmatmul.msk.bf16.gmra.mxu1 %vm5488_vm2, %v5816_v40 }
  0xf0   : > { %4466 = vmatmul.msk.bf16.gmra.mxu3 %vm5488_vm2, %v5692_v9  ;;  %v5100_v9 = vld [vmem:[%s8172_s2 + $0xc4] sm:$0xf0]  ;;  %v6138_v36 = vpop.f32.mrf.mxu2 }
  0xf1   : > { %8325 = vst [vmem:[#allocation47_spill] sm:$0xff] %v6138_v36  ;;  %v4689_v5 = vor.u32 %v5100_v9, %v4688_v49  ;;  %v4752_v49 = vld [vmem:[%s8172_s2 + $0x240] sm:$0xf] }
  0xf2   : > { %v6142_v46 = vpop.f32.mrf.mxu0 }
  0xf3   : > { %v6140_v43 = vpop.f32.mrf.mxu3  ;;  %1690 = vmatpush.bf16.msra.mxu2 %v4689_v5  ;;  %v6144_v35 = vpop.f32.mrf.mxu1  ;;  %v4753_v5 = vor.u32 %v5116_v37, %v4752_v49 }
  0xf4   : > { %8326 = vst [vmem:[#allocation48_spill] sm:$0xff] %v6140_v43 }
  0xf5   : > { %2039 = vmatpush.bf16.msra.mxu0 %v4753_v5 }
  0xf8   : > { %v6158_v9 = vpop.f32.mrf.mxu2 }
  0xf9   : > { %8327 = vst [vmem:[#allocation49_spill] sm:$0xff] %v6158_v9 }
  0xfa   : > { %v6162_v36 = vpop.f32.mrf.mxu0 }
  0xfb   : > { %v6160_v43 = vpop.f32.mrf.mxu3  ;;  %v6164_v44 = vpop.f32.mrf.mxu1 }
  0xfc   : > { %8328 = vst [vmem:[#allocation50_spill] sm:$0xff] %v6160_v43 }
  0xfd   : > { %4424 = vmatmul.msk.bf16.gmra.mxu2 %vm5488_vm2, %v5754_v48  ;;  %4581 = vmatmul.msk.bf16.gmra.mxu0 %vm5488_vm2, %v5878_v53 }
  0xfe   : > { %4626 = vmatmul.msk.bf16.gmra.mxu1 %vm5488_vm2, %v5878_v53 }
 0x100   : > { %4469 = vmatmul.msk.bf16.gmra.mxu3 %vm5488_vm2, %v5754_v48  ;;  %v6178_v55 = vpop.f32.mrf.mxu2  ;;  %v5097_v48 = vld [vmem:[%s8172_s2 + $0xb4] sm:$0xf] }
 0x101   : > { %8329 = vst [vmem:[#allocation51_spill] sm:$0xff] %v6178_v55 }
 0x102   : > { %v6182_v49 = vpop.f32.mrf.mxu0 }
 0x103   : > { %v6180_v51 = vpop.f32.mrf.mxu3  ;;  %v6184_v31 = vpop.f32.mrf.mxu1 }
 0x104   : > { %8330 = vst [vmem:[#allocation52_spill] sm:$0xff] %v6180_v51 }
 0x108   : > { %v6186_v37 = vpop.f32.mrf.mxu2 }
 0x109   : > { %8331 = vst [vmem:[#allocation53_spill] sm:$0xff] %v6186_v37  ;;  %v4680_v37 = vld [vmem:[%s8172_s2 + $0xb0] sm:$0xf] }
 0x10a   : > { %v6190_v43 = vpop.f32.mrf.mxu0 }
 0x10b   : > { %v6188_v5 = vpop.f32.mrf.mxu3  ;;  %v6192_v9 = vpop.f32.mrf.mxu1 }
 0x10c   : > { %8332 = vst [vmem:[#allocation54_spill] sm:$0xff] %v6188_v5  ;;  %v4682_v5 = vld [vmem:[%s8172_s2 + $0xb8] sm:$0xf0] }
 0x10d   : > { %4427 = vmatmul.msk.bf16.gmra.mxu2 %vm5488_vm2, %v5816_v40  ;;  %4584 = vmatmul.msk.bf16.gmra.mxu0 %vm5488_vm2, %v5940_v19  ;;  %v4685_v51 = vor.u32 %v5097_v48, %v4682_v5  ;;  %v4746_v5 = vld [vmem:[%s8172_s2 + $0x238] sm:$0xf0] }
 0x10e   : > { %4629 = vmatmul.msk.bf16.gmra.mxu1 %vm5488_vm2, %v5940_v19  ;;  %v4749_v48 = vor.u32 %v5113_v42, %v4746_v5 }
 0x10f   : > { %1780 = vmatpush.bf16.msra.mxu3 %v4685_v51  ;;  %v5114_v51 = vld [vmem:[%s8172_s2 + $0x234] sm:$0xf0] }
 0x110   : > { %4472 = vmatmul.msk.bf16.gmra.mxu3 %vm5488_vm2, %v5816_v40  ;;  %v5098_v40 = vld [vmem:[%s8172_s2 + $0xb4] sm:$0xf0]  ;;  %v6218_v55 = vpop.f32.mrf.mxu2  ;;  %2129 = vmatpush.bf16.msra.mxu1 %v4749_v48 }
 0x111   : > { %8333 = vst [vmem:[#allocation55_spill] sm:$0xff] %v6218_v55  ;;  %v4681_v54 = vor.u32 %v5098_v40, %v4680_v37  ;;  %v4744_v37 = vld [vmem:[%s8172_s2 + $0x230] sm:$0xf] }
 0x112   : > { %v6222_v7 = vpop.f32.mrf.mxu0 }
 0x113   : > { %v6220_v60 = vpop.f32.mrf.mxu3  ;;  %1691 = vmatpush.bf16.msra.mxu2 %v4681_v54  ;;  %v6224_v2 = vpop.f32.mrf.mxu1  ;;  %v4745_v54 = vor.u32 %v5114_v51, %v4744_v37 }
 0x114   : > { %8334 = vst [vmem:[#allocation56_spill] sm:$0xff] %v6220_v60 }
 0x115   : > { %2040 = vmatpush.bf16.msra.mxu0 %v4745_v54 }
 0x118   : > { %v6238_v40 = vpop.f32.mrf.mxu2 }
 0x119   : > { %8335 = vst [vmem:[#allocation57_spill] sm:$0xff] %v6238_v40 }
 0x11a   : > { %v6242_v55 = vpop.f32.mrf.mxu0 }
 0x11b   : > { %v6240_v60 = vpop.f32.mrf.mxu3  ;;  %v6244_v6 = vpop.f32.mrf.mxu1 }
 0x11c   : > { %8336 = vst [vmem:[#allocation58_spill] sm:$0xff] %v6240_v60 }
 0x11d   : > { %4430 = vmatmul.msk.bf16.gmra.mxu2 %vm5488_vm2, %v5878_v53  ;;  %4587 = vmatmul.msk.bf16.gmra.mxu0 %vm5488_vm2, %v5475_v13 }
 0x11e   : > { %4632 = vmatmul.msk.bf16.gmra.mxu1 %vm5488_vm2, %v5475_v13 }
 0x120   : > { %4475 = vmatmul.msk.bf16.gmra.mxu3 %vm5488_vm2, %v5878_v53  ;;  %v6258_v42 = vpop.f32.mrf.mxu2  ;;  %v5095_v53 = vld [vmem:[%s8172_s2 + $0xa4] sm:$0xf] }
 0x121   : > { %8337 = vst [vmem:[#allocation59_spill] sm:$0xff] %v6258_v42 }
 0x122   : > { %v6262_v37 = vpop.f32.mrf.mxu0 }
 0x123   : > { %v6260_v5 = vpop.f32.mrf.mxu3  ;;  %v6264_v48 = vpop.f32.mrf.mxu1 }
 0x124   : > { %8338 = vst [vmem:[#allocation60_spill] sm:$0xff] %v6260_v5 }
 0x128   : > { %v6266_v51 = vpop.f32.mrf.mxu2 }
 0x129   : > { %8339 = vst [vmem:[#allocation61_spill] sm:$0xff] %v6266_v51  ;;  %v4672_v51 = vld [vmem:[%s8172_s2 + $0xa0] sm:$0xf] }
 0x12a   : > { %v1181_v60 = vpop.f32.mrf.mxu0 }
 0x12b   : > { %v6268_v54 = vpop.f32.mrf.mxu3  ;;  %v1270_v40 = vpop.f32.mrf.mxu1 }
 0x12c   : > { %8340 = vst [vmem:[#allocation62_spill] sm:$0xff] %v6268_v54  ;;  %v4674_v54 = vld [vmem:[%s8172_s2 + $0xa8] sm:$0xf0] }
 0x12d   : > { %4433 = vmatmul.msk.bf16.gmra.mxu2 %vm5488_vm2, %v5940_v19  ;;  %4590 = vmatmul.msk.bf16.gmra.mxu0 %vm5488_vm2, %v5564_v59  ;;  %v4677_v5 = vor.u32 %v5095_v53, %v4674_v54  ;;  %v4738_v54 = vld [vmem:[%s8172_s2 + $0x228] sm:$0xf0] }
 0x12e   : > { %4635 = vmatmul.msk.bf16.gmra.mxu1 %vm5488_vm2, %v5564_v59 }
 0x12f   : > { %1781 = vmatpush.bf16.msra.mxu3 %v4677_v5 }
 0x130   : > { %4478 = vmatmul.msk.bf16.gmra.mxu3 %vm5488_vm2, %v5940_v19  ;;  %v5096_v19 = vld [vmem:[%s8172_s2 + $0xa4] sm:$0xf0]  ;;  %v906_v42 = vpop.f32.mrf.mxu2 }
 0x131   : > { %v4673_v32 = vor.u32 %v5096_v19, %v4672_v51  ;;  %v907_v25 = vadd.f32 %v906_v42, %v5954_v50  ;;  %v4736_v51 = vld [vmem:[%s8172_s2 + $0x220] sm:$0xf]  ;;  %v4741_v42 = vor.u32 %v5111_v21, %v4738_v54 }
 0x132   : > { %v1183_v45 = vpop.f32.mrf.mxu0 }
 0x133   : > { %v995_v29 = vpop.f32.mrf.mxu3  ;;  %1692 = vmatpush.bf16.msra.mxu2 %v4673_v32  ;;  %v1272_v28 = vpop.f32.mrf.mxu1  ;;  %v6305_v50 = vadd.f32 %v1181_v60, %v907_v25  ;;  %2130 = vmatpush.bf16.msra.mxu1 %v4741_v42 }
 0x134   : > { %v996_v22 = vadd.f32 %v995_v29, %v5956_v20  ;;  %v5112_v29 = vld [vmem:[%s8172_s2 + $0x224] sm:$0xf0] }
 0x135   : > { %v4737_v32 = vor.u32 %v5112_v29, %v4736_v51 }
 0x136   : > { %v6310_v20 = vadd.f32 %v1270_v40, %v996_v22 }
 0x137   : > { %2041 = vmatpush.bf16.msra.mxu0 %v4737_v32 }
 0x138   : > { %v908_v5 = vpop.f32.mrf.mxu2 }
 0x139   : > { %v909_v53 = vadd.f32 %v908_v5, %v5982_v10 }
 0x13a   : > { %v1186_v58 = vpop.f32.mrf.mxu0 }
 0x13b   : > { %v997_v19 = vpop.f32.mrf.mxu3  ;;  %v1275_v1 = vpop.f32.mrf.mxu1  ;;  %v6314_v25 = vadd.f32 %v1183_v45, %v909_v53 }
 0x13c   : > { %v998_v0 = vadd.f32 %v997_v19, %v5984_v12 }
 0x13d   : > { %4436 = vmatmul.msk.bf16.gmra.mxu2 %vm5488_vm2, %v5475_v13  ;;  %4593 = vmatmul.msk.bf16.gmra.mxu0 %vm5488_vm2, %v5626_v30 }
 0x13e   : > { %v6316_v21 = vadd.f32 %v1272_v28, %v998_v0  ;;  %4638 = vmatmul.msk.bf16.gmra.mxu1 %vm5488_vm2, %v5626_v30 }
 0x140   : > { %4481 = vmatmul.msk.bf16.gmra.mxu3 %vm5488_vm2, %v5475_v13  ;;  %v911_v10 = vpop.f32.mrf.mxu2 }
 0x141   : > { %v912_v28 = vadd.f32 %v911_v10, %v6002_v11 }
 0x142   : > { %v1188_v45 = vpop.f32.mrf.mxu0 }
 0x143   : > { %v1000_v12 = vpop.f32.mrf.mxu3  ;;  %v1277_v22 = vpop.f32.mrf.mxu1  ;;  %v6332_v60 = vadd.f32 %v1186_v58, %v912_v28  ;;  %v5093_v58 = vld [vmem:[%s8172_s2 + $0x94] sm:$0xf] }
 0x144   : > { %v1001_v0 = vadd.f32 %v1000_v12, %v6004_v38  ;;  %v4666_v38 = vld [vmem:[%s8172_s2 + $0x98] sm:$0xf0] }
 0x146   : > { %v6334_v40 = vadd.f32 %v1275_v1, %v1001_v0  ;;  %v4664_v1 = vld [vmem:[%s8172_s2 + $0x90] sm:$0xf] }
 0x148   : > { %v913_v54 = vpop.f32.mrf.mxu2 }
 0x149   : > { %v914_v51 = vadd.f32 %v913_v54, %v6022_v23  ;;  %v4669_v23 = vor.u32 %v5093_v58, %v4666_v38  ;;  %v4728_v54 = vld [vmem:[%s8172_s2 + $0x210] sm:$0xf] }
 0x14a   : > { %v1191_v29 = vpop.f32.mrf.mxu0 }
 0x14b   : > { %v1002_v13 = vpop.f32.mrf.mxu3  ;;  %v1280_v32 = vpop.f32.mrf.mxu1  ;;  %v6338_v5 = vadd.f32 %v1188_v45, %v914_v51  ;;  %1782 = vmatpush.bf16.msra.mxu3 %v4669_v23  ;;  %v5109_v45 = vld [vmem:[%s8172_s2 + $0x214] sm:$0xf] }
 0x14c   : > { %v1003_v42 = vadd.f32 %v1002_v13, %v6024_v24 }
 0x14d   : > { %4439 = vmatmul.msk.bf16.gmra.mxu2 %vm5488_vm2, %v5564_v59  ;;  %4596 = vmatmul.msk.bf16.gmra.mxu0 %vm5488_vm2, %v5688_v8 }
 0x14e   : > { %v6340_v11 = vadd.f32 %v1277_v22, %v1003_v42  ;;  %4641 = vmatmul.msk.bf16.gmra.mxu1 %vm5488_vm2, %v5688_v8  ;;  %v4730_v22 = vld [vmem:[%s8172_s2 + $0x218] sm:$0xf0] }
 0x14f   : > { %v4733_v51 = vor.u32 %v5109_v45, %v4730_v22 }
 0x150   : > { %4484 = vmatmul.msk.bf16.gmra.mxu3 %vm5488_vm2, %v5564_v59  ;;  %v5094_v59 = vld [vmem:[%s8172_s2 + $0x94] sm:$0xf0]  ;;  %v916_v24 = vpop.f32.mrf.mxu2 }
 0x151   : > { %v4665_v53 = vor.u32 %v5094_v59, %v4664_v1  ;;  %v917_v19 = vadd.f32 %v916_v24, %v6030_v41  ;;  %2131 = vmatpush.bf16.msra.mxu1 %v4733_v51 }
 0x152   : > { %v1193_v12 = vpop.f32.mrf.mxu0 }
 0x153   : > { %v1005_v10 = vpop.f32.mrf.mxu3  ;;  %1693 = vmatpush.bf16.msra.mxu2 %v4665_v53  ;;  %v1282_v0 = vpop.f32.mrf.mxu1  ;;  %v6377_v41 = vadd.f32 %v1191_v29, %v917_v19 }
 0x154   : > { %v1006_v28 = vadd.f32 %v1005_v10, %v6032_v33  ;;  %v5110_v33 = vld [vmem:[%s8172_s2 + $0x214] sm:$0xf0] }
 0x155   : > { %v4729_v42 = vor.u32 %v5110_v33, %v4728_v54 }
 0x156   : > { %v6382_v13 = vadd.f32 %v1280_v32, %v1006_v28 }
 0x157   : > { %2042 = vmatpush.bf16.msra.mxu0 %v4729_v42 }
 0x158   : > { %v918_v58 = vpop.f32.mrf.mxu2 }
 0x159   : > { %v919_v38 = vadd.f32 %v918_v58, %v6062_v27 }
 0x15a   : > { %v1196_v59 = vpop.f32.mrf.mxu0 }
 0x15b   : > { %v1007_v1 = vpop.f32.mrf.mxu3  ;;  %v1285_v24 = vpop.f32.mrf.mxu1  ;;  %v6386_v29 = vadd.f32 %v1193_v12, %v919_v38 }
 0x15c   : > { %v1008_v23 = vadd.f32 %v1007_v1, %v6064_v26 }
 0x15d   : > { %4442 = vmatmul.msk.bf16.gmra.mxu2 %vm5488_vm2, %v5626_v30  ;;  %4599 = vmatmul.msk.bf16.gmra.mxu0 %vm5488_vm2, %v5750_v47 }
 0x15e   : > { %v6388_v53 = vadd.f32 %v1282_v0, %v1008_v23  ;;  %4644 = vmatmul.msk.bf16.gmra.mxu1 %vm5488_vm2, %v5750_v47 }
 0x160   : > { %4487 = vmatmul.msk.bf16.gmra.mxu3 %vm5488_vm2, %v5626_v30  ;;  %v921_v26 = vpop.f32.mrf.mxu2 }
 0x161   : > { %v922_v27 = vadd.f32 %v921_v26, %v6082_v62 }
 0x162   : > { %v1198_v10 = vpop.f32.mrf.mxu0 }
 0x163   : > { %v1010_v32 = vpop.f32.mrf.mxu3  ;;  %v1287_v28 = vpop.f32.mrf.mxu1  ;;  %v6404_v12 = vadd.f32 %v1196_v59, %v922_v27 }
 0x164   : > { %v1011_v19 = vadd.f32 %v1010_v32, %v6084_v61  ;;  %v5091_v61 = vld [vmem:[%s8172_s2 + $0x84] sm:$0xf] }
 0x165   : > { %v5107_v32 = vld [vmem:[%s8172_s2 + $0x204] sm:$0xf] }
 0x166   : > { %v6406_v0 = vadd.f32 %v1285_v24, %v1011_v19  ;;  %v4722_v19 = vld [vmem:[%s8172_s2 + $0x208] sm:$0xf0] }
 0x168   : > { %v923_v45 = vpop.f32.mrf.mxu2 }
 0x169   : > { %v924_v22 = vadd.f32 %v923_v45, %v6102_v34  ;;  %v4658_v34 = vld [vmem:[%s8172_s2 + $0x88] sm:$0xf0] }
 0x16a   : > { %v1201_v51 = vpop.f32.mrf.mxu0  ;;  %v4661_v58 = vor.u32 %v5091_v61, %v4658_v34 }
 0x16b   : > { %v1012_v30 = vpop.f32.mrf.mxu3  ;;  %v1290_v33 = vpop.f32.mrf.mxu1  ;;  %v6410_v42 = vadd.f32 %v1198_v10, %v924_v22  ;;  %v4720_v10 = vld [vmem:[%s8172_s2 + $0x200] sm:$0xf] }
 0x16c   : > { %v1013_v54 = vadd.f32 %v1012_v30, %v6104_v18  ;;  %v4656_v18 = vld [vmem:[%s8172_s2 + $0x80] sm:$0xf]  ;;  %1783 = vmatpush.bf16.msra.mxu3 %v4661_v58 }
 0x16d   : > { %4445 = vmatmul.msk.bf16.gmra.mxu2 %vm5488_vm2, %v5688_v8  ;;  %4602 = vmatmul.msk.bf16.gmra.mxu0 %vm5488_vm2, %v5812_v39 }
 0x16e   : > { %v6412_v62 = vadd.f32 %v1287_v28, %v1013_v54  ;;  %4647 = vmatmul.msk.bf16.gmra.mxu1 %vm5488_vm2, %v5812_v39  ;;  %v4725_v28 = vor.u32 %v5107_v32, %v4722_v19  ;;  %v5272_v32 = vmov 0.0  }
 0x16f   : > { %3850 = vst [vmem:[%s6484_s12] sm:$0xff] %v5272_v32 }
 0x170   : > { %4490 = vmatmul.msk.bf16.gmra.mxu3 %vm5488_vm2, %v5688_v8  ;;  %v5092_v8 = vld [vmem:[%s8172_s2 + $0x84] sm:$0xf0]  ;;  %v926_v38 = vpop.f32.mrf.mxu2  ;;  %2132 = vmatpush.bf16.msra.mxu1 %v4725_v28  ;;  %3851 = vst [vmem:[%s6484_s12 + $0x8] sm:$0xff] %v5272_v32 }
 0x171   : > { %v4657_v1 = vor.u32 %v5092_v8, %v4656_v18  ;;  %v927_v23 = vadd.f32 %v926_v38, %v6110_v15 }
 0x172   : > { %v1203_v26 = vpop.f32.mrf.mxu0 }
 0x173   : > { %v1015_v59 = vpop.f32.mrf.mxu3  ;;  %1694 = vmatpush.bf16.msra.mxu2 %v4657_v1  ;;  %v1292_v27 = vpop.f32.mrf.mxu1  ;;  %v6449_v15 = vadd.f32 %v1201_v51, %v927_v23 }
 0x174   : > { %v1016_v24 = vadd.f32 %v1015_v59, %v6112_v14  ;;  %v5108_v14 = vld [vmem:[%s8172_s2 + $0x204] sm:$0xf0] }
 0x175   : > { %v4721_v22 = vor.u32 %v5108_v14, %v4720_v10  ;;  %v4840_v14 = vld [vmem:[%s8172_s2 + $0x3f0] sm:$0xf] }
 0x176   : > { %v6454_v45 = vadd.f32 %v1290_v33, %v1016_v24 }
 0x177   : > { %2043 = vmatpush.bf16.msra.mxu0 %v4721_v22 }
 0x178   : > { %v928_v30 = vpop.f32.mrf.mxu2 }
 0x179   : > { %v929_v54 = vadd.f32 %v928_v30, %v6142_v46 }
 0x17a   : > { %v1206_v18 = vpop.f32.mrf.mxu0 }
 0x17b   : > { %v1017_v61 = vpop.f32.mrf.mxu3  ;;  %v1295_v51 = vpop.f32.mrf.mxu1  ;;  %v6458_v58 = vadd.f32 %v1203_v26, %v929_v54 }
 0x17c   : > { %v1018_v34 = vadd.f32 %v1017_v61, %v6144_v35 }
 0x17d   : > { %4448 = vmatmul.msk.bf16.gmra.mxu2 %vm5488_vm2, %v5750_v47  ;;  %4605 = vmatmul.msk.bf16.gmra.mxu0 %vm5488_vm2, %v5874_v52 }
 0x17e   : > { %v6460_v8 = vadd.f32 %v1292_v27, %v1018_v34  ;;  %4650 = vmatmul.msk.bf16.gmra.mxu1 %vm5488_vm2, %v5874_v52  ;;  %v219_v34 = vld [vmem:[%s5385_s19 + $0x14] sm:$0x1] }
 0x180   : > { %4493 = vmatmul.msk.bf16.gmra.mxu3 %vm5488_vm2, %v5750_v47  ;;  %v931_v46 = vpop.f32.mrf.mxu2 }
 0x181   : > { %v932_v35 = vadd.f32 %v931_v46, %v6162_v36 }
 0x182   : > { %v1208_v1 = vpop.f32.mrf.mxu0 }
 0x183   : > { %v1020_v33 = vpop.f32.mrf.mxu3  ;;  %v1297_v23 = vpop.f32.mrf.mxu1  ;;  %v6476_v59 = vadd.f32 %v1206_v18, %v932_v35  ;;  %v5153_v35 = vld [vmem:[%s8172_s2 + $0x174] sm:$0xf] }
 0x184   : > { %v1021_v38 = vadd.f32 %v1020_v33, %v6164_v44  ;;  %v4906_v33 = vld [vmem:[%s8172_s2 + $0x178] sm:$0xf0] }
 0x186   : > { %v6479_v24 = vadd.f32 %v1295_v51, %v1021_v38 }
 0x188   : > { %v933_v47 = vpop.f32.mrf.mxu2 }
 0x189   : > { %v934_v36 = vadd.f32 %v933_v47, %v6182_v49  ;;  %v5137_v49 = vld [vmem:[%s8172_s2 + $0x3f4] sm:$0xf] }
 0x18a   : > { %v1211_v27 = vpop.f32.mrf.mxu0 }
 0x18b   : > { %v1022_v26 = vpop.f32.mrf.mxu3  ;;  %v1300_v19 = vpop.f32.mrf.mxu1  ;;  %v6492_v10 = vadd.f32 %v1208_v1, %v934_v36  ;;  %v273_v1 = vunpack.c.l.bf16 %v219_v34 }
 0x18c   : > { %v1023_v44 = vadd.f32 %v1022_v26, %v6184_v31  ;;  %v4842_v31 = vld [vmem:[%s8172_s2 + $0x3f8] sm:$0xf0] }
 0x18d   : > { %4451 = vmatmul.msk.bf16.gmra.mxu2 %vm5488_vm2, %v5812_v39  ;;  %4608 = vmatmul.msk.bf16.gmra.mxu0 %vm5488_vm2, %v5936_v16  ;;  %v4845_v22 = vor.u32 %v5137_v49, %v4842_v31 }
 0x18e   : > { %v6494_v28 = vadd.f32 %v1297_v23, %v1023_v44  ;;  %4653 = vmatmul.msk.bf16.gmra.mxu1 %vm5488_vm2, %v5936_v16  ;;  %v4909_v23 = vor.u32 %v5153_v35, %v4906_v33  ;;  %v6542_v44 = vld [vmem:[%s8171_s1] ss:$0 sm:$0xff] }
 0x18f   : > { %2474 = vmatpush.bf16.msrb.mxu3 %v4845_v22 }
 0x190   : > { %4496 = vmatmul.msk.bf16.gmra.mxu3 %vm5488_vm2, %v5812_v39  ;;  %v5138_v39 = vld [vmem:[%s8172_s2 + $0x3f4] sm:$0xf0]  ;;  %v936_v30 = vpop.f32.mrf.mxu2  ;;  %2941 = vmatpush.bf16.msrb.mxu1 %v4909_v23 }
 0x191   : > { %v4841_v54 = vor.u32 %v5138_v39, %v4840_v14  ;;  %v937_v16 = vadd.f32 %v936_v30, %v6190_v43  ;;  %v4904_v43 = vld [vmem:[%s8172_s2 + $0x170] sm:$0xf]  ;;  %v6547_v14 = vadd.s32 16, %v5425_v57 }
 0x192   : > { %v1213_v51 = vpop.f32.mrf.mxu0 }
 0x193   : > { %v1025_v61 = vpop.f32.mrf.mxu3  ;;  %2385 = vmatpush.bf16.msrb.mxu2 %v4841_v54  ;;  %v1302_v46 = vpop.f32.mrf.mxu1  ;;  %v6532_v38 = vadd.f32 %v1211_v27, %v937_v16  ;;  %v330_v27 = vmul.f32 %v6542_v44, %v273_v1  ;;  %v6555_v54 = vld [vmem:[%s8171_s1 + $0x1] ss:$0 sm:$0xff]  ;;  %vm449_vm3 = vcmp.le.s32.totalorder %v6547_v14, 16 }
 0x194   : > { %v1026_v18 = vadd.f32 %v1025_v61, %v6192_v9  ;;  %v5154_v9 = vld [vmem:[%s8172_s2 + $0x174] sm:$0xf0] }
 0x195   : > { %v4905_v36 = vor.u32 %v5154_v9, %v4904_v43  ;;  %v385_v16 = vadd.f32 %v6555_v54, %v330_v27  ;;  %v1469_v43 = vrot.slane %v5455_v4, 1 }
 0x196   : > { %v6537_v47 = vadd.f32 %v1300_v19, %v1026_v18 }
 0x197   : > { %2852 = vmatpush.bf16.msrb.mxu0 %v4905_v36  ;;  %v6576_v18 = vsel %vm449_vm3, %v385_v16, 0.0 }
 0x198   : > { %v938_v26 = vpop.f32.mrf.mxu2  ;;  %8343 = vst [vmem:[#allocation64_spill] sm:$0xff] %v6576_v18 }
 0x199   : > { %v939_v49 = vadd.f32 %v938_v26, %v6222_v7  ;;  %v8341_v7 = vmov 0.0|0.0   ;;  %v1463_v26 = vrot.slane %v5272_v32, 1 }
 0x19a   : > { %v1216_v22 = vpop.f32.mrf.mxu0 }
 0x19b   : > { %v1027_v31 = vpop.f32.mrf.mxu3  ;;  %v1305_v39 = vpop.f32.mrf.mxu1  ;;  %v6550_v30 = vadd.f32 %v1213_v51, %v939_v49  ;;  %v222_v51 = vld [vmem:[%s5385_s19 + $0x20] sm:$0x1]  ;;  %v6593_v16 = vpack.c.bf16 %v1463_v26, %v1463_v26 }
 0x19c   : > { %v1028_v19 = vadd.f32 %v1027_v31, %v6224_v2  ;;  %v6572_v2 = vsel %vm438_vm0, %v5452_v3, 0.0  ;;  %v1471_v3 = vrot.slane %v6576_v18, 1  ;;  %v276_v23 = vunpack.c.l.bf16 %v222_v51 }
 0x19d   : > { %4454 = vmatmul.msk.bf16.gmra.mxu2 %vm5488_vm2, %v5874_v52  ;;  %1255 = vmatmul.bf16.gmra.mxu0 %v8341_v7  ;;  %8342 = vst [vmem:[#allocation63_spill] sm:$0xff] %v6572_v2  ;;  %v1468_v33 = vrot.slane %v6572_v2, 1 }
 0x19e   : > { %v6558_v61 = vadd.f32 %v1302_v46, %v1028_v19  ;;  %1344 = vmatmul.bf16.gmra.mxu1 %v8341_v7  ;;  %v1472_v27 = vsel %vm1462_vm4, %v1469_v43, %v1471_v3  ;;  %8344 = vst [vmem:[#allocation65_spill] sm:$0xff] %v6593_v16 }
 0x1a0   : > { %4499 = vmatmul.msk.bf16.gmra.mxu3 %vm5488_vm2, %v5874_v52  ;;  %v941_v34 = vpop.f32.mrf.mxu2 }
 0x1a1   : > { %v942_v46 = vadd.f32 %v941_v34, %v6242_v55  ;;  %v1470_v55 = vsel %vm1462_vm4, %v1468_v33, %v1469_v43  ;;  %v6615_v33 = vsel %vm438_vm0, %v5557_v56, 0.0  ;;  %v5136_v43 = vld [vmem:[%s8172_s2 + $0x3e4] sm:$0xf0]  ;;  %v8347_v56 = vld [vmem:[#allocation32_spill] sm:$0xff] }
 0x1a2   : > { %v1218_v52 = vpop.f32.mrf.mxu0  ;;  %v1576_v34 = vpack.c.bf16 %v1472_v27, %v1470_v55  ;;  %8345 = vst [vmem:[#allocation66_spill] sm:$0xff] %v6615_v33  ;;  %v225_v55 = vld [vmem:[%s5385_s19 + $0x2c] sm:$0x1]  ;;  %v1473_v27 = vrot.slane %v6615_v33, 1 }
 0x1a3   : > { %v1030_v35 = vpop.f32.mrf.mxu3  ;;  %v1307_v1 = vpop.f32.mrf.mxu1  ;;  %v6584_v9 = vadd.f32 %v1216_v22, %v942_v46 }
 0x1a4   : > { %v1031_v17 = vadd.f32 %v1030_v35, %v6244_v6  ;;  %v333_v6 = vmul.f32 %v6542_v44, %v276_v23  ;;  %v4832_v35 = vld [vmem:[%s8172_s2 + $0x3e0] sm:$0xf] }
 0x1a5   : > { %v4833_v3 = vor.u32 %v5136_v43, %v4832_v35 }
 0x1a6   : > { %v6586_v36 = vadd.f32 %v1305_v39, %v1031_v17  ;;  %v388_v51 = vadd.f32 %v6555_v54, %v333_v6 }
 0x1a7   : > { %2386 = vmatpush.bf16.msrb.mxu2 %v4833_v3 }
 0x1a8   : > { %v943_v49 = vpop.f32.mrf.mxu2  ;;  %v6619_v17 = vsel %vm449_vm3, %v388_v51, 0.0 }
 0x1a9   : > { %v944_v31 = vadd.f32 %v943_v49, %v6262_v37  ;;  %v5135_v37 = vld [vmem:[%s8172_s2 + $0x3e4] sm:$0xf]  ;;  %8346 = vst [vmem:[#allocation67_spill] sm:$0xff] %v6619_v17 }
 0x1aa   : > { %v1221_v7 = vpop.f32.mrf.mxu0 }
 0x1ab   : > { %v1032_v19 = vpop.f32.mrf.mxu3  ;;  %v1310_v39 = vpop.f32.mrf.mxu1  ;;  %v6597_v32 = vadd.f32 %v1218_v52, %v944_v31  ;;  %v8348_v31 = vld [vmem:[#allocation7_spill] sm:$0xff] }
 0x1ac   : > { %v1033_v22 = vadd.f32 %v1032_v19, %v6264_v48  ;;  %v4834_v48 = vld [vmem:[%s8172_s2 + $0x3e8] sm:$0xf0]  ;;  %v1474_v19 = vrot.slane %v8348_v31, 1 }
 0x1ad   : > { %1695 = vmatmul.bf16.vlgmr.msra.gmra.mxu2 %v6593_v16  ;;  %2044 = vmatmul.bf16.vlgmr.msra.gmra.mxu0 %v1576_v34  ;;  %v4837_v52 = vor.u32 %v5135_v37, %v4834_v48  ;;  %v5151_v37 = vld [vmem:[%s8172_s2 + $0x164] sm:$0xf]  ;;  %v4896_v48 = vld [vmem:[%s8172_s2 + $0x160] sm:$0xf] }
 0x1ae   : > { %v6599_v46 = vadd.f32 %v1307_v1, %v1033_v22  ;;  %2133 = vmatmul.bf16.vlgmr.msra.gmra.mxu1 %v1576_v34  ;;  %v1476_v22 = vrot.slane %v6619_v17, 1 }
 0x1af   : > { %2475 = vmatpush.bf16.msrb.mxu3 %v4837_v52  ;;  %v279_v52 = vunpack.c.l.bf16 %v225_v55 }
 0x1b0   : > { %1784 = vmatmul.bf16.vlgmr.msra.gmra.mxu3 %v6593_v16  ;;  %v946_v1 = vpop.f32.mrf.mxu2  ;;  %v1477_v16 = vsel %vm1462_vm4, %v1474_v19, %v1476_v22  ;;  %v228_v22 = vld [vmem:[%s5385_s19 + $0x38] sm:$0x1] }
 0x1b1   : > { %v947_v23 = vadd.f32 %v946_v1, %v5978_v63  ;;  %v4898_v63 = vld [vmem:[%s8172_s2 + $0x168] sm:$0xf0]  ;;  %v5152_v1 = vld [vmem:[%s8172_s2 + $0x164] sm:$0xf0]  ;;  %v336_v31 = vmul.f32 %v6542_v44, %v279_v52 }
 0x1b2   : > { %v1223_v49 = vpop.f32.mrf.mxu0  ;;  %v4901_v43 = vor.u32 %v5151_v37, %v4898_v63  ;;  %v8351_v37 = vld [vmem:[#allocation34_spill] sm:$0xff] }
 0x1b3   : > { %v1035_v26 = vpop.f32.mrf.mxu3  ;;  %v1312_v51 = vpop.f32.mrf.mxu1  ;;  %v6639_v35 = vadd.f32 %v1221_v7, %v947_v23  ;;  %v8350_v7 = vld [vmem:[#allocation33_spill] sm:$0xff] }
 0x1b4   : > { %v1036_v6 = vadd.f32 %v1035_v26, %v8347_v56  ;;  %v4897_v26 = vor.u32 %v5152_v1, %v4896_v48  ;;  %2942 = vmatpush.bf16.msrb.mxu1 %v4901_v43  ;;  %v1475_v56 = vsel %vm1462_vm4, %v1473_v27, %v1474_v19  ;;  %v391_v27 = vadd.f32 %v6555_v54, %v336_v31  ;;  %v8357_v31 = vld [vmem:[#allocation35_spill] sm:$0xff]  ;;  %v8358_v1 = vld [vmem:[#allocation36_spill] sm:$0xff] }
 0x1b5   : > { %v6651_v18 = vpack.c.bf16 %v1477_v16, %v1475_v56 }
 0x1b6   : > { %v6644_v3 = vadd.f32 %v1310_v39, %v1036_v6  ;;  %2853 = vmatpush.bf16.msrb.mxu0 %v4897_v26 }
 0x1b8   : > { %8349 = vst [vmem:[#allocation32_spill] sm:$0xff] %v6644_v3  ;;  %v948_v17 = vpop.f32.mrf.mxu2 }
 0x1b9   : > { %v949_v23 = vadd.f32 %v948_v17, %v8350_v7  ;;  %v8354_v17 = vld [vmem:[#allocation10_spill] sm:$0xff]  ;;  %v8359_v7 = vld [vmem:[#allocation11_spill] sm:$0xff] }
 0x1ba   : > { %v1226_v33 = vpop.f32.mrf.mxu0  ;;  %v6663_v19 = vsel %vm438_vm0, %v8354_v17, 0.0 }
 0x1bb   : > { %v1037_v55 = vpop.f32.mrf.mxu3  ;;  %v1315_v39 = vpop.f32.mrf.mxu1  ;;  %v6653_v6 = vadd.f32 %v1223_v49, %v949_v23  ;;  %8355 = vst [vmem:[#allocation10_spill] sm:$0xff] %v6663_v19  ;;  %v6667_v49 = vsel %vm449_vm3, %v391_v27, 0.0  ;;  %v1478_v43 = vrot.slane %v6663_v19, 1  ;;  %v1479_v23 = vrot.slane %v8359_v7, 1 }
 0x1bc   : > { %v1038_v63 = vadd.f32 %v1037_v55, %v8351_v37  ;;  %8356 = vst [vmem:[#allocation68_spill] sm:$0xff] %v6667_v49  ;;  %v1481_v55 = vrot.slane %v6667_v49, 1  ;;  %v282_v37 = vunpack.c.l.bf16 %v228_v22 }
 0x1bd   : > { %8352 = vst [vmem:[#allocation33_spill] sm:$0xff] %v6653_v6  ;;  %1700 = vmatmul.bf16.gmra.mxu2 %v1576_v34  ;;  %2049 = vmatmul.bf16.gmra.mxu0 %v6651_v18  ;;  %v1480_v27 = vsel %vm1462_vm4, %v1478_v43, %v1479_v23  ;;  %v8363_v6 = vld [vmem:[#allocation38_spill] sm:$0xff] }
 0x1be   : > { %v6656_v48 = vadd.f32 %v1312_v51, %v1038_v63  ;;  %2138 = vmatmul.bf16.gmra.mxu1 %v6651_v18 }
 0x1c0   : > { %8353 = vst [vmem:[#allocation34_spill] sm:$0xff] %v6656_v48  ;;  %1789 = vmatmul.bf16.gmra.mxu3 %v1576_v34  ;;  %v951_v16 = vpop.f32.mrf.mxu2  ;;  %v8362_v48 = vld [vmem:[#allocation37_spill] sm:$0xff] }
 0x1c1   : > { %v952_v51 = vadd.f32 %v951_v16, %v8357_v31  ;;  %v1482_v16 = vsel %vm1462_vm4, %v1479_v23, %v1481_v55  ;;  %v339_v31 = vmul.f32 %v6542_v44, %v282_v37  ;;  %v8370_v37 = vld [vmem:[#allocation39_spill] sm:$0xff] }
 0x1c2   : > { %v1228_v26 = vpop.f32.mrf.mxu0  ;;  %v6684_v3 = vpack.c.bf16 %v1482_v16, %v1480_v27 }
 0x1c3   : > { %v1040_v52 = vpop.f32.mrf.mxu3  ;;  %v1317_v56 = vpop.f32.mrf.mxu1  ;;  %v6675_v63 = vadd.f32 %v1226_v33, %v952_v51  ;;  %v394_v33 = vadd.f32 %v6555_v54, %v339_v31  ;;  %v231_v31 = vld [vmem:[%s5385_s19 + $0x44] sm:$0x1] }
 0x1c4   : > { %v1041_v34 = vadd.f32 %v1040_v52, %v8358_v1  ;;  %8364 = vst [vmem:[#allocation37_spill] sm:$0xff] %v6684_v3 }
 0x1c5   : > { %8360 = vst [vmem:[#allocation35_spill] sm:$0xff] %v6675_v63 }
 0x1c6   : > { %v6677_v17 = vadd.f32 %v1315_v39, %v1041_v34  ;;  %v6711_v34 = vsel %vm449_vm3, %v394_v33, 0.0 }
 0x1c7   : > { %8369 = vst [vmem:[#allocation70_spill] sm:$0xff] %v6711_v34 }
 0x1c8   : > { %8361 = vst [vmem:[#allocation36_spill] sm:$0xff] %v6677_v17  ;;  %v953_v19 = vpop.f32.mrf.mxu2 }
 0x1c9   : > { %v954_v52 = vadd.f32 %v953_v19, %v8362_v48  ;;  %v4826_v48 = vld [vmem:[%s8172_s2 + $0x3d8] sm:$0xf0]  ;;  %v8367_v19 = vld [vmem:[#allocation14_spill] sm:$0xff] }
 0x1ca   : > { %v1231_v7 = vpop.f32.mrf.mxu0  ;;  %v6707_v43 = vsel %vm438_vm0, %v8367_v19, 0.0 }
 0x1cb   : > { %v1042_v1 = vpop.f32.mrf.mxu3  ;;  %v1320_v22 = vpop.f32.mrf.mxu1  ;;  %v6687_v39 = vadd.f32 %v1228_v26, %v954_v52  ;;  %8368 = vst [vmem:[#allocation14_spill] sm:$0xff] %v6707_v43  ;;  %v1483_v52 = vrot.slane %v6707_v43, 1 }
 0x1cc   : > { %v1043_v4 = vadd.f32 %v1042_v1, %v8363_v6  ;;  %v5133_v6 = vld [vmem:[%s8172_s2 + $0x3d4] sm:$0xf] }
 0x1cd   : > { %8365 = vst [vmem:[#allocation38_spill] sm:$0xff] %v6687_v39  ;;  %1705 = vmatmul.bf16.gmra.mxu2 %v6651_v18  ;;  %2054 = vmatmul.bf16.gmra.mxu0 %v6684_v3  ;;  %v4829_v26 = vor.u32 %v5133_v6, %v4826_v48  ;;  %v8371_v1 = vld [vmem:[#allocation40_spill] sm:$0xff]  ;;  %v1486_v6 = vrot.slane %v6711_v34, 1 }
 0x1ce   : > { %v6689_v51 = vadd.f32 %v1317_v56, %v1043_v4  ;;  %2143 = vmatmul.bf16.gmra.mxu1 %v6684_v3  ;;  %v4824_v4 = vld [vmem:[%s8172_s2 + $0x3d0] sm:$0xf]  ;;  %v5134_v56 = vld [vmem:[%s8172_s2 + $0x3d4] sm:$0xf0] }
 0x1cf   : > { %v4825_v55 = vor.u32 %v5134_v56, %v4824_v4  ;;  %2476 = vmatpush.bf16.msrb.mxu3 %v4829_v26  ;;  %v5149_v4 = vld [vmem:[%s8172_s2 + $0x154] sm:$0xf]  ;;  %v4890_v56 = vld [vmem:[%s8172_s2 + $0x158] sm:$0xf0]  ;;  %v4888_v26 = vld [vmem:[%s8172_s2 + $0x150] sm:$0xf] }
 0x1d0   : > { %8366 = vst [vmem:[#allocation69_spill] sm:$0xff] %v6689_v51  ;;  %1794 = vmatmul.bf16.gmra.mxu3 %v6651_v18  ;;  %v956_v23 = vpop.f32.mrf.mxu2  ;;  %v8372_v51 = vld [vmem:[#allocation15_spill] sm:$0xff] }
 0x1d1   : > { %v957_v27 = vadd.f32 %v956_v23, %v8370_v37  ;;  %v1484_v33 = vrot.slane %v8372_v51, 1  ;;  %2387 = vmatpush.bf16.msrb.mxu2 %v4825_v55  ;;  %v285_v37 = vunpack.c.l.bf16 %v231_v31  ;;  %v5150_v55 = vld [vmem:[%s8172_s2 + $0x154] sm:$0xf0] }
 0x1d2   : > { %v1233_v49 = vpop.f32.mrf.mxu0  ;;  %v4889_v34 = vor.u32 %v5150_v55, %v4888_v26 }
 0x1d3   : > { %v1045_v16 = vpop.f32.mrf.mxu3  ;;  %v1322_v48 = vpop.f32.mrf.mxu1  ;;  %v6731_v23 = vadd.f32 %v1231_v7, %v957_v27  ;;  %v1485_v51 = vsel %vm1462_vm4, %v1483_v52, %v1484_v33  ;;  %v1487_v43 = vsel %vm1462_vm4, %v1484_v33, %v1486_v6  ;;  %v342_v17 = vmul.f32 %v6542_v44, %v285_v37  ;;  %v8375_v7 = vld [vmem:[#allocation41_spill] sm:$0xff]  ;;  %v8384_v37 = vld [vmem:[#allocation44_spill] sm:$0xff] }
 0x1d4   : > { %v1046_v19 = vadd.f32 %v1045_v16, %v8371_v1  ;;  %v4893_v16 = vor.u32 %v5149_v4, %v4890_v56  ;;  %2854 = vmatpush.bf16.msrb.mxu0 %v4889_v34  ;;  %v8376_v4 = vld [vmem:[#allocation42_spill] sm:$0xff]  ;;  %v6743_v63 = vpack.c.bf16 %v1487_v43, %v1485_v51  ;;  %v8383_v34 = vld [vmem:[#allocation43_spill] sm:$0xff] }
 0x1d5   : > { %8373 = vst [vmem:[#allocation39_spill] sm:$0xff] %v6731_v23  ;;  %v397_v52 = vadd.f32 %v6555_v54, %v342_v17  ;;  %v234_v17 = vld [vmem:[%s5385_s19 + $0x50] sm:$0x1] }
 0x1d6   : > { %v6736_v1 = vadd.f32 %v1320_v22, %v1046_v19  ;;  %2943 = vmatpush.bf16.msrb.mxu1 %v4893_v16  ;;  %8377 = vst [vmem:[#allocation41_spill] sm:$0xff] %v6743_v63 }
 0x1d8   : > { %8374 = vst [vmem:[#allocation40_spill] sm:$0xff] %v6736_v1  ;;  %v958_v39 = vpop.f32.mrf.mxu2  ;;  %v8389_v1 = vld [vmem:[#allocation46_spill] sm:$0xff] }
 0x1d9   : > { %v959_v27 = vadd.f32 %v958_v39, %v8375_v7  ;;  %v8380_v39 = vld [vmem:[#allocation18_spill] sm:$0xff] }
 0x1da   : > { %v1236_v23 = vpop.f32.mrf.mxu0  ;;  %v6757_v51 = vsel %vm438_vm0, %v8380_v39, 0.0 }
 0x1db   : > { %v1047_v31 = vpop.f32.mrf.mxu3  ;;  %v1325_v22 = vpop.f32.mrf.mxu1  ;;  %v6745_v19 = vadd.f32 %v1233_v49, %v959_v27  ;;  %8381 = vst [vmem:[#allocation18_spill] sm:$0xff] %v6757_v51  ;;  %v6761_v49 = vsel %vm449_vm3, %v397_v52, 0.0  ;;  %v8385_v27 = vld [vmem:[#allocation19_spill] sm:$0xff] }
 0x1dc   : > { %v1048_v56 = vadd.f32 %v1047_v31, %v8376_v4  ;;  %8382 = vst [vmem:[#allocation72_spill] sm:$0xff] %v6761_v49  ;;  %v1489_v31 = vrot.slane %v8385_v27, 1  ;;  %v1491_v4 = vrot.slane %v6761_v49, 1 }
 0x1dd   : > { %8378 = vst [vmem:[#allocation42_spill] sm:$0xff] %v6745_v19  ;;  %1710 = vmatmul.bf16.gmra.mxu2 %v6684_v3  ;;  %2059 = vmatmul.bf16.gmra.mxu0 %v6743_v63  ;;  %v8388_v19 = vld [vmem:[#allocation45_spill] sm:$0xff] }
 0x1de   : > { %v6748_v26 = vadd.f32 %v1322_v48, %v1048_v56  ;;  %2148 = vmatmul.bf16.gmra.mxu1 %v6743_v63  ;;  %v1488_v48 = vrot.slane %v6757_v51, 1  ;;  %v288_v56 = vunpack.c.l.bf16 %v234_v17 }
 0x1e0   : > { %8379 = vst [vmem:[#allocation71_spill] sm:$0xff] %v6748_v26  ;;  %1799 = vmatmul.bf16.gmra.mxu3 %v6684_v3  ;;  %v961_v43 = vpop.f32.mrf.mxu2  ;;  %v1490_v52 = vsel %vm1462_vm4, %v1488_v48, %v1489_v31 }
 0x1e1   : > { %v962_v33 = vadd.f32 %v961_v43, %v8383_v34  ;;  %v1492_v43 = vsel %vm1462_vm4, %v1489_v31, %v1491_v4  ;;  %v345_v34 = vmul.f32 %v6542_v44, %v288_v56  ;;  %v8396_v56 = vld [vmem:[#allocation47_spill] sm:$0xff] }
 0x1e2   : > { %v1238_v55 = vpop.f32.mrf.mxu0  ;;  %v6778_v2 = vpack.c.bf16 %v1492_v43, %v1490_v52 }
 0x1e3   : > { %v1050_v6 = vpop.f32.mrf.mxu3  ;;  %v1327_v7 = vpop.f32.mrf.mxu1  ;;  %v6769_v39 = vadd.f32 %v1236_v23, %v962_v33  ;;  %v400_v23 = vadd.f32 %v6555_v54, %v345_v34  ;;  %v237_v34 = vld [vmem:[%s5385_s19 + $0x5c] sm:$0x1] }
 0x1e4   : > { %v1051_v16 = vadd.f32 %v1050_v6, %v8384_v37  ;;  %8390 = vst [vmem:[#allocation45_spill] sm:$0xff] %v6778_v2 }
 0x1e5   : > { %8386 = vst [vmem:[#allocation43_spill] sm:$0xff] %v6769_v39 }
 0x1e6   : > { %v6771_v26 = vadd.f32 %v1325_v22, %v1051_v16  ;;  %v6805_v16 = vsel %vm449_vm3, %v400_v23, 0.0 }
 0x1e7   : > { %8395 = vst [vmem:[#allocation74_spill] sm:$0xff] %v6805_v16 }
 0x1e8   : > { %8387 = vst [vmem:[#allocation44_spill] sm:$0xff] %v6771_v26  ;;  %v963_v51 = vpop.f32.mrf.mxu2 }
 0x1e9   : > { %v964_v6 = vadd.f32 %v963_v51, %v8388_v19  ;;  %v4818_v19 = vld [vmem:[%s8172_s2 + $0x3c8] sm:$0xf0]  ;;  %v8393_v51 = vld [vmem:[#allocation22_spill] sm:$0xff] }
 0x1ea   : > { %v1241_v27 = vpop.f32.mrf.mxu0  ;;  %v6801_v48 = vsel %vm438_vm0, %v8393_v51, 0.0 }
 0x1eb   : > { %v1052_v37 = vpop.f32.mrf.mxu3  ;;  %v1330_v17 = vpop.f32.mrf.mxu1  ;;  %v6781_v22 = vadd.f32 %v1238_v55, %v964_v6  ;;  %8394 = vst [vmem:[#allocation22_spill] sm:$0xff] %v6801_v48  ;;  %v1493_v6 = vrot.slane %v6801_v48, 1 }
 0x1ec   : > { %v1053_v3 = vadd.f32 %v1052_v37, %v8389_v1  ;;  %v5131_v1 = vld [vmem:[%s8172_s2 + $0x3c4] sm:$0xf]  ;;  %v8397_v37 = vld [vmem:[#allocation48_spill] sm:$0xff] }
 0x1ed   : > { %8391 = vst [vmem:[#allocation46_spill] sm:$0xff] %v6781_v22  ;;  %1715 = vmatmul.bf16.gmra.mxu2 %v6743_v63  ;;  %2064 = vmatmul.bf16.gmra.mxu0 %v6778_v2  ;;  %v4821_v55 = vor.u32 %v5131_v1, %v4818_v19  ;;  %v1496_v1 = vrot.slane %v6805_v16, 1 }
 0x1ee   : > { %v6783_v33 = vadd.f32 %v1327_v7, %v1053_v3  ;;  %2153 = vmatmul.bf16.gmra.mxu1 %v6778_v2  ;;  %v4816_v3 = vld [vmem:[%s8172_s2 + $0x3c0] sm:$0xf]  ;;  %v5132_v7 = vld [vmem:[%s8172_s2 + $0x3c4] sm:$0xf0] }
 0x1ef   : > { %v4817_v4 = vor.u32 %v5132_v7, %v4816_v3  ;;  %2477 = vmatpush.bf16.msrb.mxu3 %v4821_v55  ;;  %v5147_v3 = vld [vmem:[%s8172_s2 + $0x144] sm:$0xf]  ;;  %v4882_v7 = vld [vmem:[%s8172_s2 + $0x148] sm:$0xf0]  ;;  %v4880_v55 = vld [vmem:[%s8172_s2 + $0x140] sm:$0xf] }
 0x1f0   : > { %8392 = vst [vmem:[#allocation73_spill] sm:$0xff] %v6783_v33  ;;  %1804 = vmatmul.bf16.gmra.mxu3 %v6743_v63  ;;  %v966_v31 = vpop.f32.mrf.mxu2  ;;  %v8398_v33 = vld [vmem:[#allocation23_spill] sm:$0xff] }
 0x1f1   : > { %v967_v52 = vadd.f32 %v966_v31, %v8396_v56  ;;  %v1494_v23 = vrot.slane %v8398_v33, 1  ;;  %2388 = vmatpush.bf16.msrb.mxu2 %v4817_v4  ;;  %v291_v56 = vunpack.c.l.bf16 %v237_v34  ;;  %v5148_v4 = vld [vmem:[%s8172_s2 + $0x144] sm:$0xf0] }
 0x1f2   : > { %v1243_v49 = vpop.f32.mrf.mxu0  ;;  %v4881_v16 = vor.u32 %v5148_v4, %v4880_v55 }
 0x1f3   : > { %v1055_v43 = vpop.f32.mrf.mxu3  ;;  %v1332_v19 = vpop.f32.mrf.mxu1  ;;  %v6825_v31 = vadd.f32 %v1241_v27, %v967_v52  ;;  %v1495_v33 = vsel %vm1462_vm4, %v1493_v6, %v1494_v23  ;;  %v1497_v48 = vsel %vm1462_vm4, %v1494_v23, %v1496_v1  ;;  %v348_v26 = vmul.f32 %v6542_v44, %v291_v56  ;;  %v8401_v27 = vld [vmem:[#allocation49_spill] sm:$0xff]  ;;  %v8410_v56 = vld [vmem:[#allocation52_spill] sm:$0xff] }
 0x1f4   : > { %v1056_v51 = vadd.f32 %v1055_v43, %v8397_v37  ;;  %v4885_v43 = vor.u32 %v5147_v3, %v4882_v7  ;;  %2855 = vmatpush.bf16.msrb.mxu0 %v4881_v16  ;;  %v8402_v3 = vld [vmem:[#allocation50_spill] sm:$0xff]  ;;  %v6837_v39 = vpack.c.bf16 %v1497_v48, %v1495_v33  ;;  %v8409_v16 = vld [vmem:[#allocation51_spill] sm:$0xff] }
 0x1f5   : > { %8399 = vst [vmem:[#allocation47_spill] sm:$0xff] %v6825_v31  ;;  %v403_v6 = vadd.f32 %v6555_v54, %v348_v26  ;;  %v240_v26 = vld [vmem:[%s5385_s19 + $0x68] sm:$0x1] }
 0x1f6   : > { %v6830_v37 = vadd.f32 %v1330_v17, %v1056_v51  ;;  %2944 = vmatpush.bf16.msrb.mxu1 %v4885_v43  ;;  %8403 = vst [vmem:[#allocation49_spill] sm:$0xff] %v6837_v39 }
 0x1f8   : > { %8400 = vst [vmem:[#allocation48_spill] sm:$0xff] %v6830_v37  ;;  %v968_v22 = vpop.f32.mrf.mxu2  ;;  %v8415_v37 = vld [vmem:[#allocation54_spill] sm:$0xff] }
 0x1f9   : > { %v969_v52 = vadd.f32 %v968_v22, %v8401_v27  ;;  %v8406_v22 = vld [vmem:[#allocation26_spill] sm:$0xff] }
 0x1fa   : > { %v1246_v31 = vpop.f32.mrf.mxu0  ;;  %v6851_v33 = vsel %vm438_vm0, %v8406_v22, 0.0 }
 0x1fb   : > { %v1057_v34 = vpop.f32.mrf.mxu3  ;;  %v1335_v17 = vpop.f32.mrf.mxu1  ;;  %v6839_v51 = vadd.f32 %v1243_v49, %v969_v52  ;;  %8407 = vst [vmem:[#allocation26_spill] sm:$0xff] %v6851_v33  ;;  %v6855_v49 = vsel %vm449_vm3, %v403_v6, 0.0  ;;  %v8411_v52 = vld [vmem:[#allocation27_spill] sm:$0xff] }
 0x1fc   : > { %v1058_v7 = vadd.f32 %v1057_v34, %v8402_v3  ;;  %8408 = vst [vmem:[#allocation76_spill] sm:$0xff] %v6855_v49  ;;  %v1499_v34 = vrot.slane %v8411_v52, 1  ;;  %v1501_v3 = vrot.slane %v6855_v49, 1 }
 0x1fd   : > { %8404 = vst [vmem:[#allocation50_spill] sm:$0xff] %v6839_v51  ;;  %1720 = vmatmul.bf16.gmra.mxu2 %v6778_v2  ;;  %2069 = vmatmul.bf16.gmra.mxu0 %v6837_v39  ;;  %v8414_v51 = vld [vmem:[#allocation53_spill] sm:$0xff] }
 0x1fe   : > { %v6842_v55 = vadd.f32 %v1332_v19, %v1058_v7  ;;  %2158 = vmatmul.bf16.gmra.mxu1 %v6837_v39  ;;  %v1498_v19 = vrot.slane %v6851_v33, 1  ;;  %v294_v7 = vunpack.c.l.bf16 %v240_v26 }
 0x200   : > { %8405 = vst [vmem:[#allocation75_spill] sm:$0xff] %v6842_v55  ;;  %1809 = vmatmul.bf16.gmra.mxu3 %v6778_v2  ;;  %v971_v48 = vpop.f32.mrf.mxu2  ;;  %v1500_v6 = vsel %vm1462_vm4, %v1498_v19, %v1499_v34 }
 0x201   : > { %v972_v23 = vadd.f32 %v971_v48, %v8409_v16  ;;  %v1502_v48 = vsel %vm1462_vm4, %v1499_v34, %v1501_v3  ;;  %v351_v16 = vmul.f32 %v6542_v44, %v294_v7  ;;  %v8422_v7 = vld [vmem:[#allocation55_spill] sm:$0xff] }
 0x202   : > { %v1248_v4 = vpop.f32.mrf.mxu0  ;;  %v6872_v63 = vpack.c.bf16 %v1502_v48, %v1500_v6 }
 0x203   : > { %v1060_v1 = vpop.f32.mrf.mxu3  ;;  %v1337_v27 = vpop.f32.mrf.mxu1  ;;  %v6863_v22 = vadd.f32 %v1246_v31, %v972_v23  ;;  %v406_v31 = vadd.f32 %v6555_v54, %v351_v16  ;;  %v243_v16 = vld [vmem:[%s5385_s19 + $0x74] sm:$0x1] }
 0x204   : > { %v1061_v43 = vadd.f32 %v1060_v1, %v8410_v56  ;;  %8416 = vst [vmem:[#allocation53_spill] sm:$0xff] %v6872_v63 }
 0x205   : > { %8412 = vst [vmem:[#allocation51_spill] sm:$0xff] %v6863_v22 }
 0x206   : > { %v6865_v55 = vadd.f32 %v1335_v17, %v1061_v43  ;;  %v6899_v43 = vsel %vm449_vm3, %v406_v31, 0.0 }
 0x207   : > { %8421 = vst [vmem:[#allocation78_spill] sm:$0xff] %v6899_v43 }
 0x208   : > { %8413 = vst [vmem:[#allocation52_spill] sm:$0xff] %v6865_v55  ;;  %v973_v33 = vpop.f32.mrf.mxu2 }
 0x209   : > { %v974_v1 = vadd.f32 %v973_v33, %v8414_v51  ;;  %v4810_v51 = vld [vmem:[%s8172_s2 + $0x3b8] sm:$0xf0]  ;;  %v8419_v33 = vld [vmem:[#allocation30_spill] sm:$0xff] }
 0x20a   : > { %v1251_v52 = vpop.f32.mrf.mxu0  ;;  %v6895_v19 = vsel %vm438_vm0, %v8419_v33, 0.0 }
 0x20b   : > { %v1062_v56 = vpop.f32.mrf.mxu3  ;;  %v1340_v26 = vpop.f32.mrf.mxu1  ;;  %v6875_v17 = vadd.f32 %v1248_v4, %v974_v1  ;;  %8420 = vst [vmem:[#allocation30_spill] sm:$0xff] %v6895_v19  ;;  %v1503_v1 = vrot.slane %v6895_v19, 1 }
 0x20c   : > { %v1063_v2 = vadd.f32 %v1062_v56, %v8415_v37  ;;  %v5129_v37 = vld [vmem:[%s8172_s2 + $0x3b4] sm:$0xf] }
 0x20d   : > { %8417 = vst [vmem:[#allocation54_spill] sm:$0xff] %v6875_v17  ;;  %1725 = vmatmul.bf16.gmra.mxu2 %v6837_v39  ;;  %2074 = vmatmul.bf16.gmra.mxu0 %v6872_v63  ;;  %v4813_v4 = vor.u32 %v5129_v37, %v4810_v51  ;;  %v8423_v56 = vld [vmem:[#allocation56_spill] sm:$0xff]  ;;  %v1506_v37 = vrot.slane %v6899_v43, 1 }
 0x20e   : > { %v6877_v23 = vadd.f32 %v1337_v27, %v1063_v2  ;;  %2163 = vmatmul.bf16.gmra.mxu1 %v6872_v63  ;;  %v4808_v2 = vld [vmem:[%s8172_s2 + $0x3b0] sm:$0xf]  ;;  %v5130_v27 = vld [vmem:[%s8172_s2 + $0x3b4] sm:$0xf0] }
 0x20f   : > { %v4809_v3 = vor.u32 %v5130_v27, %v4808_v2  ;;  %2478 = vmatpush.bf16.msrb.mxu3 %v4813_v4  ;;  %v5145_v2 = vld [vmem:[%s8172_s2 + $0x134] sm:$0xf]  ;;  %v4874_v27 = vld [vmem:[%s8172_s2 + $0x138] sm:$0xf0]  ;;  %v4872_v4 = vld [vmem:[%s8172_s2 + $0x130] sm:$0xf] }
 0x210   : > { %8418 = vst [vmem:[#allocation77_spill] sm:$0xff] %v6877_v23  ;;  %1814 = vmatmul.bf16.gmra.mxu3 %v6837_v39  ;;  %v976_v34 = vpop.f32.mrf.mxu2  ;;  %v8424_v23 = vld [vmem:[#allocation31_spill] sm:$0xff] }
 0x211   : > { %v977_v6 = vadd.f32 %v976_v34, %v8422_v7  ;;  %v1504_v31 = vrot.slane %v8424_v23, 1  ;;  %2389 = vmatpush.bf16.msrb.mxu2 %v4809_v3  ;;  %v297_v7 = vunpack.c.l.bf16 %v243_v16  ;;  %v5146_v3 = vld [vmem:[%s8172_s2 + $0x134] sm:$0xf0] }
 0x212   : > { %v1253_v49 = vpop.f32.mrf.mxu0  ;;  %v4873_v43 = vor.u32 %v5146_v3, %v4872_v4 }
 0x213   : > { %v1065_v48 = vpop.f32.mrf.mxu3  ;;  %v1342_v51 = vpop.f32.mrf.mxu1  ;;  %v6919_v34 = vadd.f32 %v1251_v52, %v977_v6  ;;  %v1505_v23 = vsel %vm1462_vm4, %v1503_v1, %v1504_v31  ;;  %v1507_v19 = vsel %vm1462_vm4, %v1504_v31, %v1506_v37  ;;  %v354_v55 = vmul.f32 %v6542_v44, %v297_v7  ;;  %v8427_v52 = vld [vmem:[#allocation57_spill] sm:$0xff]  ;;  %v8435_v7 = vld [vmem:[#allocation60_spill] sm:$0xff] }
 0x214   : > { %v1066_v33 = vadd.f32 %v1065_v48, %v8423_v56  ;;  %v4877_v48 = vor.u32 %v5145_v2, %v4874_v27  ;;  %2856 = vmatpush.bf16.msrb.mxu0 %v4873_v43  ;;  %v8428_v2 = vld [vmem:[#allocation58_spill] sm:$0xff]  ;;  %v6931_v22 = vpack.c.bf16 %v1507_v19, %v1505_v23  ;;  %v8434_v43 = vld [vmem:[#allocation59_spill] sm:$0xff] }
 0x215   : > { %8425 = vst [vmem:[#allocation55_spill] sm:$0xff] %v6919_v34  ;;  %v409_v1 = vadd.f32 %v6555_v54, %v354_v55  ;;  %v246_v55 = vld [vmem:[%s5385_s19 + $0x80] sm:$0x1] }
 0x216   : > { %v6924_v56 = vadd.f32 %v1340_v26, %v1066_v33  ;;  %2945 = vmatpush.bf16.msrb.mxu1 %v4877_v48 }
 0x218   : > { %8426 = vst [vmem:[#allocation56_spill] sm:$0xff] %v6924_v56  ;;  %v978_v17 = vpop.f32.mrf.mxu2  ;;  %v8438_v56 = vld [vmem:[#allocation62_spill] sm:$0xff] }
 0x219   : > { %v979_v6 = vadd.f32 %v978_v17, %v8427_v52  ;;  %v8431_v17 = vld [vmem:[#allocation2_spill] sm:$0xff] }
 0x21a   : > { %v1256_v34 = vpop.f32.mrf.mxu0  ;;  %v6945_v23 = vsel %vm438_vm0, %v8431_v17, 0.0 }
 0x21b   : > { %v1067_v16 = vpop.f32.mrf.mxu3  ;;  %v1345_v26 = vpop.f32.mrf.mxu1  ;;  %v6933_v33 = vadd.f32 %v1253_v49, %v979_v6  ;;  %8432 = vst [vmem:[#allocation2_spill] sm:$0xff] %v6945_v23  ;;  %v6949_v49 = vsel %vm449_vm3, %v409_v1, 0.0  ;;  %v8436_v6 = vld [vmem:[#allocation3_spill] sm:$0xff] }
 0x21c   : > { %v1068_v27 = vadd.f32 %v1067_v16, %v8428_v2  ;;  %8433 = vst [vmem:[#allocation79_spill] sm:$0xff] %v6949_v49  ;;  %v1509_v16 = vrot.slane %v8436_v6, 1  ;;  %v1511_v2 = vrot.slane %v6949_v49, 1 }
 0x21d   : > { %8429 = vst [vmem:[#allocation57_spill] sm:$0xff] %v6933_v33  ;;  %1730 = vmatmul.bf16.gmra.mxu2 %v6872_v63  ;;  %2079 = vmatmul.bf16.gmra.mxu0 %v6931_v22  ;;  %v8437_v33 = vld [vmem:[#allocation61_spill] sm:$0xff] }
 0x21e   : > { %v6936_v4 = vadd.f32 %v1342_v51, %v1068_v27  ;;  %2168 = vmatmul.bf16.gmra.mxu1 %v6931_v22  ;;  %v1508_v51 = vrot.slane %v6945_v23, 1  ;;  %v300_v27 = vunpack.c.l.bf16 %v246_v55 }
 0x220   : > { %8430 = vst [vmem:[#allocation58_spill] sm:$0xff] %v6936_v4  ;;  %1819 = vmatmul.bf16.gmra.mxu3 %v6872_v63  ;;  %v981_v19 = vpop.f32.mrf.mxu2  ;;  %v1510_v1 = vsel %vm1462_vm4, %v1508_v51, %v1509_v16 }
 0x221   : > { %v982_v31 = vadd.f32 %v981_v19, %v8434_v43  ;;  %v1512_v19 = vsel %vm1462_vm4, %v1509_v16, %v1511_v2  ;;  %v357_v43 = vmul.f32 %v6542_v44, %v300_v27 }
 0x222   : > { %v1258_v3 = vpop.f32.mrf.mxu0  ;;  %v6966_v39 = vpack.c.bf16 %v1512_v19, %v1510_v1  ;;  %v249_v19 = vld [vmem:[%s5385_s19 + $0x8c] sm:$0x1] }
 0x223   : > { %v1070_v37 = vpop.f32.mrf.mxu3  ;;  %v1347_v52 = vpop.f32.mrf.mxu1  ;;  %v6957_v17 = vadd.f32 %v1256_v34, %v982_v31  ;;  %v412_v34 = vadd.f32 %v6555_v54, %v357_v43 }
 0x224   : > { %v1071_v48 = vadd.f32 %v1070_v37, %v8435_v7 }
 0x226   : > { %v6959_v4 = vadd.f32 %v1345_v26, %v1071_v48  ;;  %v6993_v48 = vsel %vm449_vm3, %v412_v34, 0.0 }
 0x227   : > { %8442 = vst [vmem:[#allocation61_spill] sm:$0xff] %v6993_v48 }
 0x228   : > { %v983_v23 = vpop.f32.mrf.mxu2 }
 0x229   : > { %v984_v37 = vadd.f32 %v983_v23, %v8437_v33  ;;  %v4802_v33 = vld [vmem:[%s8172_s2 + $0x3a8] sm:$0xf0]  ;;  %v8440_v23 = vld [vmem:[#allocation5_spill] sm:$0xff] }
 0x22a   : > { %v2045_v6 = vpop.f32.mrf.mxu0  ;;  %v6989_v51 = vsel %vm438_vm0, %v8440_v23, 0.0  ;;  %v8443_v23 = vld [vmem:[#allocation6_spill] sm:$0xff] }
 0x22b   : > { %v1072_v7 = vpop.f32.mrf.mxu3  ;;  %v2134_v55 = vpop.f32.mrf.mxu1  ;;  %v6969_v26 = vadd.f32 %v1258_v3, %v984_v37  ;;  %8441 = vst [vmem:[#allocation60_spill] sm:$0xff] %v6989_v51  ;;  %v1513_v43 = vrot.slane %v6989_v51, 1  ;;  %v1514_v34 = vrot.slane %v8443_v23, 1 }
 0x22c   : > { %v1073_v63 = vadd.f32 %v1072_v7, %v8438_v56  ;;  %v5127_v56 = vld [vmem:[%s8172_s2 + $0x3a4] sm:$0xf] }
 0x22d   : > { %1735 = vmatmul.bf16.gmra.mxu2 %v6931_v22  ;;  %2084 = vmatmul.bf16.gmra.mxu0 %v6966_v39  ;;  %v4805_v3 = vor.u32 %v5127_v56, %v4802_v33  ;;  %v1516_v56 = vrot.slane %v6993_v48, 1  ;;  %v1515_v23 = vsel %vm1462_vm4, %v1513_v43, %v1514_v34 }
 0x22e   : > { %v6971_v31 = vadd.f32 %v1347_v52, %v1073_v63  ;;  %2173 = vmatmul.bf16.gmra.mxu1 %v6966_v39  ;;  %v4800_v63 = vld [vmem:[%s8172_s2 + $0x3a0] sm:$0xf]  ;;  %v5128_v52 = vld [vmem:[%s8172_s2 + $0x3a4] sm:$0xf0] }
 0x22f   : > { %v4801_v2 = vor.u32 %v5128_v52, %v4800_v63  ;;  %2479 = vmatpush.bf16.msrb.mxu3 %v4805_v3  ;;  %v5143_v63 = vld [vmem:[%s8172_s2 + $0x124] sm:$0xf]  ;;  %v4864_v3 = vld [vmem:[%s8172_s2 + $0x120] sm:$0xf]  ;;  %v303_v52 = vunpack.c.l.bf16 %v249_v19  ;;  %v1517_v51 = vsel %vm1462_vm4, %v1514_v34, %v1516_v56 }
 0x230   : > { %8439 = vst [vmem:[#allocation59_spill] sm:$0xff] %v6971_v31  ;;  %1824 = vmatmul.bf16.gmra.mxu3 %v6931_v22  ;;  %v1696_v16 = vpop.f32.mrf.mxu2 }
 0x231   : > { %v1865_v27 = vadd.f32 %v1696_v16, %v6305_v50  ;;  %2390 = vmatpush.bf16.msrb.mxu2 %v4801_v2  ;;  %v4866_v50 = vld [vmem:[%s8172_s2 + $0x128] sm:$0xf0]  ;;  %v5144_v2 = vld [vmem:[%s8172_s2 + $0x124] sm:$0xf0]  ;;  %v360_v31 = vmul.f32 %v6542_v44, %v303_v52  ;;  %v8448_v52 = vld [vmem:[#allocation9_spill] sm:$0xff] }
 0x232   : > { %v2047_v7 = vpop.f32.mrf.mxu0  ;;  %v4869_v16 = vor.u32 %v5143_v63, %v4866_v50  ;;  %v4865_v48 = vor.u32 %v5144_v2, %v4864_v3  ;;  %v7025_v50 = vpack.c.bf16 %v1517_v51, %v1515_v23 }
 0x233   : > { %v1785_v1 = vpop.f32.mrf.mxu3  ;;  %v2136_v33 = vpop.f32.mrf.mxu1  ;;  %v415_v43 = vadd.f32 %v6555_v54, %v360_v31  ;;  %v252_v31 = vld [vmem:[%s5385_s19 + $0x98] sm:$0x1] }
 0x234   : > { %v1866_v37 = vadd.f32 %v1785_v1, %v6310_v20  ;;  %v7013_v20 = vadd.f32 %v2045_v6, %v1865_v27  ;;  %2946 = vmatpush.bf16.msrb.mxu1 %v4869_v16  ;;  %2857 = vmatpush.bf16.msrb.mxu0 %v4865_v48  ;;  %v1519_v16 = vrot.slane %v8448_v52, 1 }
 0x235   : > { %v7043_v51 = vsel %vm449_vm3, %v415_v43, 0.0 }
 0x236   : > { %v7018_v1 = vadd.f32 %v2134_v55, %v1866_v37  ;;  %v1521_v2 = vrot.slane %v7043_v51, 1 }
 0x238   : > { %v1698_v49 = vpop.f32.mrf.mxu2 }
 0x239   : > { %v1867_v6 = vadd.f32 %v1698_v49, %v6314_v25  ;;  %v8445_v25 = vld [vmem:[#allocation8_spill] sm:$0xff] }
 0x23a   : > { %v2050_v63 = vpop.f32.mrf.mxu0  ;;  %8447 = vst [vmem:[#allocation8_spill] sm:$0xff] %v7043_v51 }
 0x23b   : > { %v1787_v27 = vpop.f32.mrf.mxu3  ;;  %v2139_v55 = vpop.f32.mrf.mxu1  ;;  %v7027_v37 = vadd.f32 %v2047_v7, %v1867_v6  ;;  %v306_v6 = vunpack.c.l.bf16 %v252_v31 }
 0x23c   : > { %v1868_v19 = vadd.f32 %v1787_v27, %v6316_v21  ;;  %v7039_v21 = vsel %vm438_vm0, %v8445_v25, 0.0 }
 0x23d   : > { %1740 = vmatmul.bf16.gmra.mxu2 %v6966_v39  ;;  %2089 = vmatmul.bf16.gmra.mxu0 %v7025_v50  ;;  %8446 = vst [vmem:[#allocation5_spill] sm:$0xff] %v7039_v21  ;;  %v1518_v23 = vrot.slane %v7039_v21, 1  ;;  %v363_v25 = vmul.f32 %v6542_v44, %v306_v6 }
 0x23e   : > { %v7030_v3 = vadd.f32 %v2136_v33, %v1868_v19  ;;  %2178 = vmatmul.bf16.gmra.mxu1 %v7025_v50 }
 0x23f   : > { %v1520_v43 = vsel %vm1462_vm4, %v1518_v23, %v1519_v16  ;;  %v8450_v23 = vld [vmem:[#allocation12_spill] sm:$0xff] }
 0x240   : > { %8444 = vst [vmem:[#allocation62_spill] sm:$0xff] %v7030_v3  ;;  %1829 = vmatmul.bf16.gmra.mxu3 %v6966_v39  ;;  %v1701_v49 = vpop.f32.mrf.mxu2 }
 0x241   : > { %v1869_v48 = vadd.f32 %v1701_v49, %v6332_v60  ;;  %v1522_v60 = vsel %vm1462_vm4, %v1519_v16, %v1521_v2  ;;  %v5126_v16 = vld [vmem:[%s8172_s2 + $0x394] sm:$0xf0] }
 0x242   : > { %v2052_v56 = vpop.f32.mrf.mxu0  ;;  %v7060_v3 = vpack.c.bf16 %v1522_v60, %v1520_v43 }
 0x243   : > { %v1790_v7 = vpop.f32.mrf.mxu3  ;;  %v2141_v33 = vpop.f32.mrf.mxu1  ;;  %v7051_v27 = vadd.f32 %v2050_v63, %v1869_v48  ;;  %v418_v63 = vadd.f32 %v6555_v54, %v363_v25  ;;  %v255_v25 = vld [vmem:[%s5385_s19 + $0xa4] sm:$0x1] }
 0x244   : > { %v1870_v34 = vadd.f32 %v1790_v7, %v6334_v40 }
 0x246   : > { %v7053_v19 = vadd.f32 %v2139_v55, %v1870_v34  ;;  %v7083_v34 = vsel %vm438_vm0, %v8450_v23, 0.0  ;;  %v8453_v23 = vld [vmem:[#allocation13_spill] sm:$0xff] }
 0x247   : > { %8451 = vst [vmem:[#allocation12_spill] sm:$0xff] %v7083_v34 }
 0x248   : > { %v1703_v49 = vpop.f32.mrf.mxu2 }
 0x249   : > { %v1871_v40 = vadd.f32 %v1703_v49, %v6338_v5  ;;  %v5125_v5 = vld [vmem:[%s8172_s2 + $0x394] sm:$0xf]  ;;  %v1523_v49 = vrot.slane %v7083_v34, 1 }
 0x24a   : > { %v2055_v52 = vpop.f32.mrf.mxu0 }
 0x24b   : > { %v1792_v7 = vpop.f32.mrf.mxu3  ;;  %v2144_v31 = vpop.f32.mrf.mxu1  ;;  %v7063_v55 = vadd.f32 %v2052_v56, %v1871_v40  ;;  %v7087_v56 = vsel %vm449_vm3, %v418_v63, 0.0  ;;  %v1524_v63 = vrot.slane %v8453_v23, 1 }
 0x24c   : > { %v1872_v21 = vadd.f32 %v1792_v7, %v6340_v11  ;;  %v4794_v11 = vld [vmem:[%s8172_s2 + $0x398] sm:$0xf0]  ;;  %8452 = vst [vmem:[#allocation81_spill] sm:$0xff] %v7087_v56 }
 0x24d   : > { %1745 = vmatmul.bf16.gmra.mxu2 %v7025_v50  ;;  %2094 = vmatmul.bf16.gmra.mxu0 %v7060_v3  ;;  %v1525_v23 = vsel %vm1462_vm4, %v1523_v49, %v1524_v63 }
 0x24e   : > { %v7065_v48 = vadd.f32 %v2141_v33, %v1872_v21  ;;  %2183 = vmatmul.bf16.gmra.mxu1 %v7060_v3  ;;  %v4792_v21 = vld [vmem:[%s8172_s2 + $0x390] sm:$0xf]  ;;  %v4797_v33 = vor.u32 %v5125_v5, %v4794_v11  ;;  %v1526_v5 = vrot.slane %v7087_v56, 1 }
 0x24f   : > { %v4793_v6 = vor.u32 %v5126_v16, %v4792_v21  ;;  %v5141_v21 = vld [vmem:[%s8172_s2 + $0x114] sm:$0xf]  ;;  %v309_v16 = vunpack.c.l.bf16 %v255_v25 }
 0x250   : > { %8449 = vst [vmem:[#allocation80_spill] sm:$0xff] %v7065_v48  ;;  %1834 = vmatmul.bf16.gmra.mxu3 %v7025_v50  ;;  %v1706_v2 = vpop.f32.mrf.mxu2  ;;  %v1527_v34 = vsel %vm1462_vm4, %v1524_v63, %v1526_v5  ;;  %v8457_v5 = vld [vmem:[#allocation17_spill] sm:$0xff] }
 0x251   : > { %v1873_v43 = vadd.f32 %v1706_v2, %v6377_v41  ;;  %2480 = vmatpush.bf16.msrb.mxu3 %v4797_v33  ;;  %2391 = vmatpush.bf16.msrb.mxu2 %v4793_v6  ;;  %v4858_v41 = vld [vmem:[%s8172_s2 + $0x118] sm:$0xf0]  ;;  %v4856_v33 = vld [vmem:[%s8172_s2 + $0x110] sm:$0xf]  ;;  %v5142_v6 = vld [vmem:[%s8172_s2 + $0x114] sm:$0xf0]  ;;  %v366_v48 = vmul.f32 %v6542_v44, %v309_v16 }
 0x252   : > { %v2057_v7 = vpop.f32.mrf.mxu0  ;;  %v4861_v2 = vor.u32 %v5141_v21, %v4858_v41  ;;  %v4857_v56 = vor.u32 %v5142_v6, %v4856_v33  ;;  %v7119_v41 = vpack.c.bf16 %v1527_v34, %v1525_v23 }
 0x253   : > { %v1795_v60 = vpop.f32.mrf.mxu3  ;;  %v2146_v11 = vpop.f32.mrf.mxu1  ;;  %v421_v49 = vadd.f32 %v6555_v54, %v366_v48  ;;  %v258_v54 = vld [vmem:[%s5385_s19 + $0xb0] sm:$0x1] }
 0x254   : > { %v1874_v40 = vadd.f32 %v1795_v60, %v6382_v13  ;;  %v7107_v13 = vadd.f32 %v2055_v52, %v1873_v43  ;;  %2947 = vmatpush.bf16.msrb.mxu1 %v4861_v2  ;;  %2858 = vmatpush.bf16.msrb.mxu0 %v4857_v56  ;;  %v312_v2 = vunpack.c.l.bf16 %v258_v54 }
 0x256   : > { %v7112_v60 = vadd.f32 %v2144_v31, %v1874_v40 }
 0x258   : > { %v1708_v51 = vpop.f32.mrf.mxu2 }
 0x259   : > { %v1875_v52 = vadd.f32 %v1708_v51, %v6386_v29  ;;  %v8454_v29 = vld [vmem:[#allocation16_spill] sm:$0xff]  ;;  %v7137_v51 = vsel %vm449_vm3, %v421_v49, 0.0 }
 0x25a   : > { %v2060_v21 = vpop.f32.mrf.mxu0  ;;  %8456 = vst [vmem:[#allocation82_spill] sm:$0xff] %v7137_v51  ;;  %v1531_v16 = vrot.slane %v7137_v51, 1 }
 0x25b   : > { %v1797_v43 = vpop.f32.mrf.mxu3  ;;  %v2149_v31 = vpop.f32.mrf.mxu1  ;;  %v7121_v40 = vadd.f32 %v2057_v7, %v1875_v52 }
 0x25c   : > { %v1876_v25 = vadd.f32 %v1797_v43, %v6388_v53  ;;  %v7133_v53 = vsel %vm438_vm0, %v8454_v29, 0.0 }
 0x25d   : > { %1750 = vmatmul.bf16.gmra.mxu2 %v7060_v3  ;;  %2099 = vmatmul.bf16.gmra.mxu0 %v7119_v41  ;;  %8455 = vst [vmem:[#allocation16_spill] sm:$0xff] %v7133_v53  ;;  %v1528_v56 = vrot.slane %v7133_v53, 1  ;;  %v8463_v53 = vld [vmem:[#allocation21_spill] sm:$0xff] }
 0x25e   : > { %v7124_v33 = vadd.f32 %v2146_v11, %v1876_v25  ;;  %2188 = vmatmul.bf16.gmra.mxu1 %v7119_v41  ;;  %v1529_v11 = vrot.slane %v8457_v5, 1  ;;  %v7154_v25 = vld [vmem:[%s8171_s1] ss:$0 sm:$0xff] }
 0x260   : > { %1839 = vmatmul.bf16.gmra.mxu3 %v7060_v3  ;;  %v1711_v44 = vpop.f32.mrf.mxu2  ;;  %v1530_v43 = vsel %vm1462_vm4, %v1528_v56, %v1529_v11 }
 0x261   : > { %v1877_v48 = vadd.f32 %v1711_v44, %v6404_v12  ;;  %v1532_v12 = vsel %vm1462_vm4, %v1529_v11, %v1531_v16 }
 0x262   : > { %v2062_v23 = vpop.f32.mrf.mxu0 }
 0x263   : > { %v1800_v34 = vpop.f32.mrf.mxu3  ;;  %v2151_v63 = vpop.f32.mrf.mxu1  ;;  %v7145_v6 = vadd.f32 %v2060_v21, %v1877_v48 }
 0x264   : > { %v1878_v7 = vadd.f32 %v1800_v34, %v6406_v0  ;;  %v369_v0 = vmul.f32 %v7154_v25, %v312_v2  ;;  %v7164_v34 = vld [vmem:[%s8171_s1 + $0x1] ss:$0 sm:$0xff] }
 0x266   : > { %v7147_v52 = vadd.f32 %v2149_v31, %v1878_v7  ;;  %v7159_v31 = vpack.c.bf16 %v1532_v12, %v1530_v43  ;;  %v424_v56 = vadd.f32 %v7164_v34, %v369_v0  ;;  %v5124_v12 = vld [vmem:[%s8172_s2 + $0x384] sm:$0xf0] }
 0x268   : > { %v1713_v49 = vpop.f32.mrf.mxu2  ;;  %v7191_v2 = vsel %vm449_vm3, %v424_v56, 0.0  ;;  %v1534_v56 = vrot.slane %v8463_v53, 1 }
 0x269   : > { %v1879_v29 = vadd.f32 %v1713_v49, %v6410_v42  ;;  %v5123_v42 = vld [vmem:[%s8172_s2 + $0x384] sm:$0xf]  ;;  %8462 = vst [vmem:[#allocation85_spill] sm:$0xff] %v7191_v2 }
 0x26a   : > { %v2065_v54 = vpop.f32.mrf.mxu0 }
 0x26b   : > { %v1802_v44 = vpop.f32.mrf.mxu3  ;;  %v2154_v48 = vpop.f32.mrf.mxu1  ;;  %v7167_v7 = vadd.f32 %v2062_v23, %v1879_v29  ;;  %v4784_v23 = vld [vmem:[%s8172_s2 + $0x380] sm:$0xf] }
 0x26c   : > { %v1880_v21 = vadd.f32 %v1802_v44, %v6412_v62  ;;  %v4786_v62 = vld [vmem:[%s8172_s2 + $0x388] sm:$0xf0]  ;;  %v4785_v49 = vor.u32 %v5124_v12, %v4784_v23  ;;  %v5139_v23 = vld [vmem:[%s8172_s2 + $0x104] sm:$0xf] }
 0x26d   : > { %8458 = vst [vmem:[#allocation83_spill] sm:$0xff] %v7167_v7  ;;  %1755 = vmatmul.bf16.gmra.mxu2 %v7119_v41  ;;  %2104 = vmatmul.bf16.gmra.mxu0 %v7159_v31  ;;  %v4789_v43 = vor.u32 %v5123_v42, %v4786_v62  ;;  %v1536_v42 = vrot.slane %v7191_v2, 1 }
 0x26e   : > { %v7169_v11 = vadd.f32 %v2151_v63, %v1880_v21  ;;  %2193 = vmatmul.bf16.gmra.mxu1 %v7159_v31  ;;  %v8460_v63 = vld [vmem:[#allocation20_spill] sm:$0xff]  ;;  %v261_v21 = vld [vmem:[%s5385_s19 + $0xbc] sm:$0x1]  ;;  %2392 = vmatpush.bf16.msrb.mxu2 %v4785_v49  ;;  %v5140_v49 = vld [vmem:[%s8172_s2 + $0x104] sm:$0xf0] }
 0x26f   : > { %v7187_v16 = vsel %vm438_vm0, %v8460_v63, 0.0  ;;  %2481 = vmatpush.bf16.msrb.mxu3 %v4789_v43  ;;  %v4848_v43 = vld [vmem:[%s8172_s2 + $0x100] sm:$0xf]  ;;  %v315_v12 = vunpack.c.l.bf16 %v261_v21 }
 0x270   : > { %8459 = vst [vmem:[#allocation84_spill] sm:$0xff] %v7169_v11  ;;  %1844 = vmatmul.bf16.gmra.mxu3 %v7119_v41  ;;  %v1716_v0 = vpop.f32.mrf.mxu2  ;;  %v1533_v51 = vrot.slane %v7187_v16, 1  ;;  %v4849_v2 = vor.u32 %v5140_v49, %v4848_v43 }
 0x271   : > { %8461 = vst [vmem:[#allocation20_spill] sm:$0xff] %v7187_v16  ;;  %v1881_v29 = vadd.f32 %v1716_v0, %v6449_v15  ;;  %v4850_v15 = vld [vmem:[%s8172_s2 + $0x108] sm:$0xf0]  ;;  %v1537_v16 = vsel %vm1462_vm4, %v1534_v56, %v1536_v42  ;;  %v372_v7 = vmul.f32 %v7154_v25, %v315_v12  ;;  %v8467_v12 = vld [vmem:[#allocation25_spill] sm:$0xff] }
 0x272   : > { %v2067_v5 = vpop.f32.mrf.mxu0  ;;  %v4853_v0 = vor.u32 %v5139_v23, %v4850_v15  ;;  %v1535_v53 = vsel %vm1462_vm4, %v1533_v51, %v1534_v56  ;;  %2859 = vmatpush.bf16.msrb.mxu0 %v4849_v2 }
 0x273   : > { %v1805_v44 = vpop.f32.mrf.mxu3  ;;  %v2156_v62 = vpop.f32.mrf.mxu1  ;;  %v7223_v15 = vpack.c.bf16 %v1537_v16, %v1535_v53  ;;  %v427_v51 = vadd.f32 %v7164_v34, %v372_v7  ;;  %v264_v7 = vld [vmem:[%s5385_s19 + $0xc8] sm:$0x1] }
 0x274   : > { %v1882_v63 = vadd.f32 %v1805_v44, %v6454_v45  ;;  %v7211_v45 = vadd.f32 %v2065_v54, %v1881_v29  ;;  %2948 = vmatpush.bf16.msrb.mxu1 %v4853_v0  ;;  %v1539_v0 = vrot.slane %v8467_v12, 1 }
 0x276   : > { %v7216_v44 = vadd.f32 %v2154_v48, %v1882_v63 }
 0x278   : > { %v1718_v11 = vpop.f32.mrf.mxu2 }
 0x279   : > { %v1883_v54 = vadd.f32 %v1718_v11, %v6458_v58  ;;  %v8465_v58 = vld [vmem:[#allocation24_spill] sm:$0xff] }
 0x27a   : > { %v2070_v23 = vpop.f32.mrf.mxu0 }
 0x27b   : > { %v1807_v29 = vpop.f32.mrf.mxu3  ;;  %v2159_v48 = vpop.f32.mrf.mxu1  ;;  %v7225_v63 = vadd.f32 %v2067_v5, %v1883_v54  ;;  %v7241_v5 = vsel %vm449_vm3, %v427_v51, 0.0  ;;  %v318_v54 = vunpack.c.l.bf16 %v264_v7 }
 0x27c   : > { %v1884_v21 = vadd.f32 %v1807_v29, %v6460_v8  ;;  %v7237_v8 = vsel %vm438_vm0, %v8465_v58, 0.0  ;;  %v1541_v49 = vrot.slane %v7241_v5, 1 }
 0x27d   : > { %1760 = vmatmul.bf16.gmra.mxu2 %v7159_v31  ;;  %2109 = vmatmul.bf16.gmra.mxu0 %v7223_v15  ;;  %8466 = vst [vmem:[#allocation24_spill] sm:$0xff] %v7237_v8  ;;  %v1538_v2 = vrot.slane %v7237_v8, 1  ;;  %v375_v58 = vmul.f32 %v7154_v25, %v318_v54  ;;  %v4968_v25 = vld [vmem:[%s8172_s2 + $0x2f0] sm:$0xf] }
 0x27e   : > { %v7228_v43 = vadd.f32 %v2156_v62, %v1884_v21  ;;  %2198 = vmatmul.bf16.gmra.mxu1 %v7223_v15 }
 0x27f   : > { %v1540_v51 = vsel %vm1462_vm4, %v1538_v2, %v1539_v0 }
 0x280   : > { %8464 = vst [vmem:[#allocation86_spill] sm:$0xff] %v7228_v43  ;;  %1849 = vmatmul.bf16.gmra.mxu3 %v7159_v31  ;;  %v1721_v53 = vpop.f32.mrf.mxu2 }
 0x281   : > { %v1885_v11 = vadd.f32 %v1721_v53, %v6476_v59  ;;  %v1542_v59 = vsel %vm1462_vm4, %v1539_v0, %v1541_v49 }
 0x282   : > { %v2072_v42 = vpop.f32.mrf.mxu0  ;;  %v7258_v43 = vpack.c.bf16 %v1542_v59, %v1540_v51 }
 0x283   : > { %v1810_v16 = vpop.f32.mrf.mxu3  ;;  %v2161_v62 = vpop.f32.mrf.mxu1  ;;  %v7249_v29 = vadd.f32 %v2070_v23, %v1885_v11  ;;  %v430_v23 = vadd.f32 %v7164_v34, %v375_v58  ;;  %v8468_v34 = vld [vmem:[#allocation28_spill] sm:$0xff]  ;;  %v8471_v58 = vld [vmem:[#allocation29_spill] sm:$0xff] }
 0x284   : > { %v1886_v56 = vadd.f32 %v1810_v16, %v6479_v24  ;;  %v1933_v14 = vrot.slane %v8471_v58, 1 }
 0x285   : > { %v7285_v2 = vsel %vm449_vm3, %v430_v23, 0.0  ;;  %v5032_v23 = vld [vmem:[%s8172_s2 + $0x470] sm:$0xf] }
 0x286   : > { %v7251_v21 = vadd.f32 %v2159_v48, %v1886_v56  ;;  %8470 = vst [vmem:[#allocation87_spill] sm:$0xff] %v7285_v2 }
 0x288   : > { %v1723_v53 = vpop.f32.mrf.mxu2 }
 0x289   : > { %v1887_v24 = vadd.f32 %v1723_v53, %v6492_v10  ;;  %v5169_v10 = vld [vmem:[%s8172_s2 + $0x2f4] sm:$0xf]  ;;  %v1935_v53 = vrot.slane %v7285_v2, 1 }
 0x28a   : > { %v2075_v12 = vpop.f32.mrf.mxu0 }
 0x28b   : > { %v1812_v16 = vpop.f32.mrf.mxu3  ;;  %v2164_v7 = vpop.f32.mrf.mxu1  ;;  %v7261_v48 = vadd.f32 %v2072_v42, %v1887_v24  ;;  %v5170_v42 = vld [vmem:[%s8172_s2 + $0x2f4] sm:$0xf0] }
 0x28c   : > { %v1888_v8 = vadd.f32 %v1812_v16, %v6494_v28  ;;  %v4970_v28 = vld [vmem:[%s8172_s2 + $0x2f8] sm:$0xf0]  ;;  %v4969_v0 = vor.u32 %v5170_v42, %v4968_v25  ;;  %v5185_v16 = vld [vmem:[%s8172_s2 + $0x474] sm:$0xf]  ;;  %v1936_v42 = vsel %vm1462_vm4, %v1933_v14, %v1935_v53 }
 0x28d   : > { %1765 = vmatmul.bf16.gmra.mxu2 %v7223_v15  ;;  %2114 = vmatmul.bf16.gmra.mxu0 %v7258_v43  ;;  %v4973_v56 = vor.u32 %v5169_v10, %v4970_v28  ;;  %v5186_v28 = vld [vmem:[%s8172_s2 + $0x474] sm:$0xf0] }
 0x28e   : > { %v7263_v11 = vadd.f32 %v2161_v62, %v1888_v8  ;;  %2203 = vmatmul.bf16.gmra.mxu1 %v7258_v43  ;;  %v7281_v8 = vsel %vm438_vm0, %v8468_v34, 0.0  ;;  %3198 = vmatpush.bf16.msra.mxu2 %v4969_v0  ;;  %v5033_v34 = vor.u32 %v5186_v28, %v5032_v23 }
 0x28f   : > { %8469 = vst [vmem:[#allocation28_spill] sm:$0xff] %v7281_v8  ;;  %3287 = vmatpush.bf16.msra.mxu3 %v4973_v56  ;;  %v1932_v51 = vrot.slane %v7281_v8, 1 }
 0x290   : > { %1854 = vmatmul.bf16.gmra.mxu3 %v7223_v15  ;;  %v1726_v62 = vpop.f32.mrf.mxu2  ;;  %3544 = vmatpush.bf16.msra.mxu0 %v5033_v34 }
 0x291   : > { %v1889_v49 = vadd.f32 %v1726_v62, %v6532_v38  ;;  %v5034_v38 = vld [vmem:[%s8172_s2 + $0x478] sm:$0xf0]  ;;  %v1934_v56 = vsel %vm1462_vm4, %v1932_v51, %v1933_v14 }
 0x292   : > { %v2077_v59 = vpop.f32.mrf.mxu0  ;;  %v5037_v10 = vor.u32 %v5185_v16, %v5034_v38  ;;  %v7315_v16 = vpack.c.bf16 %v1936_v42, %v1934_v56 }
 0x293   : > { %v1815_v54 = vpop.f32.mrf.mxu3  ;;  %v2166_v24 = vpop.f32.mrf.mxu1 }
 0x294   : > { %v1890_v57 = vadd.f32 %v1815_v54, %v6537_v47  ;;  %v7304_v47 = vadd.f32 %v2075_v12, %v1889_v49  ;;  %3633 = vmatpush.bf16.msra.mxu1 %v5037_v10  ;;  %v5261_v10 = vld [vmem:[%s6484_s12] sm:$0xff] }
 0x295   : > { %v2628_v28 = vrot.slane %v5261_v10, 2  ;;  %v8474_v10 = vld [vmem:[#allocation32_spill] sm:$0xff] }
 0x296   : > { %v7309_v25 = vadd.f32 %v2164_v7, %v1890_v57 }
 0x298   : > { %v1728_v62 = vpop.f32.mrf.mxu2 }
 0x299   : > { %v1891_v0 = vadd.f32 %v1728_v62, %v6550_v30 }
 0x29a   : > { %v2080_v49 = vpop.f32.mrf.mxu0 }
 0x29b   : > { %v1817_v54 = vpop.f32.mrf.mxu3  ;;  %v2169_v38 = vpop.f32.mrf.mxu1  ;;  %v7317_v7 = vadd.f32 %v2077_v59, %v1891_v0 }
 0x29c   : > { %v1892_v12 = vadd.f32 %v1817_v54, %v6558_v61  ;;  %v7334_v54 = vpack.c.bf16 %v2628_v28, %v2628_v28 }
 0x29d   : > { %1770 = vmatmul.bf16.gmra.mxu2 %v7258_v43  ;;  %2119 = vmatmul.bf16.gmra.mxu0 %v7315_v16 }
 0x29e   : > { %v7319_v57 = vadd.f32 %v2166_v24, %v1892_v12  ;;  %2208 = vmatmul.bf16.gmra.mxu1 %v7315_v16  ;;  %8472 = vst [vmem:[#allocation88_spill] sm:$0xff] %v7334_v54 }
 0x2a0   : > { %1859 = vmatmul.bf16.gmra.mxu3 %v7258_v43  ;;  %v1731_v30 = vpop.f32.mrf.mxu2 }
 0x2a1   : > { %v1893_v61 = vadd.f32 %v1731_v30, %v6584_v9  ;;  %v5168_v30 = vld [vmem:[%s8172_s2 + $0x2e4] sm:$0xf0] }
 0x2a2   : > { %v2082_v53 = vpop.f32.mrf.mxu0 }
 0x2a3   : > { %v1820_v51 = vpop.f32.mrf.mxu3  ;;  %v2171_v23 = vpop.f32.mrf.mxu1  ;;  %v7327_v59 = vadd.f32 %v2080_v49, %v1893_v61  ;;  %v4960_v49 = vld [vmem:[%s8172_s2 + $0x2e0] sm:$0xf] }
 0x2a4   : > { %v1894_v14 = vadd.f32 %v1820_v51, %v6586_v36  ;;  %v4961_v61 = vor.u32 %v5168_v30, %v4960_v49  ;;  %v5024_v49 = vld [vmem:[%s8172_s2 + $0x460] sm:$0xf] }
 0x2a6   : > { %v7329_v24 = vadd.f32 %v2169_v38, %v1894_v14  ;;  %3199 = vmatpush.bf16.msra.mxu2 %v4961_v61 }
 0x2a8   : > { %v1733_v34 = vpop.f32.mrf.mxu2 }
 0x2a9   : > { %v1895_v56 = vadd.f32 %v1733_v34, %v6597_v32  ;;  %v5167_v32 = vld [vmem:[%s8172_s2 + $0x2e4] sm:$0xf] }
 0x2aa   : > { %v2085_v0 = vpop.f32.mrf.mxu0 }
 0x2ab   : > { %v1822_v42 = vpop.f32.mrf.mxu3  ;;  %v2174_v9 = vpop.f32.mrf.mxu1  ;;  %v7336_v12 = vadd.f32 %v2082_v53, %v1895_v56  ;;  %v8473_v53 = vld [vmem:[#allocation63_spill] sm:$0xff]  ;;  %v8475_v56 = vld [vmem:[#allocation4_spill] sm:$0xff] }
 0x2ac   : > { %v1896_v62 = vadd.f32 %v1822_v42, %v6599_v46  ;;  %v4962_v46 = vld [vmem:[%s8172_s2 + $0x2e8] sm:$0xf0]  ;;  %v2634_v42 = vrot.slane %v8475_v56, 2 }
 0x2ad   : > { %2393 = vmatmul.bf16.vlgmr.msrb.gmra.mxu2 %v6651_v18  ;;  %2860 = vmatmul.bf16.vlgmr.msrb.gmra.mxu0 %v7334_v54  ;;  %v4965_v38 = vor.u32 %v5167_v32, %v4962_v46  ;;  %v5183_v46 = vld [vmem:[%s8172_s2 + $0x464] sm:$0xf] }
 0x2ae   : > { %v7338_v36 = vadd.f32 %v2171_v23, %v1896_v62  ;;  %2949 = vmatmul.bf16.vlgmr.msrb.gmra.mxu1 %v7334_v54  ;;  %v2633_v23 = vrot.slane %v8473_v53, 2  ;;  %v8476_v62 = vld [vmem:[#allocation64_spill] sm:$0xff] }
 0x2af   : > { %3288 = vmatpush.bf16.msra.mxu3 %v4965_v38  ;;  %v2636_v54 = vrot.slane %v8476_v62, 2  ;;  %v8479_v62 = vld [vmem:[#allocation33_spill] sm:$0xff] }
 0x2b0   : > { %2482 = vmatmul.bf16.vlgmr.msrb.gmra.mxu3 %v6651_v18  ;;  %v1736_v18 = vpop.f32.mrf.mxu2  ;;  %v2635_v53 = vsel %vm2627_vm5, %v2633_v23, %v2634_v42  ;;  %v8485_v23 = vld [vmem:[#allocation35_spill] sm:$0xff] }
 0x2b1   : > { %v1897_v51 = vadd.f32 %v1736_v18, %v6639_v35  ;;  %v5026_v35 = vld [vmem:[%s8172_s2 + $0x468] sm:$0xf0]  ;;  %v5184_v18 = vld [vmem:[%s8172_s2 + $0x464] sm:$0xf0] }
 0x2b2   : > { %v2087_v34 = vpop.f32.mrf.mxu0  ;;  %v5029_v30 = vor.u32 %v5183_v46, %v5026_v35 }
 0x2b3   : > { %v1825_v14 = vpop.f32.mrf.mxu3  ;;  %v2176_v32 = vpop.f32.mrf.mxu1  ;;  %v7370_v38 = vadd.f32 %v2085_v0, %v1897_v51  ;;  %v8480_v51 = vld [vmem:[#allocation34_spill] sm:$0xff] }
 0x2b4   : > { %v1898_v28 = vadd.f32 %v1825_v14, %v8474_v10  ;;  %v5025_v14 = vor.u32 %v5184_v18, %v5024_v49  ;;  %3634 = vmatpush.bf16.msra.mxu1 %v5029_v30  ;;  %v2637_v10 = vsel %vm2627_vm5, %v2634_v42, %v2636_v54  ;;  %v8486_v30 = vld [vmem:[#allocation36_spill] sm:$0xff] }
 0x2b5   : > { %8477 = vst [vmem:[#allocation63_spill] sm:$0xff] %v7370_v38  ;;  %v7381_v35 = vpack.c.bf16 %v2637_v10, %v2635_v53  ;;  %v8487_v53 = vld [vmem:[#allocation66_spill] sm:$0xff]  ;;  %v8489_v10 = vld [vmem:[#allocation67_spill] sm:$0xff] }
 0x2b6   : > { %v7375_v61 = vadd.f32 %v2174_v9, %v1898_v28  ;;  %3545 = vmatpush.bf16.msra.mxu0 %v5025_v14  ;;  %v8484_v28 = vld [vmem:[#allocation37_spill] sm:$0xff] }
 0x2b7   : > { %8481 = vst [vmem:[#allocation4_spill] sm:$0xff] %v7381_v35 }
 0x2b8   : > { %8478 = vst [vmem:[#allocation32_spill] sm:$0xff] %v7375_v61  ;;  %v1738_v56 = vpop.f32.mrf.mxu2 }
 0x2b9   : > { %v1899_v2 = vadd.f32 %v1738_v56, %v8479_v62  ;;  %v2641_v56 = vrot.slane %v8489_v10, 2 }
 0x2ba   : > { %v2090_v46 = vpop.f32.mrf.mxu0 }
 0x2bb   : > { %v1827_v0 = vpop.f32.mrf.mxu3  ;;  %v2179_v8 = vpop.f32.mrf.mxu1  ;;  %v7383_v38 = vadd.f32 %v2087_v34, %v1899_v2  ;;  %v2638_v2 = vrot.slane %v8487_v53, 2 }
 0x2bc   : > { %v1900_v58 = vadd.f32 %v1827_v0, %v8480_v51 }
 0x2bd   : > { %8482 = vst [vmem:[#allocation64_spill] sm:$0xff] %v7383_v38  ;;  %2398 = vmatmul.bf16.gmra.mxu2 %v8484_v28  ;;  %2865 = vmatmul.bf16.gmra.mxu0 %v7381_v35 }
 0x2be   : > { %v7385_v9 = vadd.f32 %v2176_v32, %v1900_v58  ;;  %2954 = vmatmul.bf16.gmra.mxu1 %v7381_v35  ;;  %v8488_v58 = vld [vmem:[#allocation7_spill] sm:$0xff] }
 0x2bf   : > { %v2639_v32 = vrot.slane %v8488_v58, 2 }
 0x2c0   : > { %8483 = vst [vmem:[#allocation33_spill] sm:$0xff] %v7385_v9  ;;  %2487 = vmatmul.bf16.gmra.mxu3 %v8484_v28  ;;  %v1741_v54 = vpop.f32.mrf.mxu2 }
 0x2c1   : > { %v1901_v42 = vadd.f32 %v1741_v54, %v8485_v23  ;;  %v2640_v51 = vsel %vm2627_vm5, %v2638_v2, %v2639_v32  ;;  %v2642_v28 = vsel %vm2627_vm5, %v2639_v32, %v2641_v56  ;;  %v8492_v23 = vld [vmem:[#allocation38_spill] sm:$0xff]  ;;  %v8498_v32 = vld [vmem:[#allocation39_spill] sm:$0xff] }
 0x2c2   : > { %v2092_v14 = vpop.f32.mrf.mxu0  ;;  %v7404_v61 = vpack.c.bf16 %v2642_v28, %v2640_v51  ;;  %v8499_v51 = vld [vmem:[#allocation10_spill] sm:$0xff] }
 0x2c3   : > { %v1830_v49 = vpop.f32.mrf.mxu3  ;;  %v2181_v34 = vpop.f32.mrf.mxu1  ;;  %v7396_v62 = vadd.f32 %v2090_v46, %v1901_v42  ;;  %v5165_v42 = vld [vmem:[%s8172_s2 + $0x2d4] sm:$0xf]  ;;  %v2643_v28 = vrot.slane %v8499_v51, 2 }
 0x2c4   : > { %v1902_v18 = vadd.f32 %v1830_v49, %v8486_v30  ;;  %v8493_v30 = vld [vmem:[#allocation69_spill] sm:$0xff]  ;;  %8494 = vst [vmem:[#allocation35_spill] sm:$0xff] %v7404_v61 }
 0x2c5   : > { %8490 = vst [vmem:[#allocation34_spill] sm:$0xff] %v7396_v62 }
 0x2c6   : > { %v7398_v0 = vadd.f32 %v2179_v8, %v1902_v18  ;;  %v8497_v8 = vld [vmem:[#allocation41_spill] sm:$0xff] }
 0x2c7   : > { %v4954_v18 = vld [vmem:[%s8172_s2 + $0x2d8] sm:$0xf0] }
 0x2c8   : > { %8491 = vst [vmem:[#allocation37_spill] sm:$0xff] %v7398_v0  ;;  %v1743_v54 = vpop.f32.mrf.mxu2 }
 0x2c9   : > { %v1903_v9 = vadd.f32 %v1743_v54, %v8492_v23  ;;  %v8500_v54 = vld [vmem:[#allocation40_spill] sm:$0xff] }
 0x2ca   : > { %v2095_v53 = vpop.f32.mrf.mxu0 }
 0x2cb   : > { %v1832_v49 = vpop.f32.mrf.mxu3  ;;  %v2184_v58 = vpop.f32.mrf.mxu1  ;;  %v7406_v35 = vadd.f32 %v2092_v14, %v1903_v9  ;;  %v4957_v9 = vor.u32 %v5165_v42, %v4954_v18  ;;  %v5166_v14 = vld [vmem:[%s8172_s2 + $0x2d4] sm:$0xf0]  ;;  %v5181_v18 = vld [vmem:[%s8172_s2 + $0x454] sm:$0xf] }
 0x2cc   : > { %v1904_v38 = vadd.f32 %v1832_v49, %v8493_v30  ;;  %v8501_v30 = vld [vmem:[#allocation11_spill] sm:$0xff] }
 0x2cd   : > { %8495 = vst [vmem:[#allocation36_spill] sm:$0xff] %v7406_v35  ;;  %2403 = vmatmul.bf16.gmra.mxu2 %v8497_v8  ;;  %2870 = vmatmul.bf16.gmra.mxu0 %v7404_v61 }
 0x2ce   : > { %v7408_v46 = vadd.f32 %v2181_v34, %v1904_v38  ;;  %2959 = vmatmul.bf16.gmra.mxu1 %v7404_v61  ;;  %v4952_v38 = vld [vmem:[%s8172_s2 + $0x2d0] sm:$0xf]  ;;  %3289 = vmatpush.bf16.msra.mxu3 %v4957_v9 }
 0x2cf   : > { %v4953_v34 = vor.u32 %v5166_v14, %v4952_v38  ;;  %v5018_v38 = vld [vmem:[%s8172_s2 + $0x458] sm:$0xf0]  ;;  %v5016_v9 = vld [vmem:[%s8172_s2 + $0x450] sm:$0xf] }
 0x2d0   : > { %8496 = vst [vmem:[#allocation66_spill] sm:$0xff] %v7408_v46  ;;  %2492 = vmatmul.bf16.gmra.mxu3 %v8497_v8  ;;  %v1746_v2 = vpop.f32.mrf.mxu2  ;;  %v2644_v8 = vrot.slane %v8501_v30, 2  ;;  %v8502_v46 = vld [vmem:[#allocation68_spill] sm:$0xff]  ;;  %v8505_v30 = vld [vmem:[#allocation42_spill] sm:$0xff] }
 0x2d1   : > { %v1905_v10 = vadd.f32 %v1746_v2, %v8498_v32  ;;  %v2646_v35 = vrot.slane %v8502_v46, 2  ;;  %3200 = vmatpush.bf16.msra.mxu2 %v4953_v34  ;;  %v5021_v2 = vor.u32 %v5181_v18, %v5018_v38  ;;  %v5182_v46 = vld [vmem:[%s8172_s2 + $0x454] sm:$0xf0] }
 0x2d2   : > { %v2097_v49 = vpop.f32.mrf.mxu0  ;;  %v5017_v32 = vor.u32 %v5182_v46, %v5016_v9  ;;  %v8512_v9 = vld [vmem:[#allocation44_spill] sm:$0xff] }
 0x2d3   : > { %v1835_v56 = vpop.f32.mrf.mxu3  ;;  %v2186_v42 = vpop.f32.mrf.mxu1  ;;  %v7440_v14 = vadd.f32 %v2095_v53, %v1905_v10  ;;  %3635 = vmatpush.bf16.msra.mxu1 %v5021_v2  ;;  %v2647_v51 = vsel %vm2627_vm5, %v2644_v8, %v2646_v35  ;;  %v8506_v53 = vld [vmem:[#allocation71_spill] sm:$0xff] }
 0x2d4   : > { %v1906_v23 = vadd.f32 %v1835_v56, %v8500_v54  ;;  %v2645_v56 = vsel %vm2627_vm5, %v2643_v28, %v2644_v8  ;;  %3546 = vmatpush.bf16.msra.mxu0 %v5017_v32  ;;  %v8511_v28 = vld [vmem:[#allocation43_spill] sm:$0xff]  ;;  %v8513_v32 = vld [vmem:[#allocation14_spill] sm:$0xff] }
 0x2d5   : > { %8503 = vst [vmem:[#allocation7_spill] sm:$0xff] %v7440_v14  ;;  %v7451_v38 = vpack.c.bf16 %v2647_v51, %v2645_v56  ;;  %v8515_v51 = vld [vmem:[#allocation70_spill] sm:$0xff] }
 0x2d6   : > { %v7445_v34 = vadd.f32 %v2184_v58, %v1906_v23  ;;  %v8510_v23 = vld [vmem:[#allocation45_spill] sm:$0xff] }
 0x2d7   : > { %8507 = vst [vmem:[#allocation38_spill] sm:$0xff] %v7451_v38 }
 0x2d8   : > { %8504 = vst [vmem:[#allocation67_spill] sm:$0xff] %v7445_v34  ;;  %v1748_v54 = vpop.f32.mrf.mxu2 }
 0x2d9   : > { %v1907_v0 = vadd.f32 %v1748_v54, %v8505_v30  ;;  %v2651_v54 = vrot.slane %v8515_v51, 2 }
 0x2da   : > { %v2100_v18 = vpop.f32.mrf.mxu0 }
 0x2db   : > { %v1837_v62 = vpop.f32.mrf.mxu3  ;;  %v2189_v14 = vpop.f32.mrf.mxu1  ;;  %v7453_v61 = vadd.f32 %v2097_v49, %v1907_v0  ;;  %v2648_v0 = vrot.slane %v8513_v32, 2 }
 0x2dc   : > { %v1908_v10 = vadd.f32 %v1837_v62, %v8506_v53 }
 0x2dd   : > { %8508 = vst [vmem:[#allocation69_spill] sm:$0xff] %v7453_v61  ;;  %2408 = vmatmul.bf16.gmra.mxu2 %v8510_v23  ;;  %2875 = vmatmul.bf16.gmra.mxu0 %v7451_v38 }
 0x2de   : > { %v7455_v58 = vadd.f32 %v2186_v42, %v1908_v10  ;;  %2964 = vmatmul.bf16.gmra.mxu1 %v7451_v38  ;;  %v8514_v42 = vld [vmem:[#allocation15_spill] sm:$0xff] }
 0x2df   : > { %v2649_v56 = vrot.slane %v8514_v42, 2 }
 0x2e0   : > { %8509 = vst [vmem:[#allocation41_spill] sm:$0xff] %v7455_v58  ;;  %2497 = vmatmul.bf16.gmra.mxu3 %v8510_v23  ;;  %v1751_v35 = vpop.f32.mrf.mxu2 }
 0x2e1   : > { %v1909_v8 = vadd.f32 %v1751_v35, %v8511_v28  ;;  %v2650_v10 = vsel %vm2627_vm5, %v2648_v0, %v2649_v56  ;;  %v2652_v23 = vsel %vm2627_vm5, %v2649_v56, %v2651_v54  ;;  %v8518_v28 = vld [vmem:[#allocation46_spill] sm:$0xff]  ;;  %v8524_v56 = vld [vmem:[#allocation47_spill] sm:$0xff] }
 0x2e2   : > { %v2102_v46 = vpop.f32.mrf.mxu0  ;;  %v7474_v34 = vpack.c.bf16 %v2652_v23, %v2650_v10  ;;  %v8525_v10 = vld [vmem:[#allocation18_spill] sm:$0xff] }
 0x2e3   : > { %v1840_v62 = vpop.f32.mrf.mxu3  ;;  %v2191_v49 = vpop.f32.mrf.mxu1  ;;  %v7466_v30 = vadd.f32 %v2100_v18, %v1909_v8  ;;  %v5163_v8 = vld [vmem:[%s8172_s2 + $0x2c4] sm:$0xf]  ;;  %v2653_v23 = vrot.slane %v8525_v10, 2 }
 0x2e4   : > { %v1910_v2 = vadd.f32 %v1840_v62, %v8512_v9  ;;  %v8519_v9 = vld [vmem:[#allocation73_spill] sm:$0xff]  ;;  %8520 = vst [vmem:[#allocation40_spill] sm:$0xff] %v7474_v34 }
 0x2e5   : > { %8516 = vst [vmem:[#allocation39_spill] sm:$0xff] %v7466_v30 }
 0x2e6   : > { %v7468_v53 = vadd.f32 %v2189_v14, %v1910_v2  ;;  %v8523_v14 = vld [vmem:[#allocation49_spill] sm:$0xff]  ;;  %v4946_v2 = vld [vmem:[%s8172_s2 + $0x2c8] sm:$0xf0] }
 0x2e8   : > { %8517 = vst [vmem:[#allocation10_spill] sm:$0xff] %v7468_v53  ;;  %v1753_v35 = vpop.f32.mrf.mxu2 }
 0x2e9   : > { %v1911_v58 = vadd.f32 %v1753_v35, %v8518_v28  ;;  %v8526_v35 = vld [vmem:[#allocation48_spill] sm:$0xff] }
 0x2ea   : > { %v2105_v32 = vpop.f32.mrf.mxu0 }
 0x2eb   : > { %v1842_v62 = vpop.f32.mrf.mxu3  ;;  %v2194_v42 = vpop.f32.mrf.mxu1  ;;  %v7476_v38 = vadd.f32 %v2102_v46, %v1911_v58  ;;  %v4949_v58 = vor.u32 %v5163_v8, %v4946_v2  ;;  %v5164_v46 = vld [vmem:[%s8172_s2 + $0x2c4] sm:$0xf0]  ;;  %v5179_v2 = vld [vmem:[%s8172_s2 + $0x444] sm:$0xf] }
 0x2ec   : > { %v1912_v61 = vadd.f32 %v1842_v62, %v8519_v9  ;;  %v8527_v9 = vld [vmem:[#allocation19_spill] sm:$0xff] }
 0x2ed   : > { %8521 = vst [vmem:[#allocation11_spill] sm:$0xff] %v7476_v38  ;;  %2413 = vmatmul.bf16.gmra.mxu2 %v8523_v14  ;;  %2880 = vmatmul.bf16.gmra.mxu0 %v7474_v34 }
 0x2ee   : > { %v7478_v18 = vadd.f32 %v2191_v49, %v1912_v61  ;;  %2969 = vmatmul.bf16.gmra.mxu1 %v7474_v34  ;;  %v4944_v61 = vld [vmem:[%s8172_s2 + $0x2c0] sm:$0xf]  ;;  %3290 = vmatpush.bf16.msra.mxu3 %v4949_v58 }
 0x2ef   : > { %v4945_v49 = vor.u32 %v5164_v46, %v4944_v61  ;;  %v5010_v61 = vld [vmem:[%s8172_s2 + $0x448] sm:$0xf0]  ;;  %v5008_v58 = vld [vmem:[%s8172_s2 + $0x440] sm:$0xf] }
 0x2f0   : > { %8522 = vst [vmem:[#allocation68_spill] sm:$0xff] %v7478_v18  ;;  %2502 = vmatmul.bf16.gmra.mxu3 %v8523_v14  ;;  %v1756_v0 = vpop.f32.mrf.mxu2  ;;  %v2654_v14 = vrot.slane %v8527_v9, 2  ;;  %v8528_v18 = vld [vmem:[#allocation72_spill] sm:$0xff]  ;;  %v8531_v9 = vld [vmem:[#allocation50_spill] sm:$0xff] }
 0x2f1   : > { %v1913_v51 = vadd.f32 %v1756_v0, %v8524_v56  ;;  %v2656_v38 = vrot.slane %v8528_v18, 2  ;;  %3201 = vmatpush.bf16.msra.mxu2 %v4945_v49  ;;  %v5013_v0 = vor.u32 %v5179_v2, %v5010_v61  ;;  %v5180_v18 = vld [vmem:[%s8172_s2 + $0x444] sm:$0xf0] }
 0x2f2   : > { %v2107_v62 = vpop.f32.mrf.mxu0  ;;  %v5009_v56 = vor.u32 %v5180_v18, %v5008_v58  ;;  %v8538_v58 = vld [vmem:[#allocation52_spill] sm:$0xff] }
 0x2f3   : > { %v1845_v54 = vpop.f32.mrf.mxu3  ;;  %v2196_v8 = vpop.f32.mrf.mxu1  ;;  %v7510_v46 = vadd.f32 %v2105_v32, %v1913_v51  ;;  %3636 = vmatpush.bf16.msra.mxu1 %v5013_v0  ;;  %v2657_v10 = vsel %vm2627_vm5, %v2654_v14, %v2656_v38  ;;  %v8532_v32 = vld [vmem:[#allocation75_spill] sm:$0xff] }
 0x2f4   : > { %v1914_v28 = vadd.f32 %v1845_v54, %v8526_v35  ;;  %v2655_v54 = vsel %vm2627_vm5, %v2653_v23, %v2654_v14  ;;  %3547 = vmatpush.bf16.msra.mxu0 %v5009_v56  ;;  %v8537_v23 = vld [vmem:[#allocation51_spill] sm:$0xff]  ;;  %v8539_v56 = vld [vmem:[#allocation22_spill] sm:$0xff] }
 0x2f5   : > { %8529 = vst [vmem:[#allocation42_spill] sm:$0xff] %v7510_v46  ;;  %v7521_v61 = vpack.c.bf16 %v2657_v10, %v2655_v54  ;;  %v8541_v10 = vld [vmem:[#allocation74_spill] sm:$0xff] }
 0x2f6   : > { %v7515_v49 = vadd.f32 %v2194_v42, %v1914_v28  ;;  %v8536_v28 = vld [vmem:[#allocation53_spill] sm:$0xff] }
 0x2f7   : > { %8533 = vst [vmem:[#allocation45_spill] sm:$0xff] %v7521_v61 }
 0x2f8   : > { %8530 = vst [vmem:[#allocation71_spill] sm:$0xff] %v7515_v49  ;;  %v1758_v35 = vpop.f32.mrf.mxu2 }
 0x2f9   : > { %v1915_v53 = vadd.f32 %v1758_v35, %v8531_v9  ;;  %v2661_v35 = vrot.slane %v8541_v10, 2  ;;  %v8549_v10 = vld [vmem:[#allocation26_spill] sm:$0xff] }
 0x2fa   : > { %v2110_v2 = vpop.f32.mrf.mxu0 }
 0x2fb   : > { %v1847_v30 = vpop.f32.mrf.mxu3  ;;  %v2199_v46 = vpop.f32.mrf.mxu1  ;;  %v7523_v34 = vadd.f32 %v2107_v62, %v1915_v53  ;;  %v2658_v53 = vrot.slane %v8539_v56, 2 }
 0x2fc   : > { %v1916_v51 = vadd.f32 %v1847_v30, %v8532_v32 }
 0x2fd   : > { %8534 = vst [vmem:[#allocation43_spill] sm:$0xff] %v7523_v34  ;;  %2418 = vmatmul.bf16.gmra.mxu2 %v8536_v28  ;;  %2885 = vmatmul.bf16.gmra.mxu0 %v7521_v61 }
 0x2fe   : > { %v7525_v42 = vadd.f32 %v2196_v8, %v1916_v51  ;;  %2974 = vmatmul.bf16.gmra.mxu1 %v7521_v61  ;;  %v8540_v8 = vld [vmem:[#allocation23_spill] sm:$0xff] }
 0x2ff   : > { %v2659_v54 = vrot.slane %v8540_v8, 2 }
 0x300   : > { %8535 = vst [vmem:[#allocation44_spill] sm:$0xff] %v7525_v42  ;;  %2507 = vmatmul.bf16.gmra.mxu3 %v8536_v28  ;;  %v1761_v38 = vpop.f32.mrf.mxu2 }
 0x301   : > { %v1917_v14 = vadd.f32 %v1761_v38, %v8537_v23  ;;  %v2660_v51 = vsel %vm2627_vm5, %v2658_v53, %v2659_v54  ;;  %v2662_v28 = vsel %vm2627_vm5, %v2659_v54, %v2661_v35  ;;  %v8544_v23 = vld [vmem:[#allocation54_spill] sm:$0xff]  ;;  %v8548_v53 = vld [vmem:[#allocation55_spill] sm:$0xff]  ;;  %v2663_v35 = vrot.slane %v8549_v10, 2 }
 0x302   : > { %v2112_v18 = vpop.f32.mrf.mxu0  ;;  %v7544_v49 = vpack.c.bf16 %v2662_v28, %v2660_v51  ;;  %v8550_v51 = vld [vmem:[#allocation56_spill] sm:$0xff] }
 0x303   : > { %v1850_v30 = vpop.f32.mrf.mxu3  ;;  %v2201_v62 = vpop.f32.mrf.mxu1  ;;  %v7536_v9 = vadd.f32 %v2110_v2, %v1917_v14  ;;  %v4938_v14 = vld [vmem:[%s8172_s2 + $0x2b8] sm:$0xf0] }
 0x304   : > { %v1918_v0 = vadd.f32 %v1850_v30, %v8538_v58  ;;  %v8545_v58 = vld [vmem:[#allocation77_spill] sm:$0xff] }
 0x305   : > { %8542 = vst [vmem:[#allocation14_spill] sm:$0xff] %v7536_v9 }
 0x306   : > { %v7538_v32 = vadd.f32 %v2199_v46, %v1918_v0  ;;  %v5161_v46 = vld [vmem:[%s8172_s2 + $0x2b4] sm:$0xf]  ;;  %v5162_v0 = vld [vmem:[%s8172_s2 + $0x2b4] sm:$0xf0] }
 0x308   : > { %8543 = vst [vmem:[#allocation15_spill] sm:$0xff] %v7538_v32  ;;  %v1763_v38 = vpop.f32.mrf.mxu2 }
 0x309   : > { %v1919_v42 = vadd.f32 %v1763_v38, %v8544_v23  ;;  %v8551_v23 = vld [vmem:[#allocation27_spill] sm:$0xff] }
 0x30a   : > { %v2115_v56 = vpop.f32.mrf.mxu0 }
 0x30b   : > { %v1852_v30 = vpop.f32.mrf.mxu3  ;;  %v2204_v8 = vpop.f32.mrf.mxu1  ;;  %v7546_v61 = vadd.f32 %v2112_v18, %v1919_v42  ;;  %v4941_v42 = vor.u32 %v5161_v46, %v4938_v14  ;;  %v5177_v14 = vld [vmem:[%s8172_s2 + $0x434] sm:$0xf] }
 0x30c   : > { %v1920_v34 = vadd.f32 %v1852_v30, %v8545_v58  ;;  %v2664_v30 = vrot.slane %v8551_v23, 2  ;;  %v8552_v58 = vld [vmem:[#allocation76_spill] sm:$0xff] }
 0x30d   : > { %8546 = vst [vmem:[#allocation70_spill] sm:$0xff] %v7546_v61  ;;  %2423 = vmatmul.bf16.gmra.mxu2 %v6931_v22  ;;  %2890 = vmatmul.bf16.gmra.mxu0 %v7544_v49 }
 0x30e   : > { %v7548_v2 = vadd.f32 %v2201_v62, %v1920_v34  ;;  %2979 = vmatmul.bf16.gmra.mxu1 %v7544_v49  ;;  %v4936_v34 = vld [vmem:[%s8172_s2 + $0x2b0] sm:$0xf]  ;;  %3291 = vmatpush.bf16.msra.mxu3 %v4941_v42  ;;  %v2665_v10 = vsel %vm2627_vm5, %v2663_v35, %v2664_v30 }
 0x30f   : > { %v4937_v18 = vor.u32 %v5162_v0, %v4936_v34  ;;  %v5002_v34 = vld [vmem:[%s8172_s2 + $0x438] sm:$0xf0]  ;;  %v5000_v42 = vld [vmem:[%s8172_s2 + $0x430] sm:$0xf] }
 0x310   : > { %8547 = vst [vmem:[#allocation46_spill] sm:$0xff] %v7548_v2  ;;  %2512 = vmatmul.bf16.gmra.mxu3 %v6931_v22  ;;  %v1766_v22 = vpop.f32.mrf.mxu2  ;;  %v2666_v2 = vrot.slane %v8552_v58, 2  ;;  %v8554_v58 = vld [vmem:[#allocation57_spill] sm:$0xff] }
 0x311   : > { %v1921_v62 = vadd.f32 %v1766_v22, %v8548_v53  ;;  %3202 = vmatpush.bf16.msra.mxu2 %v4937_v18  ;;  %v5005_v22 = vor.u32 %v5177_v14, %v5002_v34  ;;  %v5178_v18 = vld [vmem:[%s8172_s2 + $0x434] sm:$0xf0] }
 0x312   : > { %v2117_v38 = vpop.f32.mrf.mxu0 }
 0x313   : > { %v1855_v54 = vpop.f32.mrf.mxu3  ;;  %v2206_v46 = vpop.f32.mrf.mxu1  ;;  %v7580_v0 = vadd.f32 %v2115_v56, %v1921_v62  ;;  %3637 = vmatpush.bf16.msra.mxu1 %v5005_v22  ;;  %v8555_v56 = vld [vmem:[#allocation58_spill] sm:$0xff] }
 0x314   : > { %v1922_v28 = vadd.f32 %v1855_v54, %v8550_v51  ;;  %v5001_v54 = vor.u32 %v5178_v18, %v5000_v42  ;;  %v2667_v51 = vsel %vm2627_vm5, %v2664_v30, %v2666_v2  ;;  %v8556_v42 = vld [vmem:[#allocation30_spill] sm:$0xff] }
 0x315   : > { %8553 = vst [vmem:[#allocation73_spill] sm:$0xff] %v7580_v0  ;;  %v7591_v34 = vpack.c.bf16 %v2667_v51, %v2665_v10  ;;  %v8558_v18 = vld [vmem:[#allocation78_spill] sm:$0xff] }
 0x316   : > { %v7585_v53 = vadd.f32 %v2204_v8, %v1922_v28  ;;  %3548 = vmatpush.bf16.msra.mxu0 %v5001_v54  ;;  %v2671_v54 = vrot.slane %v8558_v18, 2  ;;  %v8561_v18 = vld [vmem:[#allocation2_spill] sm:$0xff] }
 0x318   : > { %v1768_v23 = vpop.f32.mrf.mxu2 }
 0x319   : > { %v1923_v61 = vadd.f32 %v1768_v23, %v8554_v58 }
 0x31a   : > { %v2120_v14 = vpop.f32.mrf.mxu0 }
 0x31b   : > { %v1857_v32 = vpop.f32.mrf.mxu3  ;;  %v2209_v0 = vpop.f32.mrf.mxu1  ;;  %v7593_v9 = vadd.f32 %v2117_v38, %v1923_v61  ;;  %v2668_v61 = vrot.slane %v8556_v42, 2 }
 0x31c   : > { %v1924_v62 = vadd.f32 %v1857_v32, %v8555_v56  ;;  %v8559_v56 = vld [vmem:[#allocation59_spill] sm:$0xff] }
 0x31d   : > { %2428 = vmatmul.bf16.gmra.mxu2 %v6966_v39  ;;  %2895 = vmatmul.bf16.gmra.mxu0 %v7591_v34 }
 0x31e   : > { %v7595_v8 = vadd.f32 %v2206_v46, %v1924_v62  ;;  %2984 = vmatmul.bf16.gmra.mxu1 %v7591_v34  ;;  %v8557_v46 = vld [vmem:[#allocation31_spill] sm:$0xff] }
 0x31f   : > { %v2669_v22 = vrot.slane %v8557_v46, 2 }
 0x320   : > { %2517 = vmatmul.bf16.gmra.mxu3 %v6966_v39  ;;  %v1771_v2 = vpop.f32.mrf.mxu2 }
 0x321   : > { %v1925_v35 = vadd.f32 %v1771_v2, %v6957_v17  ;;  %v2670_v39 = vsel %vm2627_vm5, %v2668_v61, %v2669_v22  ;;  %v2672_v23 = vsel %vm2627_vm5, %v2669_v22, %v2671_v54  ;;  %v2673_v54 = vrot.slane %v8561_v18, 2 }
 0x322   : > { %v2122_v30 = vpop.f32.mrf.mxu0 }
 0x323   : > { %v1860_v32 = vpop.f32.mrf.mxu3  ;;  %v2211_v38 = vpop.f32.mrf.mxu1  ;;  %v7606_v10 = vadd.f32 %v2120_v14, %v1925_v35  ;;  %v4928_v35 = vld [vmem:[%s8172_s2 + $0x2a0] sm:$0xf] }
 0x324   : > { %v1926_v28 = vadd.f32 %v1860_v32, %v6959_v4  ;;  %v7614_v32 = vpack.c.bf16 %v2672_v23, %v2670_v39 }
 0x326   : > { %v7608_v51 = vadd.f32 %v2209_v0, %v1926_v28  ;;  %v4930_v0 = vld [vmem:[%s8172_s2 + $0x2a8] sm:$0xf0] }
 0x328   : > { %v1773_v17 = vpop.f32.mrf.mxu2 }
 0x329   : > { %v1927_v58 = vadd.f32 %v1773_v17, %v6969_v26  ;;  %v5159_v26 = vld [vmem:[%s8172_s2 + $0x2a4] sm:$0xf]  ;;  %v8562_v17 = vld [vmem:[#allocation3_spill] sm:$0xff] }
 0x32a   : > { %v2861_v2 = vpop.f32.mrf.mxu0  ;;  %v4933_v28 = vor.u32 %v5159_v26, %v4930_v0  ;;  %v5175_v26 = vld [vmem:[%s8172_s2 + $0x424] sm:$0xf]  ;;  %v4992_v0 = vld [vmem:[%s8172_s2 + $0x420] sm:$0xf] }
 0x32b   : > { %v1862_v4 = vpop.f32.mrf.mxu3  ;;  %v2950_v42 = vpop.f32.mrf.mxu1  ;;  %v7616_v46 = vadd.f32 %v2122_v30, %v1927_v58  ;;  %v5160_v30 = vld [vmem:[%s8172_s2 + $0x2a4] sm:$0xf0]  ;;  %v2674_v58 = vrot.slane %v8562_v17, 2 }
 0x32c   : > { %v1928_v62 = vadd.f32 %v1862_v4, %v8559_v56  ;;  %v4929_v61 = vor.u32 %v5160_v30, %v4928_v35  ;;  %3292 = vmatpush.bf16.msra.mxu3 %v4933_v28  ;;  %v8563_v4 = vld [vmem:[#allocation79_spill] sm:$0xff] }
 0x32d   : > { %2433 = vmatmul.bf16.gmra.mxu2 %v7025_v50  ;;  %2900 = vmatmul.bf16.gmra.mxu0 %v7614_v32  ;;  %v2676_v56 = vrot.slane %v8563_v4, 2  ;;  %v5176_v28 = vld [vmem:[%s8172_s2 + $0x424] sm:$0xf0] }
 0x32e   : > { %v7618_v14 = vadd.f32 %v2211_v38, %v1928_v62  ;;  %2989 = vmatmul.bf16.gmra.mxu1 %v7614_v32  ;;  %3203 = vmatpush.bf16.msra.mxu2 %v4929_v61  ;;  %v2675_v61 = vsel %vm2627_vm5, %v2673_v54, %v2674_v58 }
 0x330   : > { %8560 = vst [vmem:[#allocation49_spill] sm:$0xff] %v7618_v14  ;;  %2522 = vmatmul.bf16.gmra.mxu3 %v7025_v50  ;;  %v2394_v50 = vpop.f32.mrf.mxu2 }
 0x331   : > { %v2563_v38 = vadd.f32 %v2394_v50, %v7013_v20  ;;  %v4994_v20 = vld [vmem:[%s8172_s2 + $0x428] sm:$0xf0]  ;;  %v4993_v50 = vor.u32 %v5176_v28, %v4992_v0  ;;  %v8566_v0 = vld [vmem:[#allocation60_spill] sm:$0xff] }
 0x332   : > { %v2863_v23 = vpop.f32.mrf.mxu0  ;;  %v4997_v35 = vor.u32 %v5175_v26, %v4994_v20 }
 0x333   : > { %v2483_v22 = vpop.f32.mrf.mxu3  ;;  %v2952_v62 = vpop.f32.mrf.mxu1  ;;  %3549 = vmatpush.bf16.msra.mxu0 %v4993_v50  ;;  %v8568_v50 = vld [vmem:[#allocation61_spill] sm:$0xff] }
 0x334   : > { %v2564_v39 = vadd.f32 %v2483_v22, %v7018_v1  ;;  %v7650_v1 = vadd.f32 %v2861_v2, %v2563_v38  ;;  %3638 = vmatpush.bf16.msra.mxu1 %v4997_v35  ;;  %v2677_v22 = vsel %vm2627_vm5, %v2674_v58, %v2676_v56  ;;  %v8565_v2 = vld [vmem:[#allocation62_spill] sm:$0xff] }
 0x335   : > { %v7661_v20 = vpack.c.bf16 %v2677_v22, %v2675_v61  ;;  %v2681_v61 = vrot.slane %v8568_v50, 2  ;;  %v8570_v50 = vld [vmem:[#allocation5_spill] sm:$0xff] }
 0x336   : > { %8564 = vst [vmem:[#allocation47_spill] sm:$0xff] %v7650_v1  ;;  %v7655_v30 = vadd.f32 %v2950_v42, %v2564_v39 }
 0x338   : > { %v2396_v18 = vpop.f32.mrf.mxu2 }
 0x339   : > { %v2565_v17 = vadd.f32 %v2396_v18, %v7027_v37 }
 0x33a   : > { %v2866_v26 = vpop.f32.mrf.mxu0 }
 0x33b   : > { %v2485_v4 = vpop.f32.mrf.mxu3  ;;  %v2955_v1 = vpop.f32.mrf.mxu1  ;;  %v7663_v14 = vadd.f32 %v2863_v23, %v2565_v17  ;;  %v2678_v23 = vrot.slane %v8566_v0, 2 }
 0x33c   : > { %v2566_v38 = vadd.f32 %v2485_v4, %v8565_v2  ;;  %v8569_v2 = vld [vmem:[#allocation80_spill] sm:$0xff] }
 0x33d   : > { %2438 = vmatmul.bf16.gmra.mxu2 %v7060_v3  ;;  %2905 = vmatmul.bf16.gmra.mxu0 %v7661_v20 }
 0x33e   : > { %v7665_v42 = vadd.f32 %v2952_v62, %v2566_v38  ;;  %2994 = vmatmul.bf16.gmra.mxu1 %v7661_v20  ;;  %v8567_v62 = vld [vmem:[#allocation6_spill] sm:$0xff] }
 0x33f   : > { %v2679_v28 = vrot.slane %v8567_v62, 2 }
 0x340   : > { %2527 = vmatmul.bf16.gmra.mxu3 %v7060_v3  ;;  %v2399_v37 = vpop.f32.mrf.mxu2 }
 0x341   : > { %v2567_v54 = vadd.f32 %v2399_v37, %v7051_v27  ;;  %v2680_v3 = vsel %vm2627_vm5, %v2678_v23, %v2679_v28  ;;  %v2682_v17 = vsel %vm2627_vm5, %v2679_v28, %v2681_v61  ;;  %v2683_v61 = vrot.slane %v8570_v50, 2 }
 0x342   : > { %v2868_v56 = vpop.f32.mrf.mxu0 }
 0x343   : > { %v2488_v39 = vpop.f32.mrf.mxu3  ;;  %v2957_v35 = vpop.f32.mrf.mxu1  ;;  %v7676_v22 = vadd.f32 %v2866_v26, %v2567_v54  ;;  %v4920_v54 = vld [vmem:[%s8172_s2 + $0x290] sm:$0xf] }
 0x344   : > { %v2568_v58 = vadd.f32 %v2488_v39, %v7053_v19  ;;  %v7684_v39 = vpack.c.bf16 %v2682_v17, %v2680_v3 }
 0x346   : > { %v7678_v18 = vadd.f32 %v2955_v1, %v2568_v58  ;;  %v4922_v1 = vld [vmem:[%s8172_s2 + $0x298] sm:$0xf0] }
 0x348   : > { %v2401_v27 = vpop.f32.mrf.mxu2 }
 0x349   : > { %v2569_v4 = vadd.f32 %v2401_v27, %v7063_v55  ;;  %v5157_v55 = vld [vmem:[%s8172_s2 + $0x294] sm:$0xf]  ;;  %v8571_v27 = vld [vmem:[#allocation9_spill] sm:$0xff] }
 0x34a   : > { %v2871_v37 = vpop.f32.mrf.mxu0  ;;  %v4925_v58 = vor.u32 %v5157_v55, %v4922_v1  ;;  %v5173_v55 = vld [vmem:[%s8172_s2 + $0x414] sm:$0xf]  ;;  %v4984_v1 = vld [vmem:[%s8172_s2 + $0x410] sm:$0xf] }
 0x34b   : > { %v2490_v19 = vpop.f32.mrf.mxu3  ;;  %v2960_v0 = vpop.f32.mrf.mxu1  ;;  %v7686_v62 = vadd.f32 %v2868_v56, %v2569_v4  ;;  %v5158_v56 = vld [vmem:[%s8172_s2 + $0x294] sm:$0xf0]  ;;  %v2684_v4 = vrot.slane %v8571_v27, 2 }
 0x34c   : > { %v2570_v38 = vadd.f32 %v2490_v19, %v8569_v2  ;;  %v4921_v23 = vor.u32 %v5158_v56, %v4920_v54  ;;  %3293 = vmatpush.bf16.msra.mxu3 %v4925_v58  ;;  %v8572_v19 = vld [vmem:[#allocation8_spill] sm:$0xff]  ;;  %v5174_v58 = vld [vmem:[%s8172_s2 + $0x414] sm:$0xf0] }
 0x34d   : > { %2443 = vmatmul.bf16.gmra.mxu2 %v7119_v41  ;;  %2910 = vmatmul.bf16.gmra.mxu0 %v7684_v39  ;;  %v2686_v2 = vrot.slane %v8572_v19, 2 }
 0x34e   : > { %v7688_v26 = vadd.f32 %v2957_v35, %v2570_v38  ;;  %2999 = vmatmul.bf16.gmra.mxu1 %v7684_v39  ;;  %3204 = vmatpush.bf16.msra.mxu2 %v4921_v23  ;;  %v2685_v23 = vsel %vm2627_vm5, %v2683_v61, %v2684_v4 }
 0x350   : > { %2532 = vmatmul.bf16.gmra.mxu3 %v7119_v41  ;;  %v2404_v41 = vpop.f32.mrf.mxu2 }
 0x351   : > { %v2571_v35 = vadd.f32 %v2404_v41, %v7107_v13  ;;  %v4986_v13 = vld [vmem:[%s8172_s2 + $0x418] sm:$0xf0]  ;;  %v4985_v41 = vor.u32 %v5174_v58, %v4984_v1 }
 0x352   : > { %v2873_v17 = vpop.f32.mrf.mxu0  ;;  %v4989_v54 = vor.u32 %v5173_v55, %v4986_v13  ;;  %v8577_v58 = vld [vmem:[#allocation81_spill] sm:$0xff] }
 0x353   : > { %v2493_v28 = vpop.f32.mrf.mxu3  ;;  %v2962_v38 = vpop.f32.mrf.mxu1  ;;  %3550 = vmatpush.bf16.msra.mxu0 %v4985_v41  ;;  %v2691_v41 = vrot.slane %v8577_v58, 2 }
 0x354   : > { %v2572_v3 = vadd.f32 %v2493_v28, %v7112_v60  ;;  %v7720_v60 = vadd.f32 %v2871_v37, %v2571_v35  ;;  %3639 = vmatpush.bf16.msra.mxu1 %v4989_v54  ;;  %v2687_v28 = vsel %vm2627_vm5, %v2684_v4, %v2686_v2  ;;  %v8575_v2 = vld [vmem:[#allocation12_spill] sm:$0xff] }
 0x355   : > { %v7731_v55 = vpack.c.bf16 %v2687_v28, %v2685_v23 }
 0x356   : > { %8573 = vst [vmem:[#allocation18_spill] sm:$0xff] %v7720_v60  ;;  %v7725_v56 = vadd.f32 %v2960_v0, %v2572_v3 }
 0x358   : > { %v2406_v50 = vpop.f32.mrf.mxu2 }
 0x359   : > { %v2573_v27 = vadd.f32 %v2406_v50, %v7121_v40 }
 0x35a   : > { %v2876_v35 = vpop.f32.mrf.mxu0 }
 0x35b   : > { %v2495_v19 = vpop.f32.mrf.mxu3  ;;  %v2965_v13 = vpop.f32.mrf.mxu1  ;;  %v7733_v60 = vadd.f32 %v2873_v17, %v2573_v27  ;;  %v2688_v17 = vrot.slane %v8575_v2, 2  ;;  %v8578_v27 = vld [vmem:[#allocation83_spill] sm:$0xff] }
 0x35c   : > { %v2574_v37 = vadd.f32 %v2495_v19, %v7124_v33 }
 0x35d   : > { %2448 = vmatmul.bf16.gmra.mxu2 %v7159_v31  ;;  %2915 = vmatmul.bf16.gmra.mxu0 %v7731_v55 }
 0x35e   : > { %v7735_v0 = vadd.f32 %v2962_v38, %v2574_v37  ;;  %3004 = vmatmul.bf16.gmra.mxu1 %v7731_v55  ;;  %v8576_v38 = vld [vmem:[#allocation13_spill] sm:$0xff]  ;;  %v8579_v37 = vld [vmem:[#allocation84_spill] sm:$0xff] }
 0x35f   : > { %v2689_v54 = vrot.slane %v8576_v38, 2 }
 0x360   : > { %8574 = vst [vmem:[#allocation48_spill] sm:$0xff] %v7735_v0  ;;  %2537 = vmatmul.bf16.gmra.mxu3 %v7159_v31  ;;  %v2409_v40 = vpop.f32.mrf.mxu2 }
 0x361   : > { %v2575_v61 = vadd.f32 %v2409_v40, %v7145_v6  ;;  %v2690_v31 = vsel %vm2627_vm5, %v2688_v17, %v2689_v54  ;;  %v2692_v50 = vsel %vm2627_vm5, %v2689_v54, %v2691_v41  ;;  %v5156_v17 = vld [vmem:[%s8172_s2 + $0x284] sm:$0xf0]  ;;  %v8581_v41 = vld [vmem:[#allocation16_spill] sm:$0xff] }
 0x362   : > { %v2878_v4 = vpop.f32.mrf.mxu0  ;;  %v7754_v2 = vpack.c.bf16 %v2692_v50, %v2690_v31  ;;  %v2693_v31 = vrot.slane %v8581_v41, 2 }
 0x363   : > { %v2498_v33 = vpop.f32.mrf.mxu3  ;;  %v2967_v1 = vpop.f32.mrf.mxu1  ;;  %v7746_v23 = vadd.f32 %v2876_v35, %v2575_v61  ;;  %v4914_v61 = vld [vmem:[%s8172_s2 + $0x288] sm:$0xf0] }
 0x364   : > { %v2576_v3 = vadd.f32 %v2498_v33, %v7147_v52 }
 0x366   : > { %v7748_v28 = vadd.f32 %v2965_v13, %v2576_v3  ;;  %v5155_v13 = vld [vmem:[%s8172_s2 + $0x284] sm:$0xf]  ;;  %v4912_v3 = vld [vmem:[%s8172_s2 + $0x280] sm:$0xf] }
 0x368   : > { %v2411_v6 = vpop.f32.mrf.mxu2 }
 0x369   : > { %v2577_v19 = vadd.f32 %v2411_v6, %v8578_v27  ;;  %v8582_v27 = vld [vmem:[#allocation17_spill] sm:$0xff] }
 0x36a   : > { %v2881_v33 = vpop.f32.mrf.mxu0 }
 0x36b   : > { %v2500_v52 = vpop.f32.mrf.mxu3  ;;  %v2970_v38 = vpop.f32.mrf.mxu1  ;;  %v7756_v0 = vadd.f32 %v2878_v4, %v2577_v19  ;;  %v4917_v4 = vor.u32 %v5155_v13, %v4914_v61  ;;  %v2694_v19 = vrot.slane %v8582_v27, 2  ;;  %v5171_v13 = vld [vmem:[%s8172_s2 + $0x404] sm:$0xf]  ;;  %v4976_v61 = vld [vmem:[%s8172_s2 + $0x400] sm:$0xf] }
 0x36c   : > { %v2578_v40 = vadd.f32 %v2500_v52, %v8579_v37  ;;  %v8583_v52 = vld [vmem:[#allocation82_spill] sm:$0xff] }
 0x36d   : > { %2453 = vmatmul.bf16.gmra.mxu2 %v7223_v15  ;;  %2920 = vmatmul.bf16.gmra.mxu0 %v7754_v2  ;;  %v2696_v37 = vrot.slane %v8583_v52, 2 }
 0x36e   : > { %v7758_v35 = vadd.f32 %v2967_v1, %v2578_v40  ;;  %3009 = vmatmul.bf16.gmra.mxu1 %v7754_v2  ;;  %v4913_v1 = vor.u32 %v5156_v17, %v4912_v3  ;;  %3294 = vmatpush.bf16.msra.mxu3 %v4917_v4  ;;  %v5172_v4 = vld [vmem:[%s8172_s2 + $0x404] sm:$0xf0] }
 0x370   : > { %8580 = vst [vmem:[#allocation19_spill] sm:$0xff] %v7758_v35  ;;  %2542 = vmatmul.bf16.gmra.mxu3 %v7223_v15  ;;  %v2414_v15 = vpop.f32.mrf.mxu2  ;;  %3205 = vmatpush.bf16.msra.mxu2 %v4913_v1  ;;  %v2695_v1 = vsel %vm2627_vm5, %v2693_v31, %v2694_v19 }
 0x371   : > { %v2579_v54 = vadd.f32 %v2414_v15, %v7211_v45  ;;  %v4978_v45 = vld [vmem:[%s8172_s2 + $0x408] sm:$0xf0]  ;;  %v4977_v15 = vor.u32 %v5172_v4, %v4976_v61  ;;  %v8586_v61 = vld [vmem:[#allocation20_spill] sm:$0xff] }
 0x372   : > { %v2883_v6 = vpop.f32.mrf.mxu0  ;;  %v4981_v3 = vor.u32 %v5171_v13, %v4978_v45 }
 0x373   : > { %v2503_v58 = vpop.f32.mrf.mxu3  ;;  %v2972_v40 = vpop.f32.mrf.mxu1  ;;  %3551 = vmatpush.bf16.msra.mxu0 %v4977_v15  ;;  %v8588_v15 = vld [vmem:[#allocation85_spill] sm:$0xff] }
 0x374   : > { %v2580_v50 = vadd.f32 %v2503_v58, %v7216_v44  ;;  %v7790_v44 = vadd.f32 %v2881_v33, %v2579_v54  ;;  %3640 = vmatpush.bf16.msra.mxu1 %v4981_v3  ;;  %v2697_v58 = vsel %vm2627_vm5, %v2694_v19, %v2696_v37  ;;  %v8585_v33 = vld [vmem:[#allocation86_spill] sm:$0xff] }
 0x375   : > { %v7801_v45 = vpack.c.bf16 %v2697_v58, %v2695_v1  ;;  %v2701_v1 = vrot.slane %v8588_v15, 2  ;;  %v2706_v15 = vrot.slane %v7241_v5, 2 }
 0x376   : > { %8584 = vst [vmem:[#allocation72_spill] sm:$0xff] %v7790_v44  ;;  %v7795_v17 = vadd.f32 %v2970_v38, %v2580_v50 }
 0x378   : > { %v2416_v41 = vpop.f32.mrf.mxu2 }
 0x379   : > { %v2581_v27 = vadd.f32 %v2416_v41, %v7225_v63 }
 0x37a   : > { %v2886_v13 = vpop.f32.mrf.mxu0 }
 0x37b   : > { %v2505_v52 = vpop.f32.mrf.mxu3  ;;  %v2975_v44 = vpop.f32.mrf.mxu1  ;;  %v7803_v35 = vadd.f32 %v2883_v6, %v2581_v27  ;;  %v2698_v6 = vrot.slane %v8586_v61, 2 }
 0x37c   : > { %v2582_v54 = vadd.f32 %v2505_v52, %v8585_v33 }
 0x37d   : > { %2458 = vmatmul.bf16.gmra.mxu2 %v7258_v43  ;;  %2925 = vmatmul.bf16.gmra.mxu0 %v7801_v45 }
 0x37e   : > { %v7805_v38 = vadd.f32 %v2972_v40, %v2582_v54  ;;  %3014 = vmatmul.bf16.gmra.mxu1 %v7801_v45  ;;  %v8587_v40 = vld [vmem:[#allocation21_spill] sm:$0xff] }
 0x37f   : > { %v2699_v4 = vrot.slane %v8587_v40, 2 }
 0x380   : > { %2547 = vmatmul.bf16.gmra.mxu3 %v7258_v43  ;;  %v2419_v63 = vpop.f32.mrf.mxu2 }
 0x381   : > { %v2583_v31 = vadd.f32 %v2419_v63, %v7249_v29  ;;  %v2700_v43 = vsel %vm2627_vm5, %v2698_v6, %v2699_v4  ;;  %v2702_v27 = vsel %vm2627_vm5, %v2699_v4, %v2701_v1  ;;  %v8589_v6 = vld [vmem:[#allocation24_spill] sm:$0xff] }
 0x382   : > { %v2888_v37 = vpop.f32.mrf.mxu0  ;;  %v7824_v63 = vpack.c.bf16 %v2702_v27, %v2700_v43 }
 0x383   : > { %v2508_v50 = vpop.f32.mrf.mxu3  ;;  %v2977_v3 = vpop.f32.mrf.mxu1  ;;  %v7816_v58 = vadd.f32 %v2886_v13, %v2583_v31 }
 0x384   : > { %v2584_v19 = vadd.f32 %v2508_v50, %v7251_v21 }
 0x386   : > { %v7818_v41 = vadd.f32 %v2975_v44, %v2584_v19 }
 0x388   : > { %v2421_v29 = vpop.f32.mrf.mxu2 }
 0x389   : > { %v2585_v52 = vadd.f32 %v2421_v29, %v7261_v48 }
 0x38a   : > { %v2891_v54 = vpop.f32.mrf.mxu0 }
 0x38b   : > { %v2510_v21 = vpop.f32.mrf.mxu3  ;;  %v2980_v50 = vpop.f32.mrf.mxu1  ;;  %v7826_v61 = vadd.f32 %v2888_v37, %v2585_v52  ;;  %v2703_v37 = vrot.slane %v8589_v6, 2 }
 0x38c   : > { %v2586_v33 = vadd.f32 %v2510_v21, %v7263_v11 }
 0x38d   : > { %2463 = vmatmul.bf16.gmra.mxu2 %v7315_v16  ;;  %2930 = vmatmul.bf16.gmra.mxu0 %v7824_v63 }
 0x38e   : > { %v7828_v13 = vadd.f32 %v2977_v3, %v2586_v33  ;;  %3019 = vmatmul.bf16.gmra.mxu1 %v7824_v63  ;;  %v8590_v3 = vld [vmem:[#allocation25_spill] sm:$0xff] }
 0x38f   : > { %v2704_v4 = vrot.slane %v8590_v3, 2 }
 0x390   : > { %2552 = vmatmul.bf16.gmra.mxu3 %v7315_v16  ;;  %v2424_v48 = vpop.f32.mrf.mxu2 }
 0x391   : > { %v2587_v44 = vadd.f32 %v2424_v48, %v7304_v47  ;;  %v2705_v16 = vsel %vm2627_vm5, %v2703_v37, %v2704_v4  ;;  %v2707_v27 = vsel %vm2627_vm5, %v2704_v4, %v2706_v15 }
 0x392   : > { %v2893_v19 = vpop.f32.mrf.mxu0  ;;  %v7847_v33 = vpack.c.bf16 %v2707_v27, %v2705_v16 }
 0x393   : > { %v2513_v11 = vpop.f32.mrf.mxu3  ;;  %v2982_v40 = vpop.f32.mrf.mxu1  ;;  %v7839_v1 = vadd.f32 %v2891_v54, %v2587_v44  ;;  %v8591_v54 = vld [vmem:[#allocation65_spill] sm:$0xff] }
 0x394   : > { %v2588_v31 = vadd.f32 %v2513_v11, %v7309_v25 }
 0x396   : > { %v7841_v43 = vadd.f32 %v2980_v50, %v2588_v31 }
 0x398   : > { %v2426_v47 = vpop.f32.mrf.mxu2 }
 0x399   : > { %v2589_v29 = vadd.f32 %v2426_v47, %v7317_v7 }
 0x39a   : > { %v2896_v21 = vpop.f32.mrf.mxu0 }
 0x39b   : > { %v2515_v25 = vpop.f32.mrf.mxu3  ;;  %v2985_v48 = vpop.f32.mrf.mxu1  ;;  %v7849_v11 = vadd.f32 %v2893_v19, %v2589_v29  ;;  %v8593_v29 = vld [vmem:[#allocation4_spill] sm:$0xff] }
 0x39c   : > { %v2590_v52 = vadd.f32 %v2515_v25, %v7319_v57 }
 0x39d   : > { %2468 = vmatmul.bf16.gmra.mxu2 %v8591_v54  ;;  %2935 = vmatmul.bf16.gmra.mxu0 %v7847_v33 }
 0x39e   : > { %v7851_v5 = vadd.f32 %v2982_v40, %v2590_v52  ;;  %3024 = vmatmul.bf16.gmra.mxu1 %v7847_v33  ;;  %v8595_v52 = vld [vmem:[#allocation63_spill] sm:$0xff] }
 0x3a0   : > { %2557 = vmatmul.bf16.gmra.mxu3 %v8591_v54  ;;  %v2429_v7 = vpop.f32.mrf.mxu2 }
 0x3a1   : > { %v2591_v50 = vadd.f32 %v2429_v7, %v7327_v59 }
 0x3a2   : > { %v2898_v31 = vpop.f32.mrf.mxu0 }
 0x3a3   : > { %v2518_v57 = vpop.f32.mrf.mxu3  ;;  %v2987_v6 = vpop.f32.mrf.mxu1  ;;  %v7859_v19 = vadd.f32 %v2896_v21, %v2591_v50 }
 0x3a4   : > { %v2592_v44 = vadd.f32 %v2518_v57, %v7329_v24  ;;  %v8594_v24 = vld [vmem:[#allocation35_spill] sm:$0xff] }
 0x3a6   : > { %v7861_v37 = vadd.f32 %v2985_v48, %v2592_v44  ;;  %v8596_v48 = vld [vmem:[#allocation32_spill] sm:$0xff] }
 0x3a8   : > { %v2431_v40 = vpop.f32.mrf.mxu2 }
 0x3a9   : > { %v2593_v3 = vadd.f32 %v2431_v40, %v7336_v12 }
 0x3aa   : > { %v2901_v16 = vpop.f32.mrf.mxu0 }
 0x3ab   : > { %v2520_v4 = vpop.f32.mrf.mxu3  ;;  %v2990_v27 = vpop.f32.mrf.mxu1  ;;  %v7865_v47 = vadd.f32 %v2898_v31, %v2593_v3  ;;  %v8599_v31 = vld [vmem:[#allocation64_spill] sm:$0xff]  ;;  %v8600_v3 = vld [vmem:[#allocation33_spill] sm:$0xff] }
 0x3ac   : > { %v2594_v15 = vadd.f32 %v2520_v4, %v7338_v36 }
 0x3ad   : > { %3206 = vmatmul.bf16.vlgmr.msra.gmra.mxu2 %v8593_v29  ;;  %3552 = vmatmul.bf16.vlgmr.msra.gmra.mxu0 %v8594_v24 }
 0x3ae   : > { %v7867_v59 = vadd.f32 %v2987_v6, %v2594_v15  ;;  %3641 = vmatmul.bf16.vlgmr.msra.gmra.mxu1 %v8594_v24 }
 0x3b0   : > { %8592 = vst [vmem:[#allocation50_spill] sm:$0xff] %v7867_v59  ;;  %3295 = vmatmul.bf16.vlgmr.msra.gmra.mxu3 %v8593_v29  ;;  %v2434_v25 = vpop.f32.mrf.mxu2 }
 0x3b1   : > { %v2595_v12 = vadd.f32 %v2434_v25, %v8595_v52  ;;  %v8603_v52 = vld [vmem:[#allocation38_spill] sm:$0xff] }
 0x3b2   : > { %v2903_v54 = vpop.f32.mrf.mxu0 }
 0x3b3   : > { %v2523_v21 = vpop.f32.mrf.mxu3  ;;  %v2992_v7 = vpop.f32.mrf.mxu1  ;;  %v7875_v50 = vadd.f32 %v2901_v16, %v2595_v12 }
 0x3b4   : > { %v2596_v36 = vadd.f32 %v2523_v21, %v8596_v48  ;;  %v8605_v48 = vld [vmem:[#allocation37_spill] sm:$0xff] }
 0x3b5   : > { %8597 = vst [vmem:[#allocation75_spill] sm:$0xff] %v7875_v50 }
 0x3b6   : > { %v7877_v57 = vadd.f32 %v2990_v27, %v2596_v36  ;;  %v8604_v27 = vld [vmem:[#allocation34_spill] sm:$0xff] }
 0x3b8   : > { %8598 = vst [vmem:[#allocation53_spill] sm:$0xff] %v7877_v57  ;;  %v2436_v44 = vpop.f32.mrf.mxu2 }
 0x3b9   : > { %v2597_v6 = vadd.f32 %v2436_v44, %v8599_v31 }
 0x3ba   : > { %v2906_v15 = vpop.f32.mrf.mxu0 }
 0x3bb   : > { %v2525_v40 = vpop.f32.mrf.mxu3  ;;  %v2995_v29 = vpop.f32.mrf.mxu1  ;;  %v7881_v59 = vadd.f32 %v2903_v54, %v2597_v6 }
 0x3bc   : > { %v2598_v4 = vadd.f32 %v2525_v40, %v8600_v3  ;;  %v8608_v40 = vld [vmem:[#allocation36_spill] sm:$0xff] }
 0x3bd   : > { %8601 = vst [vmem:[#allocation51_spill] sm:$0xff] %v7881_v59  ;;  %3211 = vmatmul.bf16.gmra.mxu2 %v8594_v24  ;;  %3557 = vmatmul.bf16.gmra.mxu0 %v8603_v52 }
 0x3be   : > { %v7883_v25 = vadd.f32 %v2992_v7, %v2598_v4  ;;  %3646 = vmatmul.bf16.gmra.mxu1 %v8603_v52 }
 0x3c0   : > { %8602 = vst [vmem:[#allocation52_spill] sm:$0xff] %v7883_v25  ;;  %3300 = vmatmul.bf16.gmra.mxu3 %v8594_v24  ;;  %v2439_v16 = vpop.f32.mrf.mxu2  ;;  %v8609_v25 = vld [vmem:[#allocation66_spill] sm:$0xff] }
 0x3c1   : > { %v2599_v12 = vadd.f32 %v2439_v16, %v8604_v27  ;;  %v8612_v27 = vld [vmem:[#allocation40_spill] sm:$0xff] }
 0x3c2   : > { %v2908_v44 = vpop.f32.mrf.mxu0 }
 0x3c3   : > { %v2528_v21 = vpop.f32.mrf.mxu3  ;;  %v2997_v31 = vpop.f32.mrf.mxu1  ;;  %v7891_v54 = vadd.f32 %v2906_v15, %v2599_v12 }
 0x3c4   : > { %v2600_v36 = vadd.f32 %v2528_v21, %v8605_v48  ;;  %v8614_v48 = vld [vmem:[#allocation67_spill] sm:$0xff] }
 0x3c5   : > { %8606 = vst [vmem:[#allocation22_spill] sm:$0xff] %v7891_v54 }
 0x3c6   : > { %v7893_v7 = vadd.f32 %v2995_v29, %v2600_v36  ;;  %v8613_v29 = vld [vmem:[#allocation7_spill] sm:$0xff] }
 0x3c8   : > { %8607 = vst [vmem:[#allocation23_spill] sm:$0xff] %v7893_v7  ;;  %v2441_v6 = vpop.f32.mrf.mxu2 }
 0x3c9   : > { %v2601_v3 = vadd.f32 %v2441_v6, %v8608_v40 }
 0x3ca   : > { %v2911_v59 = vpop.f32.mrf.mxu0 }
 0x3cb   : > { %v2530_v4 = vpop.f32.mrf.mxu3  ;;  %v3000_v57 = vpop.f32.mrf.mxu1  ;;  %v7897_v50 = vadd.f32 %v2908_v44, %v2601_v3  ;;  %v8617_v3 = vld [vmem:[#allocation69_spill] sm:$0xff] }
 0x3cc   : > { %v2602_v24 = vadd.f32 %v2530_v4, %v8609_v25 }
 0x3cd   : > { %8610 = vst [vmem:[#allocation74_spill] sm:$0xff] %v7897_v50  ;;  %3216 = vmatmul.bf16.gmra.mxu2 %v8603_v52  ;;  %3562 = vmatmul.bf16.gmra.mxu0 %v8612_v27 }
 0x3ce   : > { %v7899_v16 = vadd.f32 %v2997_v31, %v2602_v24  ;;  %3651 = vmatmul.bf16.gmra.mxu1 %v8612_v27 }
 0x3d0   : > { %8611 = vst [vmem:[#allocation54_spill] sm:$0xff] %v7899_v16  ;;  %3305 = vmatmul.bf16.gmra.mxu3 %v8603_v52  ;;  %v2444_v15 = vpop.f32.mrf.mxu2  ;;  %v8618_v16 = vld [vmem:[#allocation41_spill] sm:$0xff] }
 0x3d1   : > { %v2603_v12 = vadd.f32 %v2444_v15, %v8613_v29  ;;  %v8621_v29 = vld [vmem:[#allocation45_spill] sm:$0xff] }
 0x3d2   : > { %v2913_v36 = vpop.f32.mrf.mxu0 }
 0x3d3   : > { %v2533_v21 = vpop.f32.mrf.mxu3  ;;  %v3002_v6 = vpop.f32.mrf.mxu1  ;;  %v7907_v44 = vadd.f32 %v2911_v59, %v2603_v12 }
 0x3d4   : > { %v2604_v25 = vadd.f32 %v2533_v21, %v8614_v48  ;;  %v8623_v48 = vld [vmem:[#allocation10_spill] sm:$0xff] }
 0x3d5   : > { %8615 = vst [vmem:[#allocation77_spill] sm:$0xff] %v7907_v44 }
 0x3d6   : > { %v7909_v31 = vadd.f32 %v3000_v57, %v2604_v25  ;;  %v8622_v57 = vld [vmem:[#allocation39_spill] sm:$0xff] }
 0x3d8   : > { %8616 = vst [vmem:[#allocation55_spill] sm:$0xff] %v7909_v31  ;;  %v2446_v40 = vpop.f32.mrf.mxu2 }
 0x3d9   : > { %v2605_v4 = vadd.f32 %v2446_v40, %v8617_v3 }
 0x3da   : > { %v2916_v50 = vpop.f32.mrf.mxu0 }
 0x3db   : > { %v2535_v24 = vpop.f32.mrf.mxu3  ;;  %v3005_v7 = vpop.f32.mrf.mxu1  ;;  %v7913_v54 = vadd.f32 %v2913_v36, %v2605_v4  ;;  %v8625_v4 = vld [vmem:[#allocation11_spill] sm:$0xff] }
 0x3dc   : > { %v2606_v52 = vadd.f32 %v2535_v24, %v8618_v16 }
 0x3dd   : > { %8619 = vst [vmem:[#allocation26_spill] sm:$0xff] %v7913_v54  ;;  %3221 = vmatmul.bf16.gmra.mxu2 %v8612_v27  ;;  %3567 = vmatmul.bf16.gmra.mxu0 %v8621_v29 }
 0x3de   : > { %v7915_v15 = vadd.f32 %v3002_v6, %v2606_v52  ;;  %3656 = vmatmul.bf16.gmra.mxu1 %v8621_v29 }
 0x3e0   : > { %8620 = vst [vmem:[#allocation56_spill] sm:$0xff] %v7915_v15  ;;  %3310 = vmatmul.bf16.gmra.mxu3 %v8612_v27  ;;  %v2449_v59 = vpop.f32.mrf.mxu2  ;;  %v8626_v15 = vld [vmem:[#allocation68_spill] sm:$0xff] }
 0x3e1   : > { %v2607_v12 = vadd.f32 %v2449_v59, %v8622_v57 }
 0x3e2   : > { %v2918_v25 = vpop.f32.mrf.mxu0 }
 0x3e3   : > { %v2538_v21 = vpop.f32.mrf.mxu3  ;;  %v3007_v40 = vpop.f32.mrf.mxu1  ;;  %v7923_v36 = vadd.f32 %v2916_v50, %v2607_v12 }
 0x3e4   : > { %v2608_v16 = vadd.f32 %v2538_v21, %v8623_v48  ;;  %v8630_v21 = vld [vmem:[#allocation71_spill] sm:$0xff] }
 0x3e6   : > { %v7925_v6 = vadd.f32 %v3005_v7, %v2608_v16  ;;  %v8629_v7 = vld [vmem:[#allocation42_spill] sm:$0xff] }
 0x3e8   : > { %8624 = vst [vmem:[#allocation27_spill] sm:$0xff] %v7925_v6  ;;  %v2451_v3 = vpop.f32.mrf.mxu2 }
 0x3e9   : > { %v2609_v24 = vadd.f32 %v2451_v3, %v8625_v4  ;;  %v8632_v4 = vld [vmem:[#allocation43_spill] sm:$0xff] }
 0x3ea   : > { %v2921_v54 = vpop.f32.mrf.mxu0 }
 0x3eb   : > { %v2540_v52 = vpop.f32.mrf.mxu3  ;;  %v3010_v31 = vpop.f32.mrf.mxu1  ;;  %v7929_v44 = vadd.f32 %v2918_v25, %v2609_v24 }
 0x3ec   : > { %v2610_v27 = vadd.f32 %v2540_v52, %v8626_v15 }
 0x3ed   : > { %8627 = vst [vmem:[#allocation76_spill] sm:$0xff] %v7929_v44  ;;  %3226 = vmatmul.bf16.gmra.mxu2 %v8621_v29  ;;  %3572 = vmatmul.bf16.gmra.mxu0 %v7544_v49 }
 0x3ee   : > { %v7931_v59 = vadd.f32 %v3007_v40, %v2610_v27  ;;  %3661 = vmatmul.bf16.gmra.mxu1 %v7544_v49  ;;  %v8633_v27 = vld [vmem:[#allocation44_spill] sm:$0xff] }
 0x3f0   : > { %8628 = vst [vmem:[#allocation57_spill] sm:$0xff] %v7931_v59  ;;  %3315 = vmatmul.bf16.gmra.mxu3 %v8621_v29  ;;  %v2454_v50 = vpop.f32.mrf.mxu2 }
 0x3f1   : > { %v2611_v57 = vadd.f32 %v2454_v50, %v8629_v7 }
 0x3f2   : > { %v2923_v48 = vpop.f32.mrf.mxu0 }
 0x3f3   : > { %v2543_v12 = vpop.f32.mrf.mxu3  ;;  %v3012_v16 = vpop.f32.mrf.mxu1  ;;  %v7939_v25 = vadd.f32 %v2921_v54, %v2611_v57 }
 0x3f4   : > { %v2612_v15 = vadd.f32 %v2543_v12, %v8630_v21  ;;  %v8637_v12 = vld [vmem:[#allocation15_spill] sm:$0xff] }
 0x3f6   : > { %v7941_v40 = vadd.f32 %v3010_v31, %v2612_v15  ;;  %v8636_v31 = vld [vmem:[#allocation14_spill] sm:$0xff] }
 0x3f8   : > { %8631 = vst [vmem:[#allocation58_spill] sm:$0xff] %v7941_v40  ;;  %v2456_v3 = vpop.f32.mrf.mxu2 }
 0x3f9   : > { %v2613_v24 = vadd.f32 %v2456_v3, %v8632_v4 }
 0x3fa   : > { %v2926_v59 = vpop.f32.mrf.mxu0 }
 0x3fb   : > { %v2545_v52 = vpop.f32.mrf.mxu3  ;;  %v3015_v44 = vpop.f32.mrf.mxu1  ;;  %v7945_v6 = vadd.f32 %v2923_v48, %v2613_v24  ;;  %v8638_v24 = vld [vmem:[#allocation70_spill] sm:$0xff] }
 0x3fc   : > { %v2614_v29 = vadd.f32 %v2545_v52, %v8633_v27 }
 0x3fd   : > { %8634 = vst [vmem:[#allocation30_spill] sm:$0xff] %v7945_v6  ;;  %3231 = vmatmul.bf16.gmra.mxu2 %v7544_v49  ;;  %3577 = vmatmul.bf16.gmra.mxu0 %v7591_v34 }
 0x3fe   : > { %v7947_v50 = vadd.f32 %v3012_v16, %v2614_v29  ;;  %3666 = vmatmul.bf16.gmra.mxu1 %v7591_v34  ;;  %v8639_v29 = vld [vmem:[#allocation46_spill] sm:$0xff] }
 0x400   : > { %8635 = vst [vmem:[#allocation31_spill] sm:$0xff] %v7947_v50  ;;  %3320 = vmatmul.bf16.gmra.mxu3 %v7544_v49  ;;  %v2459_v54 = vpop.f32.mrf.mxu2 }
 0x401   : > { %v2615_v7 = vadd.f32 %v2459_v54, %v8636_v31 }
 0x402   : > { %v2928_v15 = vpop.f32.mrf.mxu0 }
 0x403   : > { %v2548_v57 = vpop.f32.mrf.mxu3  ;;  %v3017_v3 = vpop.f32.mrf.mxu1  ;;  %v7955_v48 = vadd.f32 %v2926_v59, %v2615_v7  ;;  %v8640_v59 = vld [vmem:[#allocation73_spill] sm:$0xff] }
 0x404   : > { %v2616_v21 = vadd.f32 %v2548_v57, %v8637_v12 }
 0x406   : > { %v7957_v16 = vadd.f32 %v3015_v44, %v2616_v21 }
 0x408   : > { %v2461_v4 = vpop.f32.mrf.mxu2 }
 0x409   : > { %v2617_v52 = vadd.f32 %v2461_v4, %v8638_v24 }
 0x40a   : > { %v2931_v50 = vpop.f32.mrf.mxu0 }
 0x40b   : > { %v2550_v27 = vpop.f32.mrf.mxu3  ;;  %v3020_v6 = vpop.f32.mrf.mxu1  ;;  %v7961_v40 = vadd.f32 %v2928_v15, %v2617_v52 }
 0x40c   : > { %v2618_v49 = vadd.f32 %v2550_v27, %v8639_v29 }
 0x40d   : > { %3236 = vmatmul.bf16.gmra.mxu2 %v7591_v34  ;;  %3582 = vmatmul.bf16.gmra.mxu0 %v7614_v32 }
 0x40e   : > { %v7963_v54 = vadd.f32 %v3017_v3, %v2618_v49  ;;  %3671 = vmatmul.bf16.gmra.mxu1 %v7614_v32 }
 0x410   : > { %3325 = vmatmul.bf16.gmra.mxu3 %v7591_v34  ;;  %v2464_v44 = vpop.f32.mrf.mxu2 }
 0x411   : > { %v2619_v31 = vadd.f32 %v2464_v44, %v8640_v59 }
 0x412   : > { %v2933_v12 = vpop.f32.mrf.mxu0 }
 0x413   : > { %v2553_v7 = vpop.f32.mrf.mxu3  ;;  %v3022_v21 = vpop.f32.mrf.mxu1  ;;  %v7971_v15 = vadd.f32 %v2931_v50, %v2619_v31 }
 0x414   : > { %v2620_v57 = vadd.f32 %v2553_v7, %v7585_v53 }
 0x416   : > { %v7973_v3 = vadd.f32 %v3020_v6, %v2620_v57 }
 0x418   : > { %v2466_v4 = vpop.f32.mrf.mxu2 }
 0x419   : > { %v2621_v24 = vadd.f32 %v2466_v4, %v7593_v9 }
 0x41a   : > { %v2936_v27 = vpop.f32.mrf.mxu0 }
 0x41b   : > { %v2555_v52 = vpop.f32.mrf.mxu3  ;;  %v3025_v29 = vpop.f32.mrf.mxu1  ;;  %v7977_v49 = vadd.f32 %v2933_v12, %v2621_v24 }
 0x41c   : > { %v2622_v34 = vadd.f32 %v2555_v52, %v7595_v8 }
 0x41d   : > { %3241 = vmatmul.bf16.gmra.mxu2 %v7614_v32  ;;  %3587 = vmatmul.bf16.gmra.mxu0 %v7661_v20 }
 0x41e   : > { %v7979_v44 = vadd.f32 %v3022_v21, %v2622_v34  ;;  %3676 = vmatmul.bf16.gmra.mxu1 %v7661_v20  ;;  %v8641_v21 = vld [vmem:[#allocation49_spill] sm:$0xff]  ;;  %v8642_v34 = vld [vmem:[#allocation47_spill] sm:$0xff] }
 0x420   : > { %3330 = vmatmul.bf16.gmra.mxu3 %v7614_v32  ;;  %v2469_v53 = vpop.f32.mrf.mxu2 }
 0x421   : > { %v2623_v9 = vadd.f32 %v2469_v53, %v7606_v10 }
 0x422   : > { %v2938_v50 = vpop.f32.mrf.mxu0 }
 0x423   : > { %v2558_v6 = vpop.f32.mrf.mxu3  ;;  %v3027_v59 = vpop.f32.mrf.mxu1  ;;  %v7987_v31 = vadd.f32 %v2936_v27, %v2623_v9 }
 0x424   : > { %v2624_v8 = vadd.f32 %v2558_v6, %v7608_v51 }
 0x426   : > { %v7990_v7 = vadd.f32 %v3025_v29, %v2624_v8 }
 0x428   : > { %v2471_v57 = vpop.f32.mrf.mxu2 }
 0x429   : > { %v2625_v12 = vadd.f32 %v2471_v57, %v7616_v46 }
 0x42a   : > { %v3553_v24 = vpop.f32.mrf.mxu0 }
 0x42b   : > { %v2560_v32 = vpop.f32.mrf.mxu3  ;;  %v3642_v52 = vpop.f32.mrf.mxu1  ;;  %v7994_v10 = vadd.f32 %v2938_v50, %v2625_v12 }
 0x42c   : > { %v2626_v4 = vadd.f32 %v2560_v32, %v8641_v21 }
 0x42d   : > { %3246 = vmatmul.bf16.gmra.mxu2 %v7661_v20  ;;  %3592 = vmatmul.bf16.gmra.mxu0 %v7684_v39 }
 0x42e   : > { %v7996_v51 = vadd.f32 %v3027_v59, %v2626_v4  ;;  %3681 = vmatmul.bf16.gmra.mxu1 %v7684_v39 }
 0x430   : > { %3335 = vmatmul.bf16.gmra.mxu3 %v7661_v20  ;;  %v3207_v46 = vpop.f32.mrf.mxu2 }
 0x431   : > { %v3376_v27 = vadd.f32 %v3207_v46, %v8642_v34 }
 0x432   : > { %v3555_v9 = vpop.f32.mrf.mxu0 }
 0x433   : > { %v3296_v29 = vpop.f32.mrf.mxu3  ;;  %v3722_v6 = vadd.f32 %v3553_v24, %v3376_v27  ;;  %v3644_v20 = vpop.f32.mrf.mxu1 }
 0x434   : > { %v3377_v53 = vadd.f32 %v3296_v29, %v7655_v30 }
 0x435   : > { %3786 = vst [vmem:[%s8006_s9] sm:$0xff] %v3722_v6  ;;  %v3938_v34 = vmul.f32 %v3722_v6, %v3722_v6 }
 0x436   : > { %v3723_v8 = vadd.f32 %v3642_v52, %v3377_v53 }
 0x438   : > { %3787 = vst [vmem:[%s8006_s9 + $0x8] sm:$0xff] %v3723_v8  ;;  %v3209_v50 = vpop.f32.mrf.mxu2  ;;  %v3939_v24 = vmul.f32 %v3723_v8, %v3723_v8 }
 0x439   : > { %v3378_v59 = vadd.f32 %v3209_v50, %v7663_v14 }
 0x43a   : > { %v3558_v32 = vpop.f32.mrf.mxu0 }
 0x43b   : > { %v3298_v57 = vpop.f32.mrf.mxu3  ;;  %v3724_v21 = vadd.f32 %v3555_v9, %v3378_v59  ;;  %v3647_v4 = vpop.f32.mrf.mxu1 }
 0x43c   : > { %v3379_v12 = vadd.f32 %v3298_v57, %v7665_v42 }
 0x43d   : > { %3788 = vst [vmem:[%s8006_s9 + $0x10] sm:$0xff] %v3724_v21  ;;  %v3852_v30 = vadd.f32 %v3724_v21, %v3722_v6  ;;  %v3940_v29 = vmul.f32 %v3724_v21, %v3724_v21  ;;  %3251 = vmatmul.bf16.gmra.mxu2 %v7684_v39  ;;  %3597 = vmatmul.bf16.gmra.mxu0 %v7731_v55 }
 0x43e   : > { %v3725_v46 = vadd.f32 %v3644_v20, %v3379_v12  ;;  %3686 = vmatmul.bf16.gmra.mxu1 %v7731_v55 }
 0x43f   : > { %v4002_v42 = vadd.f32 %v3940_v29, %v3938_v34 }
 0x440   : > { %3789 = vst [vmem:[%s8006_s9 + $0x18] sm:$0xff] %v3725_v46  ;;  %v3889_v52 = vadd.f32 %v3725_v46, %v3723_v8  ;;  %v3941_v14 = vmul.f32 %v3725_v46, %v3725_v46  ;;  %3340 = vmatmul.bf16.gmra.mxu3 %v7684_v39  ;;  %v3212_v53 = vpop.f32.mrf.mxu2 }
 0x441   : > { %v3380_v9 = vadd.f32 %v3212_v53, %v7676_v22 }
 0x442   : > { %v4039_v27 = vadd.f32 %v3941_v14, %v3939_v24  ;;  %v3560_v50 = vpop.f32.mrf.mxu0 }
 0x443   : > { %v3301_v6 = vpop.f32.mrf.mxu3  ;;  %v3726_v59 = vadd.f32 %v3558_v32, %v3380_v9  ;;  %v3649_v57 = vpop.f32.mrf.mxu1 }
 0x444   : > { %v3381_v20 = vadd.f32 %v3301_v6, %v7678_v18 }
 0x445   : > { %3790 = vst [vmem:[%s8006_s9 + $0x20] sm:$0xff] %v3726_v59  ;;  %v3853_v8 = vadd.f32 %v3852_v30, %v3726_v59  ;;  %v3942_v21 = vmul.f32 %v3726_v59, %v3726_v59 }
 0x446   : > { %v3727_v12 = vadd.f32 %v3647_v4, %v3381_v20  ;;  %v8643_v20 = vld [vmem:[#allocation18_spill] sm:$0xff] }
 0x447   : > { %v4003_v34 = vadd.f32 %v4002_v42, %v3942_v21 }
 0x448   : > { %3791 = vst [vmem:[%s8006_s9 + $0x28] sm:$0xff] %v3727_v12  ;;  %v3890_v39 = vadd.f32 %v3889_v52, %v3727_v12  ;;  %v3943_v46 = vmul.f32 %v3727_v12, %v3727_v12  ;;  %v3214_v24 = vpop.f32.mrf.mxu2 }
 0x449   : > { %v3382_v22 = vadd.f32 %v3214_v24, %v7686_v62 }
 0x44a   : > { %v4040_v29 = vadd.f32 %v4039_v27, %v3943_v46  ;;  %v3563_v53 = vpop.f32.mrf.mxu0 }
 0x44b   : > { %v3303_v14 = vpop.f32.mrf.mxu3  ;;  %v3728_v32 = vadd.f32 %v3560_v50, %v3382_v22  ;;  %v3652_v9 = vpop.f32.mrf.mxu1 }
 0x44c   : > { %v3383_v18 = vadd.f32 %v3303_v14, %v7688_v26 }
 0x44d   : > { %3792 = vst [vmem:[%s8006_s9 + $0x30] sm:$0xff] %v3728_v32  ;;  %v3854_v6 = vadd.f32 %v3853_v8, %v3728_v32  ;;  %v3944_v30 = vmul.f32 %v3728_v32, %v3728_v32  ;;  %3256 = vmatmul.bf16.gmra.mxu2 %v7731_v55  ;;  %3602 = vmatmul.bf16.gmra.mxu0 %v7754_v2 }
 0x44e   : > { %v3729_v4 = vadd.f32 %v3649_v57, %v3383_v18  ;;  %3691 = vmatmul.bf16.gmra.mxu1 %v7754_v2 }
 0x44f   : > { %v4004_v62 = vadd.f32 %v4003_v34, %v3944_v30 }
 0x450   : > { %3793 = vst [vmem:[%s8006_s9 + $0x38] sm:$0xff] %v3729_v4  ;;  %v3891_v52 = vadd.f32 %v3890_v39, %v3729_v4  ;;  %v3945_v42 = vmul.f32 %v3729_v4, %v3729_v4  ;;  %3345 = vmatmul.bf16.gmra.mxu3 %v7731_v55  ;;  %v3217_v27 = vpop.f32.mrf.mxu2  ;;  %v8644_v4 = vld [vmem:[#allocation48_spill] sm:$0xff] }
 0x451   : > { %v3384_v50 = vadd.f32 %v3217_v27, %v8643_v20 }
 0x452   : > { %v4041_v26 = vadd.f32 %v4040_v29, %v3945_v42  ;;  %v3565_v12 = vpop.f32.mrf.mxu0 }
 0x453   : > { %v3306_v59 = vpop.f32.mrf.mxu3  ;;  %v3730_v8 = vadd.f32 %v3563_v53, %v3384_v50  ;;  %v3654_v21 = vpop.f32.mrf.mxu1 }
 0x454   : > { %v3385_v57 = vadd.f32 %v3306_v59, %v7725_v56 }
 0x455   : > { %3794 = vst [vmem:[%s8006_s9 + $0x40] sm:$0xff] %v3730_v8  ;;  %v3855_v39 = vadd.f32 %v3854_v6, %v3730_v8  ;;  %v3946_v24 = vmul.f32 %v3730_v8, %v3730_v8 }
 0x456   : > { %v3731_v46 = vadd.f32 %v3652_v9, %v3385_v57 }
 0x457   : > { %v4005_v34 = vadd.f32 %v4004_v62, %v3946_v24 }
 0x458   : > { %3795 = vst [vmem:[%s8006_s9 + $0x48] sm:$0xff] %v3731_v46  ;;  %v3892_v55 = vadd.f32 %v3891_v52, %v3731_v46  ;;  %v3947_v22 = vmul.f32 %v3731_v46, %v3731_v46  ;;  %v3219_v14 = vpop.f32.mrf.mxu2 }
 0x459   : > { %v3386_v18 = vadd.f32 %v3219_v14, %v7733_v60 }
 0x45a   : > { %v4042_v29 = vadd.f32 %v4041_v26, %v3947_v22  ;;  %v3568_v30 = vpop.f32.mrf.mxu0 }
 0x45b   : > { %v3308_v32 = vpop.f32.mrf.mxu3  ;;  %v3732_v53 = vadd.f32 %v3565_v12, %v3386_v18  ;;  %v3657_v42 = vpop.f32.mrf.mxu1  ;;  %v8645_v18 = vld [vmem:[#allocation19_spill] sm:$0xff] }
 0x45c   : > { %v3387_v56 = vadd.f32 %v3308_v32, %v8644_v4 }
 0x45d   : > { %3796 = vst [vmem:[%s8006_s9 + $0x50] sm:$0xff] %v3732_v53  ;;  %v3856_v27 = vadd.f32 %v3855_v39, %v3732_v53  ;;  %v3948_v6 = vmul.f32 %v3732_v53, %v3732_v53  ;;  %3261 = vmatmul.bf16.gmra.mxu2 %v7754_v2  ;;  %3607 = vmatmul.bf16.gmra.mxu0 %v7801_v45 }
 0x45e   : > { %v3733_v9 = vadd.f32 %v3654_v21, %v3387_v56  ;;  %3696 = vmatmul.bf16.gmra.mxu1 %v7801_v45 }
 0x45f   : > { %v4006_v60 = vadd.f32 %v4005_v34, %v3948_v6 }
 0x460   : > { %3797 = vst [vmem:[%s8006_s9 + $0x58] sm:$0xff] %v3733_v9  ;;  %v3893_v52 = vadd.f32 %v3892_v55, %v3733_v9  ;;  %v3949_v62 = vmul.f32 %v3733_v9, %v3733_v9  ;;  %3350 = vmatmul.bf16.gmra.mxu3 %v7754_v2  ;;  %v3222_v20 = vpop.f32.mrf.mxu2 }
 0x461   : > { %v3388_v50 = vadd.f32 %v3222_v20, %v7746_v23 }
 0x462   : > { %v4043_v26 = vadd.f32 %v4042_v29, %v3949_v62  ;;  %v3570_v12 = vpop.f32.mrf.mxu0  ;;  %v8646_v62 = vld [vmem:[#allocation72_spill] sm:$0xff] }
 0x463   : > { %v3311_v59 = vpop.f32.mrf.mxu3  ;;  %v3734_v8 = vadd.f32 %v3568_v30, %v3388_v50  ;;  %v3659_v21 = vpop.f32.mrf.mxu1 }
 0x464   : > { %v3389_v57 = vadd.f32 %v3311_v59, %v7748_v28 }
 0x465   : > { %3798 = vst [vmem:[%s8006_s9 + $0x60] sm:$0xff] %v3734_v8  ;;  %v3857_v39 = vadd.f32 %v3856_v27, %v3734_v8  ;;  %v3950_v24 = vmul.f32 %v3734_v8, %v3734_v8 }
 0x466   : > { %v3735_v46 = vadd.f32 %v3657_v42, %v3389_v57 }
 0x467   : > { %v4007_v22 = vadd.f32 %v4006_v60, %v3950_v24 }
 0x468   : > { %3799 = vst [vmem:[%s8006_s9 + $0x68] sm:$0xff] %v3735_v46  ;;  %v3894_v2 = vadd.f32 %v3893_v52, %v3735_v46  ;;  %v3951_v55 = vmul.f32 %v3735_v46, %v3735_v46  ;;  %v3224_v29 = vpop.f32.mrf.mxu2 }
 0x469   : > { %v3390_v23 = vadd.f32 %v3224_v29, %v7756_v0 }
 0x46a   : > { %v4044_v34 = vadd.f32 %v4043_v26, %v3951_v55  ;;  %v3573_v32 = vpop.f32.mrf.mxu0 }
 0x46b   : > { %v3313_v14 = vpop.f32.mrf.mxu3  ;;  %v3736_v4 = vadd.f32 %v3570_v12, %v3390_v23  ;;  %v3662_v56 = vpop.f32.mrf.mxu1 }
 0x46c   : > { %v3391_v28 = vadd.f32 %v3313_v14, %v8645_v18 }
 0x46d   : > { %3800 = vst [vmem:[%s8006_s9 + $0x70] sm:$0xff] %v3736_v4  ;;  %v3858_v53 = vadd.f32 %v3857_v39, %v3736_v4  ;;  %v3952_v42 = vmul.f32 %v3736_v4, %v3736_v4  ;;  %3266 = vmatmul.bf16.gmra.mxu2 %v7801_v45  ;;  %3612 = vmatmul.bf16.gmra.mxu0 %v7824_v63 }
 0x46e   : > { %v3737_v30 = vadd.f32 %v3659_v21, %v3391_v28  ;;  %3701 = vmatmul.bf16.gmra.mxu1 %v7824_v63 }
 0x46f   : > { %v4008_v0 = vadd.f32 %v4007_v22, %v3952_v42 }
 0x470   : > { %3801 = vst [vmem:[%s8006_s9 + $0x78] sm:$0xff] %v3737_v30  ;;  %v3895_v9 = vadd.f32 %v3894_v2, %v3737_v30  ;;  %v3953_v27 = vmul.f32 %v3737_v30, %v3737_v30  ;;  %3355 = vmatmul.bf16.gmra.mxu3 %v7801_v45  ;;  %v3227_v52 = vpop.f32.mrf.mxu2 }
 0x471   : > { %v3392_v60 = vadd.f32 %v3227_v52, %v8646_v62  ;;  %v8648_v62 = vld [vmem:[#allocation29_spill] sm:$0xff] }
 0x472   : > { %v4045_v6 = vadd.f32 %v4044_v34, %v3953_v27  ;;  %v3575_v50 = vpop.f32.mrf.mxu0  ;;  %v8647_v27 = vld [vmem:[#allocation28_spill] sm:$0xff] }
 0x473   : > { %v3316_v26 = vpop.f32.mrf.mxu3  ;;  %v3738_v59 = vadd.f32 %v3573_v32, %v3392_v60  ;;  %v3664_v57 = vpop.f32.mrf.mxu1  ;;  %v3095_v60 = vrot.slane %v8648_v62, 2 }
 0x474   : > { %v3393_v20 = vadd.f32 %v3316_v26, %v7795_v17  ;;  %v8649_v26 = vld [vmem:[#allocation87_spill] sm:$0xff] }
 0x475   : > { %3802 = vst [vmem:[%s8006_s9 + $0x80] sm:$0xff] %v3738_v59  ;;  %v3859_v8 = vadd.f32 %v3858_v53, %v3738_v59  ;;  %v3954_v21 = vmul.f32 %v3738_v59, %v3738_v59 }
 0x476   : > { %v3739_v12 = vadd.f32 %v3662_v56, %v3393_v20 }
 0x477   : > { %v4009_v39 = vadd.f32 %v4008_v0, %v3954_v21  ;;  %v3094_v0 = vrot.slane %v8647_v27, 2 }
 0x478   : > { %3803 = vst [vmem:[%s8006_s9 + $0x88] sm:$0xff] %v3739_v12  ;;  %v3896_v45 = vadd.f32 %v3895_v9, %v3739_v12  ;;  %v3955_v46 = vmul.f32 %v3739_v12, %v3739_v12  ;;  %v3229_v2 = vpop.f32.mrf.mxu2 }
 0x479   : > { %v3394_v55 = vadd.f32 %v3229_v2, %v7803_v35 }
 0x47a   : > { %v4046_v24 = vadd.f32 %v4045_v6, %v3955_v46  ;;  %v3578_v34 = vpop.f32.mrf.mxu0 }
 0x47b   : > { %v3318_v22 = vpop.f32.mrf.mxu3  ;;  %v3740_v29 = vadd.f32 %v3575_v50, %v3394_v55  ;;  %v3667_v23 = vpop.f32.mrf.mxu1 }
 0x47c   : > { %v3395_v17 = vadd.f32 %v3318_v22, %v7805_v38 }
 0x47d   : > { %3804 = vst [vmem:[%s8006_s9 + $0x90] sm:$0xff] %v3740_v29  ;;  %v3860_v18 = vadd.f32 %v3859_v8, %v3740_v29  ;;  %v3956_v28 = vmul.f32 %v3740_v29, %v3740_v29  ;;  %3271 = vmatmul.bf16.gmra.mxu2 %v7824_v63  ;;  %3617 = vmatmul.bf16.gmra.mxu0 %v7847_v33 }
 0x47e   : > { %v3741_v14 = vadd.f32 %v3664_v57, %v3395_v17  ;;  %3706 = vmatmul.bf16.gmra.mxu1 %v7847_v33 }
 0x47f   : > { %v4010_v35 = vadd.f32 %v4009_v39, %v3956_v28 }
 0x480   : > { %3805 = vst [vmem:[%s8006_s9 + $0x98] sm:$0xff] %v3741_v14  ;;  %v3897_v32 = vadd.f32 %v3896_v45, %v3741_v14  ;;  %v3957_v4 = vmul.f32 %v3741_v14, %v3741_v14  ;;  %3360 = vmatmul.bf16.gmra.mxu3 %v7824_v63  ;;  %v3232_v56 = vpop.f32.mrf.mxu2  ;;  %v3097_v63 = vrot.slane %v8649_v26, 2 }
 0x481   : > { %v3396_v30 = vadd.f32 %v3232_v56, %v7816_v58 }
 0x482   : > { %v4047_v38 = vadd.f32 %v4046_v24, %v3957_v4  ;;  %v3580_v9 = vpop.f32.mrf.mxu0  ;;  %v3098_v8 = vsel %vm2627_vm5, %v3095_v60, %v3097_v63 }
 0x483   : > { %v3321_v53 = vpop.f32.mrf.mxu3  ;;  %v3742_v6 = vadd.f32 %v3578_v34, %v3396_v30  ;;  %v3669_v52 = vpop.f32.mrf.mxu1 }
 0x484   : > { %v3397_v42 = vadd.f32 %v3321_v53, %v7818_v41  ;;  %v3096_v41 = vsel %vm2627_vm5, %v3094_v0, %v3095_v60 }
 0x485   : > { %3806 = vst [vmem:[%s8006_s9 + $0xa0] sm:$0xff] %v3742_v6  ;;  %v3861_v50 = vadd.f32 %v3860_v18, %v3742_v6  ;;  %v3958_v59 = vmul.f32 %v3742_v6, %v3742_v6  ;;  %v3101_v55 = vpack.c.bf16 %v3098_v8, %v3096_v41 }
 0x486   : > { %v3743_v20 = vadd.f32 %v3667_v23, %v3397_v42 }
 0x487   : > { %v4011_v12 = vadd.f32 %v4010_v35, %v3958_v59 }
 0x488   : > { %3807 = vst [vmem:[%s8006_s9 + $0xa8] sm:$0xff] %v3743_v20  ;;  %v3898_v57 = vadd.f32 %v3897_v32, %v3743_v20  ;;  %v3959_v58 = vmul.f32 %v3743_v20, %v3743_v20  ;;  %v3234_v45 = vpop.f32.mrf.mxu2 }
 0x489   : > { %v3398_v46 = vadd.f32 %v3234_v45, %v7826_v61 }
 0x48a   : > { %v4048_v21 = vadd.f32 %v4047_v38, %v3959_v58  ;;  %v3583_v2 = vpop.f32.mrf.mxu0 }
 0x48b   : > { %v3323_v39 = vpop.f32.mrf.mxu3  ;;  %v3744_v22 = vadd.f32 %v3580_v9, %v3398_v46  ;;  %v3672_v17 = vpop.f32.mrf.mxu1 }
 0x48c   : > { %v3399_v24 = vadd.f32 %v3323_v39, %v7828_v13 }
 0x48d   : > { %3808 = vst [vmem:[%s8006_s9 + $0xb0] sm:$0xff] %v3744_v22  ;;  %v3862_v29 = vadd.f32 %v3861_v50, %v3744_v22  ;;  %v3960_v23 = vmul.f32 %v3744_v22, %v3744_v22  ;;  %3276 = vmatmul.bf16.gmra.mxu2 %v7847_v33  ;;  %3622 = vmatmul.bf16.gmra.mxu0 %v3101_v55 }
 0x48e   : > { %v3745_v34 = vadd.f32 %v3669_v52, %v3399_v24  ;;  %3711 = vmatmul.bf16.gmra.mxu1 %v3101_v55 }
 0x48f   : > { %v4012_v61 = vadd.f32 %v4011_v12, %v3960_v23 }
 0x490   : > { %3809 = vst [vmem:[%s8006_s9 + $0xb8] sm:$0xff] %v3745_v34  ;;  %v3899_v14 = vadd.f32 %v3898_v57, %v3745_v34  ;;  %v3961_v18 = vmul.f32 %v3745_v34, %v3745_v34  ;;  %3365 = vmatmul.bf16.gmra.mxu3 %v7847_v33  ;;  %v3237_v28 = vpop.f32.mrf.mxu2  ;;  %v8650_v57 = vld [vmem:[#allocation88_spill] sm:$0xff] }
 0x491   : > { %v3400_v32 = vadd.f32 %v3237_v28, %v7839_v1 }
 0x492   : > { %v4049_v13 = vadd.f32 %v4048_v21, %v3961_v18  ;;  %v3585_v38 = vpop.f32.mrf.mxu0 }
 0x493   : > { %v3326_v4 = vpop.f32.mrf.mxu3  ;;  %v3746_v56 = vadd.f32 %v3583_v2, %v3400_v32  ;;  %v3674_v30 = vpop.f32.mrf.mxu1 }
 0x494   : > { %v3401_v35 = vadd.f32 %v3326_v4, %v7841_v43 }
 0x495   : > { %3810 = vst [vmem:[%s8006_s9 + $0xc0] sm:$0xff] %v3746_v56  ;;  %v3863_v42 = vadd.f32 %v3862_v29, %v3746_v56  ;;  %v3962_v9 = vmul.f32 %v3746_v56, %v3746_v56 }
 0x496   : > { %v3747_v53 = vadd.f32 %v3672_v17, %v3401_v35 }
 0x497   : > { %v4013_v0 = vadd.f32 %v4012_v61, %v3962_v9  ;;  %v8651_v61 = vld [vmem:[#allocation50_spill] sm:$0xff] }
 0x498   : > { %3811 = vst [vmem:[%s8006_s9 + $0xc8] sm:$0xff] %v3747_v53  ;;  %v3900_v27 = vadd.f32 %v3899_v14, %v3747_v53  ;;  %v3963_v33 = vmul.f32 %v3747_v53, %v3747_v53  ;;  %v3239_v52 = vpop.f32.mrf.mxu2 }
 0x499   : > { %v3402_v1 = vadd.f32 %v3239_v52, %v7849_v11 }
 0x49a   : > { %v4050_v6 = vadd.f32 %v4049_v13, %v3963_v33  ;;  %v3588_v60 = vpop.f32.mrf.mxu0 }
 0x49b   : > { %v3328_v62 = vpop.f32.mrf.mxu3  ;;  %v3748_v26 = vadd.f32 %v3585_v38, %v3402_v1  ;;  %v3677_v63 = vpop.f32.mrf.mxu1 }
 0x49c   : > { %v3403_v43 = vadd.f32 %v3328_v62, %v7851_v5 }
 0x49d   : > { %3812 = vst [vmem:[%s8006_s9 + $0xd0] sm:$0xff] %v3748_v26  ;;  %v3864_v50 = vadd.f32 %v3863_v42, %v3748_v26  ;;  %v3964_v59 = vmul.f32 %v3748_v26, %v3748_v26  ;;  %3281 = vmatmul.bf16.gmra.mxu2 %v3101_v55  ;;  %3627 = vmatmul.bf16.gmra.mxu0 %v8650_v57 }
 0x49e   : > { %v3749_v20 = vadd.f32 %v3674_v30, %v3403_v43  ;;  %3716 = vmatmul.bf16.gmra.mxu1 %v8650_v57 }
 0x49f   : > { %v4014_v11 = vadd.f32 %v4013_v0, %v3964_v59  ;;  %v8653_v0 = vld [vmem:[#allocation53_spill] sm:$0xff] }
 0x4a0   : > { %3813 = vst [vmem:[%s8006_s9 + $0xd8] sm:$0xff] %v3749_v20  ;;  %v3901_v58 = vadd.f32 %v3900_v27, %v3749_v20  ;;  %v3965_v12 = vmul.f32 %v3749_v20, %v3749_v20  ;;  %3370 = vmatmul.bf16.gmra.mxu3 %v3101_v55  ;;  %v3242_v41 = vpop.f32.mrf.mxu2  ;;  %v8652_v27 = vld [vmem:[#allocation75_spill] sm:$0xff] }
 0x4a1   : > { %v3404_v8 = vadd.f32 %v3242_v41, %v7859_v19 }
 0x4a2   : > { %v4051_v5 = vadd.f32 %v4050_v6, %v3965_v12  ;;  %v3590_v46 = vpop.f32.mrf.mxu0 }
 0x4a3   : > { %v3331_v21 = vpop.f32.mrf.mxu3  ;;  %v3750_v39 = vadd.f32 %v3588_v60, %v3404_v8  ;;  %v3679_v24 = vpop.f32.mrf.mxu1 }
 0x4a4   : > { %v3405_v45 = vadd.f32 %v3331_v21, %v7861_v37 }
 0x4a5   : > { %3814 = vst [vmem:[%s8006_s9 + $0xe0] sm:$0xff] %v3750_v39  ;;  %v3865_v22 = vadd.f32 %v3864_v50, %v3750_v39  ;;  %v3966_v17 = vmul.f32 %v3750_v39, %v3750_v39 }
 0x4a6   : > { %v3751_v2 = vadd.f32 %v3677_v63, %v3405_v45 }
 0x4a7   : > { %v4015_v29 = vadd.f32 %v4014_v11, %v3966_v17 }
 0x4a8   : > { %3815 = vst [vmem:[%s8006_s9 + $0xe8] sm:$0xff] %v3751_v2  ;;  %v3902_v55 = vadd.f32 %v3901_v58, %v3751_v2  ;;  %v3967_v34 = vmul.f32 %v3751_v2, %v3751_v2  ;;  %v3244_v14 = vpop.f32.mrf.mxu2  ;;  %v8654_v58 = vld [vmem:[#allocation51_spill] sm:$0xff] }
 0x4a9   : > { %v3406_v19 = vadd.f32 %v3244_v14, %v7865_v47 }
 0x4aa   : > { %v4052_v23 = vadd.f32 %v4051_v5, %v3967_v34  ;;  %v3593_v13 = vpop.f32.mrf.mxu0  ;;  %v8655_v5 = vld [vmem:[#allocation52_spill] sm:$0xff] }
 0x4ab   : > { %v3333_v18 = vpop.f32.mrf.mxu3  ;;  %v3752_v28 = vadd.f32 %v3590_v46, %v3406_v19  ;;  %v3682_v32 = vpop.f32.mrf.mxu1  ;;  %v8657_v19 = vld [vmem:[#allocation23_spill] sm:$0xff] }
 0x4ac   : > { %v3407_v37 = vadd.f32 %v3333_v18, %v8651_v61 }
 0x4ad   : > { %3816 = vst [vmem:[%s8006_s9 + $0xf0] sm:$0xff] %v3752_v28  ;;  %v3866_v35 = vadd.f32 %v3865_v22, %v3752_v28  ;;  %v3968_v38 = vmul.f32 %v3752_v28, %v3752_v28 }
 0x4ae   : > { %v3753_v4 = vadd.f32 %v3679_v24, %v3407_v37 }
 0x4af   : > { %v4016_v53 = vadd.f32 %v4015_v29, %v3968_v38  ;;  %v8656_v29 = vld [vmem:[#allocation22_spill] sm:$0xff] }
 0x4b0   : > { %3817 = vst [vmem:[%s8006_s9 + $0xf8] sm:$0xff] %v3753_v4  ;;  %v3903_v56 = vadd.f32 %v3902_v55, %v3753_v4  ;;  %v3969_v30 = vmul.f32 %v3753_v4, %v3753_v4  ;;  %v3247_v9 = vpop.f32.mrf.mxu2 }
 0x4b1   : > { %v3408_v47 = vadd.f32 %v3247_v9, %v8652_v27 }
 0x4b2   : > { %v4053_v42 = vadd.f32 %v4052_v23, %v3969_v30  ;;  %v3595_v52 = vpop.f32.mrf.mxu0 }
 0x4b3   : > { %v3336_v33 = vpop.f32.mrf.mxu3  ;;  %v3754_v1 = vadd.f32 %v3593_v13, %v3408_v47  ;;  %v3684_v62 = vpop.f32.mrf.mxu1  ;;  %v8659_v47 = vld [vmem:[#allocation54_spill] sm:$0xff] }
 0x4b4   : > { %v3409_v6 = vadd.f32 %v3336_v33, %v8653_v0 }
 0x4b5   : > { %3818 = vst [vmem:[%s8006_s9 + $0x100] sm:$0xff] %v3754_v1  ;;  %v3867_v60 = vadd.f32 %v3866_v35, %v3754_v1  ;;  %v3970_v26 = vmul.f32 %v3754_v1, %v3754_v1 }
 0x4b6   : > { %v3755_v43 = vadd.f32 %v3682_v32, %v3409_v6 }
 0x4b7   : > { %v4017_v50 = vadd.f32 %v4016_v53, %v3970_v26 }
 0x4b8   : > { %3819 = vst [vmem:[%s8006_s9 + $0x108] sm:$0xff] %v3755_v43  ;;  %v3904_v63 = vadd.f32 %v3903_v56, %v3755_v43  ;;  %v3971_v20 = vmul.f32 %v3755_v43, %v3755_v43  ;;  %v3249_v57 = vpop.f32.mrf.mxu2 }
 0x4b9   : > { %v3410_v12 = vadd.f32 %v3249_v57, %v8654_v58 }
 0x4ba   : > { %v4054_v59 = vadd.f32 %v4053_v42, %v3971_v20  ;;  %v3598_v8 = vpop.f32.mrf.mxu0  ;;  %v8658_v42 = vld [vmem:[#allocation74_spill] sm:$0xff] }
 0x4bb   : > { %v3338_v11 = vpop.f32.mrf.mxu3  ;;  %v3756_v21 = vadd.f32 %v3595_v52, %v3410_v12  ;;  %v3687_v45 = vpop.f32.mrf.mxu1  ;;  %v8661_v12 = vld [vmem:[#allocation55_spill] sm:$0xff] }
 0x4bc   : > { %v3411_v41 = vadd.f32 %v3338_v11, %v8655_v5 }
 0x4bd   : > { %3820 = vst [vmem:[%s8006_s9 + $0x110] sm:$0xff] %v3756_v21  ;;  %v3868_v39 = vadd.f32 %v3867_v60, %v3756_v21  ;;  %v3972_v24 = vmul.f32 %v3756_v21, %v3756_v21 }
 0x4be   : > { %v3757_v46 = vadd.f32 %v3684_v62, %v3411_v41 }
 0x4bf   : > { %v4018_v17 = vadd.f32 %v4017_v50, %v3972_v24 }
 0x4c0   : > { %3821 = vst [vmem:[%s8006_s9 + $0x118] sm:$0xff] %v3757_v46  ;;  %v3905_v2 = vadd.f32 %v3904_v63, %v3757_v46  ;;  %v3973_v22 = vmul.f32 %v3757_v46, %v3757_v46  ;;  %v3252_v34 = vpop.f32.mrf.mxu2 }
 0x4c1   : > { %v3412_v23 = vadd.f32 %v3252_v34, %v8656_v29 }
 0x4c2   : > { %v4055_v55 = vadd.f32 %v4054_v59, %v3973_v22  ;;  %v3600_v61 = vpop.f32.mrf.mxu0  ;;  %v8660_v59 = vld [vmem:[#allocation77_spill] sm:$0xff] }
 0x4c3   : > { %v3341_v14 = vpop.f32.mrf.mxu3  ;;  %v3758_v37 = vadd.f32 %v3598_v8, %v3412_v23  ;;  %v3689_v13 = vpop.f32.mrf.mxu1  ;;  %v8663_v23 = vld [vmem:[#allocation56_spill] sm:$0xff] }
 0x4c4   : > { %v3413_v18 = vadd.f32 %v3341_v14, %v8657_v19 }
 0x4c5   : > { %3822 = vst [vmem:[%s8006_s9 + $0x120] sm:$0xff] %v3758_v37  ;;  %v3869_v32 = vadd.f32 %v3868_v39, %v3758_v37  ;;  %v3974_v4 = vmul.f32 %v3758_v37, %v3758_v37 }
 0x4c6   : > { %v3759_v28 = vadd.f32 %v3687_v45, %v3413_v18 }
 0x4c7   : > { %v4019_v56 = vadd.f32 %v4018_v17, %v3974_v4 }
 0x4c8   : > { %3823 = vst [vmem:[%s8006_s9 + $0x128] sm:$0xff] %v3759_v28  ;;  %v3906_v35 = vadd.f32 %v3905_v2, %v3759_v28  ;;  %v3975_v38 = vmul.f32 %v3759_v28, %v3759_v28  ;;  %v3254_v53 = vpop.f32.mrf.mxu2 }
 0x4c9   : > { %v3414_v9 = vadd.f32 %v3254_v53, %v8658_v42  ;;  %v8664_v42 = vld [vmem:[#allocation27_spill] sm:$0xff] }
 0x4ca   : > { %v4056_v30 = vadd.f32 %v4055_v55, %v3975_v38  ;;  %v3603_v0 = vpop.f32.mrf.mxu0  ;;  %v8662_v55 = vld [vmem:[#allocation26_spill] sm:$0xff] }
 0x4cb   : > { %v3343_v27 = vpop.f32.mrf.mxu3  ;;  %v3760_v6 = vadd.f32 %v3600_v61, %v3414_v9  ;;  %v3692_v52 = vpop.f32.mrf.mxu1 }
 0x4cc   : > { %v3415_v33 = vadd.f32 %v3343_v27, %v8659_v47 }
 0x4cd   : > { %3824 = vst [vmem:[%s8006_s9 + $0x130] sm:$0xff] %v3760_v6  ;;  %v3870_v62 = vadd.f32 %v3869_v32, %v3760_v6  ;;  %v3976_v43 = vmul.f32 %v3760_v6, %v3760_v6 }
 0x4ce   : > { %v3761_v1 = vadd.f32 %v3689_v13, %v3415_v33 }
 0x4cf   : > { %v4020_v63 = vadd.f32 %v4019_v56, %v3976_v43 }
 0x4d0   : > { %3825 = vst [vmem:[%s8006_s9 + $0x138] sm:$0xff] %v3761_v1  ;;  %v3907_v60 = vadd.f32 %v3906_v35, %v3761_v1  ;;  %v3977_v26 = vmul.f32 %v3761_v1, %v3761_v1  ;;  %v3257_v50 = vpop.f32.mrf.mxu2 }
 0x4d1   : > { %v3416_v57 = vadd.f32 %v3257_v50, %v8660_v59  ;;  %v8666_v50 = vld [vmem:[#allocation57_spill] sm:$0xff] }
 0x4d2   : > { %v4057_v20 = vadd.f32 %v4056_v30, %v3977_v26  ;;  %v3605_v5 = vpop.f32.mrf.mxu0 }
 0x4d3   : > { %v3346_v58 = vpop.f32.mrf.mxu3  ;;  %v3762_v41 = vadd.f32 %v3603_v0, %v3416_v57  ;;  %v3694_v8 = vpop.f32.mrf.mxu1 }
 0x4d4   : > { %v3417_v11 = vadd.f32 %v3346_v58, %v8661_v12 }
 0x4d5   : > { %3826 = vst [vmem:[%s8006_s9 + $0x140] sm:$0xff] %v3762_v41  ;;  %v3871_v45 = vadd.f32 %v3870_v62, %v3762_v41  ;;  %v3978_v46 = vmul.f32 %v3762_v41, %v3762_v41 }
 0x4d6   : > { %v3763_v21 = vadd.f32 %v3692_v52, %v3417_v11 }
 0x4d7   : > { %v4021_v2 = vadd.f32 %v4020_v63, %v3978_v46  ;;  %v8665_v63 = vld [vmem:[#allocation76_spill] sm:$0xff] }
 0x4d8   : > { %3827 = vst [vmem:[%s8006_s9 + $0x148] sm:$0xff] %v3763_v21  ;;  %v3908_v39 = vadd.f32 %v3907_v60, %v3763_v21  ;;  %v3979_v24 = vmul.f32 %v3763_v21, %v3763_v21  ;;  %v3259_v17 = vpop.f32.mrf.mxu2 }
 0x4d9   : > { %v3418_v34 = vadd.f32 %v3259_v17, %v8662_v55 }
 0x4da   : > { %v4058_v22 = vadd.f32 %v4057_v20, %v3979_v24  ;;  %v3608_v19 = vpop.f32.mrf.mxu0 }
 0x4db   : > { %v3348_v29 = vpop.f32.mrf.mxu3  ;;  %v3764_v18 = vadd.f32 %v3605_v5, %v3418_v34  ;;  %v3697_v61 = vpop.f32.mrf.mxu1 }
 0x4dc   : > { %v3419_v14 = vadd.f32 %v3348_v29, %v8663_v23 }
 0x4dd   : > { %3828 = vst [vmem:[%s8006_s9 + $0x150] sm:$0xff] %v3764_v18  ;;  %v3872_v13 = vadd.f32 %v3871_v45, %v3764_v18  ;;  %v3980_v28 = vmul.f32 %v3764_v18, %v3764_v18 }
 0x4de   : > { %v3765_v37 = vadd.f32 %v3694_v8, %v3419_v14 }
 0x4df   : > { %v4022_v35 = vadd.f32 %v4021_v2, %v3980_v28 }
 0x4e0   : > { %3829 = vst [vmem:[%s8006_s9 + $0x158] sm:$0xff] %v3765_v37  ;;  %v3909_v32 = vadd.f32 %v3908_v39, %v3765_v37  ;;  %v3981_v4 = vmul.f32 %v3765_v37, %v3765_v37  ;;  %v3262_v56 = vpop.f32.mrf.mxu2 }
 0x4e1   : > { %v3420_v30 = vadd.f32 %v3262_v56, %v7923_v36 }
 0x4e2   : > { %v4059_v38 = vadd.f32 %v4058_v22, %v3981_v4  ;;  %v3610_v27 = vpop.f32.mrf.mxu0  ;;  %v8667_v22 = vld [vmem:[#allocation58_spill] sm:$0xff] }
 0x4e3   : > { %v3351_v53 = vpop.f32.mrf.mxu3  ;;  %v3766_v47 = vadd.f32 %v3608_v19, %v3420_v30  ;;  %v3699_v33 = vpop.f32.mrf.mxu1 }
 0x4e4   : > { %v3421_v9 = vadd.f32 %v3351_v53, %v8664_v42 }
 0x4e5   : > { %3830 = vst [vmem:[%s8006_s9 + $0x160] sm:$0xff] %v3766_v47  ;;  %v3873_v6 = vadd.f32 %v3872_v13, %v3766_v47  ;;  %v3982_v52 = vmul.f32 %v3766_v47, %v3766_v47 }
 0x4e6   : > { %v3767_v0 = vadd.f32 %v3697_v61, %v3421_v9 }
 0x4e7   : > { %v4023_v43 = vadd.f32 %v4022_v35, %v3982_v52  ;;  %v8669_v35 = vld [vmem:[#allocation31_spill] sm:$0xff] }
 0x4e8   : > { %3831 = vst [vmem:[%s8006_s9 + $0x168] sm:$0xff] %v3767_v0  ;;  %v3910_v1 = vadd.f32 %v3909_v32, %v3767_v0  ;;  %v3983_v62 = vmul.f32 %v3767_v0, %v3767_v0  ;;  %v3264_v26 = vpop.f32.mrf.mxu2  ;;  %v8668_v32 = vld [vmem:[#allocation30_spill] sm:$0xff] }
 0x4e9   : > { %v3422_v36 = vadd.f32 %v3264_v26, %v8665_v63 }
 0x4ea   : > { %v4060_v60 = vadd.f32 %v4059_v38, %v3983_v62  ;;  %v3613_v57 = vpop.f32.mrf.mxu0 }
 0x4eb   : > { %v3353_v20 = vpop.f32.mrf.mxu3  ;;  %v3768_v58 = vadd.f32 %v3610_v27, %v3422_v36  ;;  %v3702_v12 = vpop.f32.mrf.mxu1 }
 0x4ec   : > { %v3423_v59 = vadd.f32 %v3353_v20, %v8666_v50 }
 0x4ed   : > { %3832 = vst [vmem:[%s8006_s9 + $0x170] sm:$0xff] %v3768_v58  ;;  %v3874_v5 = vadd.f32 %v3873_v6, %v3768_v58  ;;  %v3984_v41 = vmul.f32 %v3768_v58, %v3768_v58 }
 0x4ee   : > { %v3769_v11 = vadd.f32 %v3699_v33, %v3423_v59 }
 0x4ef   : > { %v4024_v45 = vadd.f32 %v4023_v43, %v3984_v41 }
 0x4f0   : > { %3833 = vst [vmem:[%s8006_s9 + $0x178] sm:$0xff] %v3769_v11  ;;  %v3911_v8 = vadd.f32 %v3910_v1, %v3769_v11  ;;  %v3985_v21 = vmul.f32 %v3769_v11, %v3769_v11  ;;  %v3267_v39 = vpop.f32.mrf.mxu2 }
 0x4f1   : > { %v3424_v24 = vadd.f32 %v3267_v39, %v7939_v25 }
 0x4f2   : > { %v4061_v46 = vadd.f32 %v4060_v60, %v3985_v21  ;;  %v3615_v55 = vpop.f32.mrf.mxu0 }
 0x4f3   : > { %v3356_v2 = vpop.f32.mrf.mxu3  ;;  %v3770_v34 = vadd.f32 %v3613_v57, %v3424_v24  ;;  %v3704_v29 = vpop.f32.mrf.mxu1 }
 0x4f4   : > { %v3425_v17 = vadd.f32 %v3356_v2, %v8667_v22 }
 0x4f5   : > { %3834 = vst [vmem:[%s8006_s9 + $0x180] sm:$0xff] %v3770_v34  ;;  %v3875_v14 = vadd.f32 %v3874_v5, %v3770_v34  ;;  %v3986_v19 = vmul.f32 %v3770_v34, %v3770_v34 }
 0x4f6   : > { %v3771_v23 = vadd.f32 %v3702_v12, %v3425_v17 }
 0x4f7   : > { %v4025_v37 = vadd.f32 %v4024_v45, %v3986_v19 }
 0x4f8   : > { %3835 = vst [vmem:[%s8006_s9 + $0x188] sm:$0xff] %v3771_v23  ;;  %v3912_v18 = vadd.f32 %v3911_v8, %v3771_v23  ;;  %v3987_v61 = vmul.f32 %v3771_v23, %v3771_v23  ;;  %v3269_v28 = vpop.f32.mrf.mxu2 }
 0x4f9   : > { %v3426_v25 = vadd.f32 %v3269_v28, %v8668_v32 }
 0x4fa   : > { %v4062_v13 = vadd.f32 %v4061_v46, %v3987_v61  ;;  %v3618_v56 = vpop.f32.mrf.mxu0 }
 0x4fb   : > { %v3358_v4 = vpop.f32.mrf.mxu3  ;;  %v3772_v30 = vadd.f32 %v3615_v55, %v3426_v25  ;;  %v3707_v53 = vpop.f32.mrf.mxu1 }
 0x4fc   : > { %v3427_v38 = vadd.f32 %v3358_v4, %v8669_v35 }
 0x4fd   : > { %3836 = vst [vmem:[%s8006_s9 + $0x190] sm:$0xff] %v3772_v30  ;;  %v3876_v9 = vadd.f32 %v3875_v14, %v3772_v30  ;;  %v3988_v27 = vmul.f32 %v3772_v30, %v3772_v30 }
 0x4fe   : > { %v3773_v42 = vadd.f32 %v3704_v29, %v3427_v38 }
 0x4ff   : > { %v4026_v0 = vadd.f32 %v4025_v37, %v3988_v27 }
 0x500   : > { %3837 = vst [vmem:[%s8006_s9 + $0x198] sm:$0xff] %v3773_v42  ;;  %v3913_v47 = vadd.f32 %v3912_v18, %v3773_v42  ;;  %v3989_v33 = vmul.f32 %v3773_v42, %v3773_v42  ;;  %v3272_v52 = vpop.f32.mrf.mxu2 }
 0x501   : > { %v3428_v1 = vadd.f32 %v3272_v52, %v7955_v48 }
 0x502   : > { %v4063_v6 = vadd.f32 %v4062_v13, %v3989_v33  ;;  %v3620_v60 = vpop.f32.mrf.mxu0 }
 0x503   : > { %v3361_v62 = vpop.f32.mrf.mxu3  ;;  %v3774_v26 = vadd.f32 %v3618_v56, %v3428_v1  ;;  %v3709_v63 = vpop.f32.mrf.mxu1 }
 0x504   : > { %v3429_v43 = vadd.f32 %v3361_v62, %v7957_v16 }
 0x505   : > { %3838 = vst [vmem:[%s8006_s9 + $0x1a0] sm:$0xff] %v3774_v26  ;;  %v3877_v20 = vadd.f32 %v3876_v9, %v3774_v26  ;;  %v3990_v50 = vmul.f32 %v3774_v26, %v3774_v26 }
 0x506   : > { %v3775_v36 = vadd.f32 %v3707_v53, %v3429_v43 }
 0x507   : > { %v4027_v58 = vadd.f32 %v4026_v0, %v3990_v50 }
 0x508   : > { %3839 = vst [vmem:[%s8006_s9 + $0x1a8] sm:$0xff] %v3775_v36  ;;  %v3914_v59 = vadd.f32 %v3913_v47, %v3775_v36  ;;  %v3991_v57 = vmul.f32 %v3775_v36, %v3775_v36  ;;  %v3274_v11 = vpop.f32.mrf.mxu2 }
 0x509   : > { %v3430_v48 = vadd.f32 %v3274_v11, %v7961_v40 }
 0x50a   : > { %v4064_v12 = vadd.f32 %v4063_v6, %v3991_v57  ;;  %v3623_v21 = vpop.f32.mrf.mxu0 }
 0x50b   : > { %v3363_v5 = vpop.f32.mrf.mxu3  ;;  %v3776_v41 = vadd.f32 %v3620_v60, %v3430_v48  ;;  %v3712_v39 = vpop.f32.mrf.mxu1 }
 0x50c   : > { %v3431_v16 = vadd.f32 %v3363_v5, %v7963_v54 }
 0x50d   : > { %3840 = vst [vmem:[%s8006_s9 + $0x1b0] sm:$0xff] %v3776_v41  ;;  %v3878_v45 = vadd.f32 %v3877_v20, %v3776_v41  ;;  %v3992_v46 = vmul.f32 %v3776_v41, %v3776_v41 }
 0x50e   : > { %v3777_v8 = vadd.f32 %v3709_v63, %v3431_v16 }
 0x50f   : > { %v4028_v22 = vadd.f32 %v4027_v58, %v3992_v46 }
 0x510   : > { %3841 = vst [vmem:[%s8006_s9 + $0x1b8] sm:$0xff] %v3777_v8  ;;  %v3915_v24 = vadd.f32 %v3914_v59, %v3777_v8  ;;  %v3993_v2 = vmul.f32 %v3777_v8, %v3777_v8  ;;  %v3277_v55 = vpop.f32.mrf.mxu2 }
 0x511   : > { %v3432_v40 = vadd.f32 %v3277_v55, %v7971_v15 }
 0x512   : > { %v4065_v17 = vadd.f32 %v4064_v12, %v3993_v2  ;;  %v3625_v37 = vpop.f32.mrf.mxu0 }
 0x513   : > { %v3366_v34 = vpop.f32.mrf.mxu3  ;;  %v3778_v29 = vadd.f32 %v3623_v21, %v3432_v40  ;;  %v3714_v28 = vpop.f32.mrf.mxu1 }
 0x514   : > { %v3433_v54 = vadd.f32 %v3366_v34, %v7973_v3 }
 0x515   : > { %3842 = vst [vmem:[%s8006_s9 + $0x1c0] sm:$0xff] %v3778_v29  ;;  %v3879_v14 = vadd.f32 %v3878_v45, %v3778_v29  ;;  %v3994_v19 = vmul.f32 %v3778_v29, %v3778_v29 }
 0x516   : > { %v3779_v23 = vadd.f32 %v3712_v39, %v3433_v54 }
 0x517   : > { %v4029_v13 = vadd.f32 %v4028_v22, %v3994_v19 }
 0x518   : > { %3843 = vst [vmem:[%s8006_s9 + $0x1c8] sm:$0xff] %v3779_v23  ;;  %v3916_v18 = vadd.f32 %v3915_v24, %v3779_v23  ;;  %v3995_v61 = vmul.f32 %v3779_v23, %v3779_v23  ;;  %v3279_v25 = vpop.f32.mrf.mxu2 }
 0x519   : > { %v3434_v15 = vadd.f32 %v3279_v25, %v7977_v49 }
 0x51a   : > { %v4066_v32 = vadd.f32 %v4065_v17, %v3995_v61  ;;  %v3628_v47 = vpop.f32.mrf.mxu0 }
 0x51b   : > { %v3368_v4 = vpop.f32.mrf.mxu3  ;;  %v3780_v35 = vadd.f32 %v3625_v37, %v3434_v15  ;;  %v3717_v0 = vpop.f32.mrf.mxu1 }
 0x51c   : > { %v3435_v3 = vadd.f32 %v3368_v4, %v7979_v44 }
 0x51d   : > { %3844 = vst [vmem:[%s8006_s9 + $0x1d0] sm:$0xff] %v3780_v35  ;;  %v3880_v56 = vadd.f32 %v3879_v14, %v3780_v35  ;;  %v3996_v30 = vmul.f32 %v3780_v35, %v3780_v35 }
 0x51e   : > { %v3781_v38 = vadd.f32 %v3714_v28, %v3435_v3 }
 0x51f   : > { %v4030_v9 = vadd.f32 %v4029_v13, %v3996_v30 }
 0x520   : > { %3845 = vst [vmem:[%s8006_s9 + $0x1d8] sm:$0xff] %v3781_v38  ;;  %v3917_v53 = vadd.f32 %v3916_v18, %v3781_v38  ;;  %v3997_v42 = vmul.f32 %v3781_v38, %v3781_v38  ;;  %v3282_v33 = vpop.f32.mrf.mxu2 }
 0x521   : > { %v3436_v49 = vadd.f32 %v3282_v33, %v7987_v31 }
 0x522   : > { %v4067_v27 = vadd.f32 %v4066_v32, %v3997_v42  ;;  %v3630_v31 = vpop.f32.mrf.mxu0  ;;  %v8670_v32 = vlaneseq }
 0x523   : > { %v3371_v6 = vpop.f32.mrf.mxu3  ;;  %v3782_v52 = vadd.f32 %v3628_v47, %v3436_v49 }
 0x524   : > { %v3437_v44 = vadd.f32 %v3371_v6, %v7990_v7  ;;  %v3719_v7 = vpop.f32.mrf.mxu1  ;;  %vm3934_vm7 = vcmp.lt.s32.totalorder %v8670_v32, 256 }
 0x525   : > { %3846 = vst [vmem:[%s8006_s9 + $0x1e0] sm:$0xff] %v3782_v52  ;;  %v3881_v62 = vadd.f32 %v3880_v56, %v3782_v52  ;;  %v3998_v43 = vmul.f32 %v3782_v52, %v3782_v52 }
 0x526   : > { %v3783_v1 = vadd.f32 %v3717_v0, %v3437_v44 }
 0x527   : > { %v4031_v63 = vadd.f32 %v4030_v9, %v3998_v43 }
 0x528   : > { %3847 = vst [vmem:[%s8006_s9 + $0x1e8] sm:$0xff] %v3783_v1  ;;  %v3918_v60 = vadd.f32 %v3917_v53, %v3783_v1  ;;  %v3999_v26 = vmul.f32 %v3783_v1, %v3783_v1  ;;  %v3284_v20 = vpop.f32.mrf.mxu2 }
 0x529   : > { %v3438_v50 = vadd.f32 %v3284_v20, %v7994_v10 }
 0x52a   : > { %v4068_v36 = vadd.f32 %v4067_v27, %v3999_v26 }
 0x52b   : > { %v3373_v59 = vpop.f32.mrf.mxu3  ;;  %v3784_v58 = vadd.f32 %v3630_v31, %v3438_v50 }
 0x52c   : > { %v3439_v57 = vadd.f32 %v3373_v59, %v7996_v51 }
 0x52d   : > { %3848 = vst [vmem:[%s8006_s9 + $0x1f0] sm:$0xff] %v3784_v58  ;;  %v3882_v11 = vadd.f32 %v3881_v62, %v3784_v58  ;;  %v4000_v48 = vmul.f32 %v3784_v58, %v3784_v58 }
 0x52e   : > { %v3785_v12 = vadd.f32 %v3719_v7, %v3439_v57 }
 0x52f   : > { %v3883_v41 = vrot.slane %v3882_v11, 4  ;;  %v4032_v8 = vadd.f32 %v4031_v63, %v4000_v48 }
 0x530   : > { %3849 = vst [vmem:[%s8006_s9 + $0x1f8] sm:$0xff] %v3785_v12  ;;  %v3919_v5 = vadd.f32 %v3918_v60, %v3785_v12  ;;  %v4001_v16 = vmul.f32 %v3785_v12, %v3785_v12 }
 0x531   : > { %v3884_v46 = vadd.f32 %v3883_v41, %v3882_v11  ;;  %v4033_v39 = vrot.slane %v4032_v8, 4 }
 0x532   : > { %v3920_v21 = vrot.slane %v3919_v5, 4  ;;  %v4069_v45 = vadd.f32 %v4068_v36, %v4001_v16 }
 0x533   : > { %v3885_v2 = vrot.slane %v3884_v46, 2  ;;  %v4034_v22 = vadd.f32 %v4033_v39, %v4032_v8 }
 0x534   : > { %v3921_v10 = vadd.f32 %v3920_v21, %v3919_v5  ;;  %v4070_v24 = vrot.slane %v4069_v45, 4 }
 0x535   : > { %v3886_v55 = vadd.f32 %v3885_v2, %v3884_v46  ;;  %v4035_v40 = vrot.slane %v4034_v22, 2 }
 0x536   : > { %v3922_v51 = vrot.slane %v3921_v10, 2  ;;  %v4071_v17 = vadd.f32 %v4070_v24, %v4069_v45 }
 0x537   : > { %v4036_v29 = vadd.f32 %v4035_v40, %v4034_v22  ;;  %v3887_v23 = vrot.slane %v3886_v55, 1 }
 0x538   : > { %v3923_v34 = vadd.f32 %v3922_v51, %v3921_v10  ;;  %v4072_v54 = vrot.slane %v4071_v17, 2 }
 0x539   : > { %v4037_v18 = vrot.slane %v4036_v29, 1  ;;  %v3888_v13 = vadd.f32 %v3887_v23, %v3886_v55 }
 0x53a   : > { %v3924_v14 = vrot.slane %v3923_v34, 1  ;;  %v4073_v19 = vadd.f32 %v4072_v54, %v4071_v17 }
 0x53b   : > { %v4038_v15 = vadd.f32 %v4037_v18, %v4036_v29 }
 0x53c   : > { %v3925_v61 = vadd.f32 %v3924_v14, %v3923_v34  ;;  %v4074_v37 = vrot.slane %v4073_v19, 1 }
 0x53e   : > { %v3928_v28 = vrot.slane %v3925_v61, 7  ;;  %v4075_v25 = vadd.f32 %v4074_v37, %v4073_v19 }
 0x540   : > { %v3930_v4 = vsel %vm3929_vm6, %v3888_v13, %v3928_v28  ;;  %v4078_v3 = vrot.slane %v4075_v25, 7 }
 0x541   : > { %3936 = vst.msk [vmem:[%s6484_s12] ss:$8 sm:$0x3] %vm3934_vm7, %v3930_v4 }
 0x542   : > { %v4079_v35 = vsel %vm3929_vm6, %v4038_v15, %v4078_v3 }
 0x543   : > { %5038 = vst.msk [vmem:[%s6484_s12 + $0x1] ss:$8 sm:$0x3] %vm3934_vm7, %v4079_v35 }
 0x544 PF: > { %s15_s15 = sadd.s32 1, %s5268_s15  }
 0x545   : > { %p12_p5 = scmp.ge.s32.totalorder %s15_s15, 4  }
 0x547   :  { %14 = sbr.rel (!%p12_p5) target bundleno = 1 (0x1), region = 75 }

</bundles_post_ra>
